<compile_context>
chip_gen: v7x
topology: tpu7x:2x2x1
jax: 0.10.0
libtpu: 0.0.40
codegen_flags: <defaults>
</compile_context>

<pallas_src>
import jax
import jax.numpy as jnp
from jax.experimental import pallas as pl
from jax.experimental.pallas import tpu as pltpu

EPS = 1e-5
SEQ = 20  # input sequence length expected by the module


def baseline_conv_kernel(x_ref, keep_l_ref, keep_r1_ref, keep_r2_ref, valid2_ref,
                         w1_ref, g1_ref, be1_ref,
                         w2_ref, g2_ref, be2_ref,
                         wfc1_ref, bfc1_ref, wfc2_ref, bfc2_ref,
                         out_ref):
    R = x_ref.shape[0]  # B * 20

    def conv_bn_relu(h, step, keep_l, keep_r, w_ref, g_ref, be_ref, inv_n,
                     valid=None):
        # Conv1d(k=3, pad=1) over the (logically strided) sequence: the
        # neighbours are +/- `step` rows; boundary taps (and cross-batch wrap
        # rows) are zeroed by the precomputed keep masks.
        h_prev = pltpu.roll(h, shift=step, axis=0) * keep_l        # h[r-step]
        h_next = pltpu.roll(h, shift=R - step, axis=0) * keep_r    # h[r+step]
        y = jnp.dot(jnp.concatenate([h_prev, h, h_next], axis=1), w_ref[...],
                    preferred_element_type=jnp.float32)
        # Conv bias omitted: it cancels exactly under training-mode BatchNorm.
        # BatchNorm1d (training-mode batch stats), one reduction pass.
        yv = y if valid is None else y * valid
        mean = jnp.sum(yv, axis=0, keepdims=True) * inv_n
        meansq = jnp.sum(yv * y, axis=0, keepdims=True) * inv_n
        scale = g_ref[...] * jax.lax.rsqrt(meansq - mean * mean + EPS)
        shift = be_ref[...] - mean * scale
        return jnp.maximum(y * scale + shift, 0.0)

    x = x_ref[...]                                   # (R, 4), all rows valid
    keep_l = keep_l_ref[...]

    # Layer 1: conv1 -> bn1 -> relu (all R rows are real samples).
    h1 = conv_bn_relu(x, 1, keep_l, keep_r1_ref[...],
                      w1_ref, g1_ref, be1_ref, 1.0 / R)            # (R, 8)
    # MaxPool1d(2): result valid at rows with pos % 2 == 0.
    m1 = jnp.maximum(h1, pltpu.roll(h1, shift=R - 1, axis=0))

    # Layer 2 on the logically-pooled rows (neighbours are +/- 2 rows).
    h2 = conv_bn_relu(m1, 2, keep_l, keep_r2_ref[...],
                      w2_ref, g2_ref, be2_ref, 2.0 / R,
                      valid=valid2_ref[...])                       # (R, 16)
    # MaxPool1d(2): result valid at rows with pos % 4 == 0.
    m2 = jnp.maximum(h2, pltpu.roll(h2, shift=R - 2, axis=0))

    # Flatten (torch order c*5+l, weights re-ordered to l*16+c in the wrapper)
    # + fc1 + ReLU + fc2, computed at every row; valid at pos == 0.
    hcat = jnp.concatenate(
        [m2] + [pltpu.roll(m2, shift=R - 4 * q, axis=0) for q in range(1, 5)],
        axis=1)                                                    # (R, 80)
    z = jnp.maximum(
        jnp.dot(hcat, wfc1_ref[...], preferred_element_type=jnp.float32)
        + bfc1_ref[...], 0.0)                                      # (R, 32)
    out_ref[...] = (jnp.dot(z, wfc2_ref[...], preferred_element_type=jnp.float32)
                    + bfc2_ref[...])                               # (R, 1)


def baseline_conv_forward(x_ncl, params):
    """x_ncl: (B, 4, 20) float32, torch NCL convention. Returns (B, 1)."""
    B, Cin, L = x_ncl.shape
    assert (Cin, L) == (4, SEQ)
    R = B * L
    x2d = jnp.transpose(x_ncl, (0, 2, 1)).reshape(R, Cin)

    (w1, _b1, g1, be1, w2, _b2, g2, be2, wfc1, bfc1, wfc2, bfc2) = params
    # Conv biases _b1/_b2 are mathematically cancelled by training-mode BN.
    # Pre-stack conv weights for the fused single-matmul form (rows = k*Cin+c).
    w1cat = jnp.transpose(w1, (2, 1, 0)).reshape(3 * Cin, w1.shape[0])      # (12, 8)
    w2cat = jnp.transpose(w2, (2, 1, 0)).reshape(3 * w2.shape[1], w2.shape[0])  # (24, 16)
    # torch flatten order of (B, 16, 5) is column c*5+l; re-order fc1 weight
    # rows to the kernel's lane order l*16+c.
    wfc1k = jnp.transpose(wfc1.reshape(32, 16, 5), (2, 1, 0)).reshape(80, 32)
    wfc2k = wfc2.T                                                          # (32, 1)

    # Constant boundary / validity masks, hoisted out of the kernel.
    pos = jnp.arange(R, dtype=jnp.int32) % L
    col = lambda m: m.astype(jnp.float32).reshape(R, 1)
    keep_l = col(pos != 0)        # zero the left-neighbour tap at seq start (both convs)
    keep_r1 = col(pos != L - 1)   # zero the right-neighbour tap, layer 1
    keep_r2 = col(pos != L - 2)   # zero the right-neighbour tap, layer 2 (stride-2 rows)
    valid2 = col(pos % 2 == 0)    # rows that are real after pool1 (for BN2 stats)

    args = (x2d, keep_l, keep_r1, keep_r2, valid2,
            w1cat, g1.reshape(1, -1), be1.reshape(1, -1),
            w2cat, g2.reshape(1, -1), be2.reshape(1, -1),
            wfc1k, bfc1.reshape(1, -1), wfc2k, bfc2.reshape(1, -1))

    vmem = lambda: pl.BlockSpec(memory_space=pltpu.MemorySpace.VMEM)
    out_rows = pl.pallas_call(
        baseline_conv_kernel,
        out_shape=jax.ShapeDtypeStruct((R, 1), jnp.float32),
        in_specs=[vmem() for _ in args],
        out_specs=vmem(),
    )(*args)
    return out_rows[::L]          # row b*L carries the result for batch b


def ref_forward(x, params):
    """Pure-JAX reference in torch NCL layout (same semantics)."""
    (w1, b1, g1, be1, w2, b2, g2, be2, wfc1, bfc1, wfc2, bfc2) = params

    def conv1d(h, w, b):
        _, _, L = h.shape
        hp = jnp.pad(h, ((0, 0), (0, 0), (1, 1)))
        y = sum(jnp.einsum('oc,bcl->bol', w[:, :, k], hp[:, :, k:k + L])
                for k in range(3))
        return y + b[None, :, None]

    def bn(h, g, be):
        mean = jnp.mean(h, axis=(0, 2), keepdims=True)
        var = jnp.mean((h - mean) ** 2, axis=(0, 2), keepdims=True)
        return (h - mean) / jnp.sqrt(var + EPS) * g[None, :, None] + be[None, :, None]

    def pool(h):
        Bb, C, L = h.shape
        return h.reshape(Bb, C, L // 2, 2).max(axis=-1)

    h = pool(jax.nn.relu(bn(conv1d(x, w1, b1), g1, be1)))
    h = pool(jax.nn.relu(bn(conv1d(h, w2, b2), g2, be2)))
    h = h.reshape(h.shape[0], -1)
    h = jax.nn.relu(h @ wfc1.T + bfc1)
    return h @ wfc2.T + bfc2


if __name__ == "__main__":
    key = jax.random.PRNGKey(0)
    ks = jax.random.split(key, 13)
    B = 8
    x = jax.random.normal(ks[0], (B, 4, 20), jnp.float32)
    params = (
        0.2 * jax.random.normal(ks[1], (8, 4, 3), jnp.float32),    # conv1.weight
        0.1 * jax.random.normal(ks[2], (8,), jnp.float32),         # conv1.bias
        1.0 + 0.1 * jax.random.normal(ks[3], (8,), jnp.float32),   # bn1.weight
        0.1 * jax.random.normal(ks[4], (8,), jnp.float32),         # bn1.bias
        0.2 * jax.random.normal(ks[5], (16, 8, 3), jnp.float32),   # conv2.weight
        0.1 * jax.random.normal(ks[6], (16,), jnp.float32),        # conv2.bias
        1.0 + 0.1 * jax.random.normal(ks[7], (16,), jnp.float32),  # bn2.weight
        0.1 * jax.random.normal(ks[8], (16,), jnp.float32),        # bn2.bias
        0.2 * jax.random.normal(ks[9], (32, 80), jnp.float32),     # fc1.weight
        0.1 * jax.random.normal(ks[10], (32,), jnp.float32),       # fc1.bias
        0.2 * jax.random.normal(ks[11], (1, 32), jnp.float32),     # fc2.weight
        0.1 * jax.random.normal(ks[12], (1,), jnp.float32),        # fc2.bias
    )

    out = jax.block_until_ready(baseline_conv_forward(x, params))
    ref = ref_forward(x, params)
    assert out.shape == (B, 1), out.shape
    assert jnp.allclose(out, ref, atol=2e-4, rtol=2e-4), (out, ref)
    print("KERNEL_OK")
</pallas_src>

<mosaic_0001>
module attributes {stable_mosaic.version = 11 : i64} {
  func.func @baseline_conv_kernel(%arg0: memref<160x4xf32, #tpu.memory_space<vmem>>, %arg1: memref<160x1xf32, #tpu.memory_space<vmem>>, %arg2: memref<160x1xf32, #tpu.memory_space<vmem>>, %arg3: memref<160x1xf32, #tpu.memory_space<vmem>>, %arg4: memref<160x1xf32, #tpu.memory_space<vmem>>, %arg5: memref<12x8xf32, #tpu.memory_space<vmem>>, %arg6: memref<1x8xf32, #tpu.memory_space<vmem>>, %arg7: memref<1x8xf32, #tpu.memory_space<vmem>>, %arg8: memref<24x16xf32, #tpu.memory_space<vmem>>, %arg9: memref<1x16xf32, #tpu.memory_space<vmem>>, %arg10: memref<1x16xf32, #tpu.memory_space<vmem>>, %arg11: memref<80x32xf32, #tpu.memory_space<vmem>>, %arg12: memref<1x32xf32, #tpu.memory_space<vmem>>, %arg13: memref<32x1xf32, #tpu.memory_space<vmem>>, %arg14: memref<1x1xf32, #tpu.memory_space<vmem>>, %arg15: memref<160x1xf32, #tpu.memory_space<vmem>>) attributes {dimension_semantics = [], scalar_prefetch = 0 : i64, scratch_operands = 0 : i64, tpu.core_type = #tpu.core_type<tc>} {
    %c0 = arith.constant 0 : index
    %c0_0 = arith.constant 0 : index
    %0 = vector.load %arg0[%c0, %c0_0] : memref<160x4xf32, #tpu.memory_space<vmem>>, vector<160x4xf32>
    %c0_1 = arith.constant 0 : index
    %c0_2 = arith.constant 0 : index
    %1 = vector.load %arg1[%c0_1, %c0_2] : memref<160x1xf32, #tpu.memory_space<vmem>>, vector<160x1xf32>
    %c0_3 = arith.constant 0 : index
    %c0_4 = arith.constant 0 : index
    %2 = vector.load %arg2[%c0_3, %c0_4] : memref<160x1xf32, #tpu.memory_space<vmem>>, vector<160x1xf32>
    %c1_i32 = arith.constant 1 : i32
    %3 = tpu.dynamic_rotate %0 by %c1_i32 dim 0 : vector<160x4xf32>, i32 -> vector<160x4xf32>
    %4 = vector.broadcast %1 : vector<160x1xf32> to vector<160x4xf32>
    %5 = arith.mulf %3, %4 : vector<160x4xf32>
    %c159_i32 = arith.constant 159 : i32
    %6 = tpu.dynamic_rotate %0 by %c159_i32 dim 0 : vector<160x4xf32>, i32 -> vector<160x4xf32>
    %7 = vector.broadcast %2 : vector<160x1xf32> to vector<160x4xf32>
    %8 = arith.mulf %6, %7 : vector<160x4xf32>
    %9 = tpu.concatenate %5, %0, %8 in 1 : vector<160x4xf32>, vector<160x4xf32>, vector<160x4xf32> -> vector<160x12xf32>
    %c0_5 = arith.constant 0 : index
    %c0_6 = arith.constant 0 : index
    %10 = vector.load %arg5[%c0_5, %c0_6] : memref<12x8xf32, #tpu.memory_space<vmem>>, vector<12x8xf32>
    %cst = arith.constant dense<0.000000e+00> : vector<160x8xf32>
    %11 = tpu.matmul %9, %10, %cst {dimension_numbers = #tpu.dot_dimension_numbers<[1], [0], [0], [1], [0, 0, 1, 1], [], []>} : vector<160x12xf32>, vector<12x8xf32>, vector<160x8xf32> -> vector<160x8xf32>
    %cst_7 = arith.constant dense<0.000000e+00> : vector<8xf32>
    %12 = vector.multi_reduction <add>, %11, %cst_7 [0] : vector<160x8xf32> to vector<8xf32>
    %13 = vector.shape_cast %12 : vector<8xf32> to vector<1x8xf32>
    %cst_8 = arith.constant 6.250000e-03 : f32
    %14 = vector.broadcast %cst_8 : f32 to vector<1x8xf32>
    %15 = arith.mulf %13, %14 : vector<1x8xf32>
    %16 = arith.mulf %11, %11 : vector<160x8xf32>
    %cst_9 = arith.constant dense<0.000000e+00> : vector<8xf32>
    %17 = vector.multi_reduction <add>, %16, %cst_9 [0] : vector<160x8xf32> to vector<8xf32>
    %18 = vector.shape_cast %17 : vector<8xf32> to vector<1x8xf32>
    %cst_10 = arith.constant 6.250000e-03 : f32
    %19 = vector.broadcast %cst_10 : f32 to vector<1x8xf32>
    %20 = arith.mulf %18, %19 : vector<1x8xf32>
    %c0_11 = arith.constant 0 : index
    %c0_12 = arith.constant 0 : index
    %21 = vector.load %arg6[%c0_11, %c0_12] : memref<1x8xf32, #tpu.memory_space<vmem>>, vector<1x8xf32>
    %22 = arith.mulf %15, %15 : vector<1x8xf32>
    %23 = arith.subf %20, %22 : vector<1x8xf32>
    %cst_13 = arith.constant 9.99999974E-6 : f32
    %24 = vector.broadcast %cst_13 : f32 to vector<1x8xf32>
    %25 = arith.addf %23, %24 : vector<1x8xf32>
    %26 = math.rsqrt %25 : vector<1x8xf32>
    %27 = arith.mulf %21, %26 : vector<1x8xf32>
    %c0_14 = arith.constant 0 : index
    %c0_15 = arith.constant 0 : index
    %28 = vector.load %arg7[%c0_14, %c0_15] : memref<1x8xf32, #tpu.memory_space<vmem>>, vector<1x8xf32>
    %29 = arith.mulf %15, %27 : vector<1x8xf32>
    %30 = arith.subf %28, %29 : vector<1x8xf32>
    %31 = vector.broadcast %27 : vector<1x8xf32> to vector<160x8xf32>
    %32 = arith.mulf %11, %31 : vector<160x8xf32>
    %33 = vector.broadcast %30 : vector<1x8xf32> to vector<160x8xf32>
    %34 = arith.addf %32, %33 : vector<160x8xf32>
    %cst_16 = arith.constant 0.000000e+00 : f32
    %35 = vector.broadcast %cst_16 : f32 to vector<160x8xf32>
    %36 = arith.maximumf %34, %35 : vector<160x8xf32>
    %c159_i32_17 = arith.constant 159 : i32
    %37 = tpu.dynamic_rotate %36 by %c159_i32_17 dim 0 : vector<160x8xf32>, i32 -> vector<160x8xf32>
    %38 = arith.maximumf %36, %37 : vector<160x8xf32>
    %c0_18 = arith.constant 0 : index
    %c0_19 = arith.constant 0 : index
    %39 = vector.load %arg3[%c0_18, %c0_19] : memref<160x1xf32, #tpu.memory_space<vmem>>, vector<160x1xf32>
    %c0_20 = arith.constant 0 : index
    %c0_21 = arith.constant 0 : index
    %40 = vector.load %arg4[%c0_20, %c0_21] : memref<160x1xf32, #tpu.memory_space<vmem>>, vector<160x1xf32>
    %c2_i32 = arith.constant 2 : i32
    %41 = tpu.dynamic_rotate %38 by %c2_i32 dim 0 : vector<160x8xf32>, i32 -> vector<160x8xf32>
    %42 = vector.broadcast %1 : vector<160x1xf32> to vector<160x8xf32>
    %43 = arith.mulf %41, %42 : vector<160x8xf32>
    %c158_i32 = arith.constant 158 : i32
    %44 = tpu.dynamic_rotate %38 by %c158_i32 dim 0 : vector<160x8xf32>, i32 -> vector<160x8xf32>
    %45 = vector.broadcast %39 : vector<160x1xf32> to vector<160x8xf32>
    %46 = arith.mulf %44, %45 : vector<160x8xf32>
    %47 = tpu.concatenate %43, %38, %46 in 1 : vector<160x8xf32>, vector<160x8xf32>, vector<160x8xf32> -> vector<160x24xf32>
    %c0_22 = arith.constant 0 : index
    %c0_23 = arith.constant 0 : index
    %48 = vector.load %arg8[%c0_22, %c0_23] : memref<24x16xf32, #tpu.memory_space<vmem>>, vector<24x16xf32>
    %cst_24 = arith.constant dense<0.000000e+00> : vector<160x16xf32>
    %49 = tpu.matmul %47, %48, %cst_24 {dimension_numbers = #tpu.dot_dimension_numbers<[1], [0], [0], [1], [0, 0, 1, 1], [], []>} : vector<160x24xf32>, vector<24x16xf32>, vector<160x16xf32> -> vector<160x16xf32>
    %50 = vector.broadcast %40 : vector<160x1xf32> to vector<160x16xf32>
    %51 = arith.mulf %49, %50 : vector<160x16xf32>
    %cst_25 = arith.constant dense<0.000000e+00> : vector<16xf32>
    %52 = vector.multi_reduction <add>, %51, %cst_25 [0] : vector<160x16xf32> to vector<16xf32>
    %53 = vector.shape_cast %52 : vector<16xf32> to vector<1x16xf32>
    %cst_26 = arith.constant 1.250000e-02 : f32
    %54 = vector.broadcast %cst_26 : f32 to vector<1x16xf32>
    %55 = arith.mulf %53, %54 : vector<1x16xf32>
    %56 = arith.mulf %51, %49 : vector<160x16xf32>
    %cst_27 = arith.constant dense<0.000000e+00> : vector<16xf32>
    %57 = vector.multi_reduction <add>, %56, %cst_27 [0] : vector<160x16xf32> to vector<16xf32>
    %58 = vector.shape_cast %57 : vector<16xf32> to vector<1x16xf32>
    %cst_28 = arith.constant 1.250000e-02 : f32
    %59 = vector.broadcast %cst_28 : f32 to vector<1x16xf32>
    %60 = arith.mulf %58, %59 : vector<1x16xf32>
    %c0_29 = arith.constant 0 : index
    %c0_30 = arith.constant 0 : index
    %61 = vector.load %arg9[%c0_29, %c0_30] : memref<1x16xf32, #tpu.memory_space<vmem>>, vector<1x16xf32>
    %62 = arith.mulf %55, %55 : vector<1x16xf32>
    %63 = arith.subf %60, %62 : vector<1x16xf32>
    %cst_31 = arith.constant 9.99999974E-6 : f32
    %64 = vector.broadcast %cst_31 : f32 to vector<1x16xf32>
    %65 = arith.addf %63, %64 : vector<1x16xf32>
    %66 = math.rsqrt %65 : vector<1x16xf32>
    %67 = arith.mulf %61, %66 : vector<1x16xf32>
    %c0_32 = arith.constant 0 : index
    %c0_33 = arith.constant 0 : index
    %68 = vector.load %arg10[%c0_32, %c0_33] : memref<1x16xf32, #tpu.memory_space<vmem>>, vector<1x16xf32>
    %69 = arith.mulf %55, %67 : vector<1x16xf32>
    %70 = arith.subf %68, %69 : vector<1x16xf32>
    %71 = vector.broadcast %67 : vector<1x16xf32> to vector<160x16xf32>
    %72 = arith.mulf %49, %71 : vector<160x16xf32>
    %73 = vector.broadcast %70 : vector<1x16xf32> to vector<160x16xf32>
    %74 = arith.addf %72, %73 : vector<160x16xf32>
    %cst_34 = arith.constant 0.000000e+00 : f32
    %75 = vector.broadcast %cst_34 : f32 to vector<160x16xf32>
    %76 = arith.maximumf %74, %75 : vector<160x16xf32>
    %c158_i32_35 = arith.constant 158 : i32
    %77 = tpu.dynamic_rotate %76 by %c158_i32_35 dim 0 : vector<160x16xf32>, i32 -> vector<160x16xf32>
    %78 = arith.maximumf %76, %77 : vector<160x16xf32>
    %c156_i32 = arith.constant 156 : i32
    %79 = tpu.dynamic_rotate %78 by %c156_i32 dim 0 : vector<160x16xf32>, i32 -> vector<160x16xf32>
    %c152_i32 = arith.constant 152 : i32
    %80 = tpu.dynamic_rotate %78 by %c152_i32 dim 0 : vector<160x16xf32>, i32 -> vector<160x16xf32>
    %c148_i32 = arith.constant 148 : i32
    %81 = tpu.dynamic_rotate %78 by %c148_i32 dim 0 : vector<160x16xf32>, i32 -> vector<160x16xf32>
    %c144_i32 = arith.constant 144 : i32
    %82 = tpu.dynamic_rotate %78 by %c144_i32 dim 0 : vector<160x16xf32>, i32 -> vector<160x16xf32>
    %83 = tpu.concatenate %78, %79, %80, %81, %82 in 1 : vector<160x16xf32>, vector<160x16xf32>, vector<160x16xf32>, vector<160x16xf32>, vector<160x16xf32> -> vector<160x80xf32>
    %c0_36 = arith.constant 0 : index
    %c0_37 = arith.constant 0 : index
    %84 = vector.load %arg11[%c0_36, %c0_37] : memref<80x32xf32, #tpu.memory_space<vmem>>, vector<80x32xf32>
    %cst_38 = arith.constant dense<0.000000e+00> : vector<160x32xf32>
    %85 = tpu.matmul %83, %84, %cst_38 {dimension_numbers = #tpu.dot_dimension_numbers<[1], [0], [0], [1], [0, 0, 1, 1], [], []>} : vector<160x80xf32>, vector<80x32xf32>, vector<160x32xf32> -> vector<160x32xf32>
    %c0_39 = arith.constant 0 : index
    %c0_40 = arith.constant 0 : index
    %86 = vector.load %arg12[%c0_39, %c0_40] : memref<1x32xf32, #tpu.memory_space<vmem>>, vector<1x32xf32>
    %87 = vector.broadcast %86 : vector<1x32xf32> to vector<160x32xf32>
    %88 = arith.addf %85, %87 : vector<160x32xf32>
    %cst_41 = arith.constant 0.000000e+00 : f32
    %89 = vector.broadcast %cst_41 : f32 to vector<160x32xf32>
    %90 = arith.maximumf %88, %89 : vector<160x32xf32>
    %c0_42 = arith.constant 0 : index
    %c0_43 = arith.constant 0 : index
    %91 = vector.load %arg13[%c0_42, %c0_43] : memref<32x1xf32, #tpu.memory_space<vmem>>, vector<32x1xf32>
    %cst_44 = arith.constant dense<0.000000e+00> : vector<160x1xf32>
    %92 = tpu.matmul %90, %91, %cst_44 {dimension_numbers = #tpu.dot_dimension_numbers<[1], [0], [0], [1], [0, 0, 1, 1], [], []>} : vector<160x32xf32>, vector<32x1xf32>, vector<160x1xf32> -> vector<160x1xf32>
    %c0_45 = arith.constant 0 : index
    %c0_46 = arith.constant 0 : index
    %93 = vector.load %arg14[%c0_45, %c0_46] : memref<1x1xf32, #tpu.memory_space<vmem>>, vector<1x1xf32>
    %94 = vector.broadcast %93 : vector<1x1xf32> to vector<160x1xf32>
    %95 = arith.addf %92, %94 : vector<160x1xf32>
    %c0_47 = arith.constant 0 : index
    %c0_48 = arith.constant 0 : index
    %96 = vector.load %arg15[%c0_47, %c0_48] : memref<160x1xf32, #tpu.memory_space<vmem>>, vector<160x1xf32>
    tpu.vector_store %arg15[%c0_47, %c0_48], %95 {strides = array<i32>} : memref<160x1xf32, #tpu.memory_space<vmem>>, vector<160x1xf32>,
    return
  }
}

</mosaic_0001>

<bundles_post_ra>
// kernel: tpu_custom_call.1
= control target key start
LH: loop header
LB: loop body
LE: loop exit
PB: predicated region body
PF: predicated region fallthrough
CT: control target
= control target key end

     0   :  { %v3508_v0 = vmov 0   ;;  %v132_v3 = vlaneseq  ;;  %s3509_s25 = smov 4   ;;  %vm701_vm2 = vcmask 1043456   ;;  %vm3510_vm3 = vmmov 1   ;;  %s3515_s28 = smov 48   ;;  %s5973_s2 = inlined_call_operand.vmem [shape: f32[160,1], index: 2, kind: input, shape index: {}]   ;;  %s5974_s0 = inlined_call_operand.vmem [shape: f32[160,4], index: 0, kind: input, shape index: {}]   ;;  %s5975_s1 = inlined_call_operand.vmem [shape: f32[160,1], index: 1, kind: input, shape index: {}]   ;;  %s5976_s5 = inlined_call_operand.vmem [shape: f32[12,8], index: 5, kind: input, shape index: {}]   ;;  %s5977_s3 = inlined_call_operand.vmem [shape: f32[160,1], index: 3, kind: input, shape index: {}]   ;;  %s5978_s6 = inlined_call_operand.vmem [shape: f32[1,8], index: 6, kind: input, shape index: {}]   ;;  %s5979_s7 = inlined_call_operand.vmem [shape: f32[1,8], index: 7, kind: input, shape index: {}]   ;;  %s5980_s8 = inlined_call_operand.vmem [shape: f32[24,16], index: 8, kind: input, shape index: {}]   ;;  %s5981_s4 = inlined_call_operand.vmem [shape: f32[160,1], index: 4, kind: input, shape index: {}]   ;;  %s5982_s9 = inlined_call_operand.vmem [shape: f32[1,16], index: 9, kind: input, shape index: {}]   ;;  %s5983_s10 = inlined_call_operand.vmem [shape: f32[1,16], index: 10, kind: input, shape index: {}]   ;;  %s5984_s11 = inlined_call_operand.vmem [shape: f32[80,32], index: 11, kind: input, shape index: {}]   ;;  %s5985_s13 = inlined_call_operand.vmem [shape: f32[32,1], index: 13, kind: input, shape index: {}]   ;;  %s5986_s14 = inlined_call_operand.<no memory space> [shape: f32[1,1], index: 14, kind: input, shape index: {}]   ;;  %s5987_s12 = inlined_call_operand.vmem [shape: f32[1,32], index: 12, kind: input, shape index: {}]   ;;  %s5988_s15 = inlined_call_operand.vmem [shape: f32[160,1], index: 15, kind: output, shape index: {}]  }
   0x1   :  { %3503 = vset.pattern.permute.xlu1 %v3508_v0  ;;  %3502 = vset.pattern.permute.xlu0 %v3508_v0  ;;  %v94_v1 = vld [vmem:[%s5973_s2 + $0x10] sm:$0xff]  ;;  %v92_v2 = vld [vmem:[%s5973_s2] sm:$0xff]  ;;  %v95_v4 = vld [vmem:[%s5973_s2 + $0x18] sm:$0xff]  ;;  %vm596_vm5 = vcmask 31744   ;;  %vm617_vm6 = vcmask 64512   ;;  %vm640_vm7 = vcmask 97280  }
   0x2   :  { %328 = vperm.xlu1 %3503, %v94_v1   ;;  %318 = vperm.xlu0 %3502, %v92_v2   ;;  %v93_v5 = vld [vmem:[%s5973_s2 + $0x8] sm:$0xff]  ;;  %v3608_v6 = vshrl.u32 %v132_v3, 7  ;;  %v96_v8 = vld [vmem:[%s5973_s2 + $0x20] sm:$0xff]  ;;  %v99_v10 = vld [vmem:[%s5973_s2 + $0x38] sm:$0xff]  ;;  %vm1565_vm10 = vcmask 130048   ;;  %vm1589_vm11 = vcmask 195584  }
   0x3   :  { %v97_v7 = vld [vmem:[%s5973_s2 + $0x28] sm:$0xff]  ;;  %v3628_v12 = vld [vmem:[%s5974_s0] sm:$0xff]  ;;  %v98_v13 = vld [vmem:[%s5973_s2 + $0x30] sm:$0xff]  ;;  %vm2529_vm13 = vcmask 261120   ;;  %vm2550_vm14 = vcmask 392192   ;;  %vm2571_vm15 = vcmask 523264  }
   0x4   :  { %v3619_v9 = vld [vmem:[%s5974_s0 + $0x8] sm:$0xff]  ;;  %vm295_vm0 = vcmp.lt.s32.totalorder %v3608_v6, 7  ;;  %v275_v14 = vrot.slane %v3628_v12, 1  ;;  %v3638_v15 = vld [vmem:[%s5974_s0 + $0x18] sm:$0xff]  ;;  %v3643_v16 = vld [vmem:[%s5974_s0 + $0x10] sm:$0xff]  ;;  %v112_v41 = vrot.slane %v3628_v12, 7 }
   0x5   :  { %v276_v11 = vrot.slane %v3619_v9, 1  ;;  %v278_v17 = vrot.slane %v3638_v15, 1  ;;  %v277_v18 = vrot.slane %v3643_v16, 1  ;;  %v3650_v19 = vld [vmem:[%s5974_s0 + $0x28] sm:$0xff]  ;;  %v3656_v21 = vld [vmem:[%s5974_s0 + $0x20] sm:$0xff]  ;;  %v103_v30 = vld [vmem:[%s5973_s2 + $0x58] sm:$0xff] }
   0x6   :  { %333 = vperm.xlu1 %3503, %v95_v4   ;;  %323 = vperm.xlu0 %3502, %v93_v5   ;;  %v280_v20 = vrot.slane %v3650_v19, 1  ;;  %v279_v23 = vrot.slane %v3656_v21, 1  ;;  %v101_v26 = vld [vmem:[%s5973_s2 + $0x48] sm:$0xff]  ;;  %v100_v27 = vld [vmem:[%s5973_s2 + $0x40] sm:$0xff]  ;;  %v102_v31 = vld [vmem:[%s5973_s2 + $0x50] sm:$0xff]  ;;  %v113_v40 = vrot.slane %v3619_v9, 7 }
   0x7   :  { %v3662_v22 = vsel %vm295_vm0, %v275_v14, %v276_v11  ;;  %v3667_v24 = vsel %vm295_vm0, %v277_v18, %v278_v17  ;;  %v3671_v25 = vsel %vm295_vm0, %v276_v11, %v277_v18  ;;  %v105_v32 = vld [vmem:[%s5973_s2 + $0x68] sm:$0xff]  ;;  %v104_v33 = vld [vmem:[%s5973_s2 + $0x60] sm:$0xff]  ;;  %v107_v34 = vld [vmem:[%s5973_s2 + $0x78] sm:$0xff]  ;;  %vm134_vm1 = vcmp.lt.s32.totalorder %v3608_v6, 1 }
   0x8   :  { %v3681_v28 = vsel %vm295_vm0, %v278_v17, %v279_v23  ;;  %v3687_v29 = vsel %vm295_vm0, %v279_v23, %v280_v20  ;;  %v106_v35 = vld [vmem:[%s5973_s2 + $0x70] sm:$0xff]  ;;  %v109_v36 = vld [vmem:[%s5973_s2 + $0x88] sm:$0xff]  ;;  %v108_v37 = vld [vmem:[%s5973_s2 + $0x80] sm:$0xff]  ;;  %v115_v44 = vrot.slane %v3638_v15, 7  ;;  %v114_v45 = vrot.slane %v3643_v16, 7 }
   0x9   :  { %v111_v38 = vld [vmem:[%s5973_s2 + $0x98] sm:$0xff]  ;;  %v110_v39 = vld [vmem:[%s5973_s2 + $0x90] sm:$0xff]  ;;  %v73_v42 = vld [vmem:[%s5975_s1 + $0x8] sm:$0xff]  ;;  %v3734_v46 = vsel %vm134_vm1, %v112_v41, %v113_v40  ;;  %v117_v49 = vrot.slane %v3650_v19, 7  ;;  %v116_v50 = vrot.slane %v3656_v21, 7  ;;  %vm1244_vm8 = vcmp.lt.s32.totalorder %v3608_v6, 6 }
   0xa   :  { %343 = vperm.xlu1 %3503, %v97_v7   ;;  %338 = vperm.xlu0 %3502, %v96_v8   ;;  %v72_v43 = vld [vmem:[%s5975_s1] sm:$0xff]  ;;  %v75_v47 = vld [vmem:[%s5975_s1 + $0x18] sm:$0xff]  ;;  %v74_v48 = vld [vmem:[%s5975_s1 + $0x10] sm:$0xff]  ;;  %v3746_v51 = vsel %vm134_vm1, %v114_v45, %v115_v44  ;;  %v3750_v52 = vsel %vm134_vm1, %v113_v40, %v114_v45  ;;  %vm1183_vm9 = vcmp.lt.s32.totalorder %v3608_v6, 2  ;;  %vm2208_vm12 = vcmp.lt.s32.totalorder %v3608_v6, 4 }
   0xb   :  { %v77_v53 = vld [vmem:[%s5975_s1 + $0x28] sm:$0xff]  ;;  %v76_v54 = vld [vmem:[%s5975_s1 + $0x20] sm:$0xff]  ;;  %v3760_v55 = vsel %vm134_vm1, %v116_v50, %v117_v49  ;;  %v3764_v56 = vsel %vm134_vm1, %v115_v44, %v116_v50  ;;  %v3769_v57 = vld [vmem:[%s5974_s0 + $0x38] sm:$0xff] }
   0xc   :  { %v3774_v58 = vld [vmem:[%s5974_s0 + $0x30] sm:$0xff]  ;;  %v5990_v59 = vrot.slane %v3769_v57, 7  ;;  %v79_v61 = vld [vmem:[%s5975_s1 + $0x38] sm:$0xff]  ;;  %v81_v1 = vld [vmem:[%s5975_s1 + $0x48] sm:$0xff] }
   0xd   :  { %v118_v60 = vrot.slane %v3774_v58, 7  ;;  %v78_v62 = vld [vmem:[%s5975_s1 + $0x30] sm:$0xff]  ;;  %v80_v2 = vld [vmem:[%s5975_s1 + $0x40] sm:$0xff]  ;;  %v83_v3 = vld [vmem:[%s5975_s1 + $0x58] sm:$0xff]  ;;  %v281_v40 = vrot.slane %v3774_v58, 1 }
   0xe   :  { %353 = vperm.xlu1 %3503, %v99_v10   ;;  %348 = vperm.xlu0 %3502, %v98_v13   ;;  %v82_v4 = vld [vmem:[%s5975_s1 + $0x50] sm:$0xff]  ;;  %v85_v5 = vld [vmem:[%s5975_s1 + $0x68] sm:$0xff]  ;;  %v84_v7 = vld [vmem:[%s5975_s1 + $0x60] sm:$0xff] }
   0xf   :  { %v3792_v63 = vsel %vm134_vm1, %v118_v60, %v5990_v59  ;;  %v3796_v0 = vsel %vm134_vm1, %v117_v49, %v118_v60  ;;  %v3831_v8 = vld [vmem:[%s5974_s0 + $0x48] sm:$0xff]  ;;  %v87_v10 = vld [vmem:[%s5975_s1 + $0x78] sm:$0xff]  ;;  %v86_v11 = vld [vmem:[%s5975_s1 + $0x70] sm:$0xff] }
  0x10   :  { %v3851_v13 = vld [vmem:[%s5974_s0 + $0x58] sm:$0xff]  ;;  %v88_v17 = vld [vmem:[%s5975_s1 + $0x80] sm:$0xff]  ;;  %v3871_v18 = vld [vmem:[%s5974_s0 + $0x68] sm:$0xff]  ;;  %v284_v44 = vrot.slane %v3831_v8, 1 }
  0x11   :  { %v91_v23 = vld [vmem:[%s5975_s1 + $0x98] sm:$0xff]  ;;  %vm3457_vm4 = vmpackc.low %vm701_vm2, %vm3510_vm3  ;;  %v286_v50 = vrot.slane %v3851_v13, 1 }
  0x12   :  { %363 = vperm.xlu1 %3503, %v101_v26   ;;  %358 = vperm.xlu0 %3502, %v100_v27   ;;  %v90_v26 = vld [vmem:[%s5975_s1 + $0x90] sm:$0xff]  ;;  %v638_v27 = vld [vmem:[%s5976_s5] sm:$0xff] }
  0x16   :  { %373 = vperm.xlu1 %3503, %v103_v30   ;;  %368 = vperm.xlu0 %3502, %v102_v31   ;;  %v639_v30 = vld [vmem:[%s5976_s5 + $0x8] sm:$0xf] }
  0x17   :  { %v3456_v31 = vpack.c.bf16 %v639_v30, %v638_v27 }
  0x19   :  { %3458 = vmatprep.subr.msk.bf16.mxu0 %vm3457_vm4, %v3456_v31 }
  0x1a   :  { %383 = vperm.xlu1 %3503, %v105_v32   ;;  %378 = vperm.xlu0 %3502, %v104_v33  }
  0x1b   :  { %3461 = vmatpush3.bf16.msk.msra.mxu0 %vm3457_vm4, %v3456_v31 }
  0x1e   :  { %393 = vperm.xlu1 %3503, %v107_v34   ;;  %388 = vperm.xlu0 %3502, %v106_v35  }
  0x22   :  { %403 = vperm.xlu1 %3503, %v109_v36   ;;  %398 = vperm.xlu0 %3502, %v108_v37  }
  0x26   :  { %413 = vperm.xlu1 %3503, %v111_v38   ;;  %408 = vperm.xlu0 %3502, %v110_v39   ;;  %v282_v39 = vrot.slane %v3769_v57, 1 }
  0x2a   :  { %162 = vperm.xlu1 %3503, %v73_v42   ;;  %157 = vperm.xlu0 %3502, %v72_v43  }
  0x2e   :  { %172 = vperm.xlu1 %3503, %v75_v47   ;;  %167 = vperm.xlu0 %3502, %v74_v48   ;;  %v308_v47 = vsel %vm295_vm0, %v281_v40, %v282_v39 }
  0x32   :  { %182 = vperm.xlu1 %3503, %v77_v53   ;;  %177 = vperm.xlu0 %3502, %v76_v54  }
  0x36   :  { %458 = vrot.lane.b32.xlu1 %v3619_v9, %s3509_s25  ;;  %456 = vrot.lane.b32.xlu0 %v3628_v12, %s3509_s25  ;;  %v3836_v9 = vld [vmem:[%s5974_s0 + $0x40] sm:$0xff] }
  0x37   :  { %v283_v45 = vrot.slane %v3836_v9, 1 }
  0x3a   :  { %192 = vperm.xlu1 %3503, %v79_v61   ;;  %187 = vperm.xlu0 %3502, %v78_v62   ;;  %v288_v62 = vrot.slane %v3871_v18, 1 }
  0x3e   :  { %462 = vrot.lane.b32.xlu1 %v3638_v15, %s3509_s25  ;;  %460 = vrot.lane.b32.xlu0 %v3643_v16, %s3509_s25  ;;  %v3856_v15 = vld [vmem:[%s5974_s0 + $0x50] sm:$0xff]  ;;  %v89_v16 = vld [vmem:[%s5975_s1 + $0x88] sm:$0xff]  ;;  %s3511_s1 = smov 8  }
  0x3f   :  { %v285_v53 = vrot.slane %v3856_v15, 1 }
  0x42   :  { %202 = vperm.xlu1 %3503, %v81_v1   ;;  %197 = vperm.xlu0 %3502, %v80_v2   ;;  %v305_v2 = vsel %vm295_vm0, %v284_v44, %v285_v53 }
  0x46   :  { %466 = vrot.lane.b32.xlu1 %v3650_v19, %s3509_s25  ;;  %464 = vrot.lane.b32.xlu0 %v3656_v21, %s3509_s25  ;;  %v3876_v21 = vld [vmem:[%s5974_s0 + $0x60] sm:$0xff]  ;;  %v307_v19 = vsel %vm295_vm0, %v282_v39, %v283_v45 }
  0x47   :  { %v287_v1 = vrot.slane %v3876_v21, 1 }
  0x4a   :  { %212 = vperm.xlu1 %3503, %v83_v3   ;;  %207 = vperm.xlu0 %3502, %v82_v4   ;;  %v304_v3 = vsel %vm295_vm0, %v285_v53, %v286_v50  ;;  %v3933_v4 = vld [vmem:[%s5974_s0 + $0x70] sm:$0xff] }
  0x4e   :  { %470 = vrot.lane.b32.xlu1 %v3769_v57, %s3509_s25  ;;  %468 = vrot.lane.b32.xlu0 %v3774_v58, %s3509_s25 }
  0x52   :  { %222 = vperm.xlu1 %3503, %v85_v5   ;;  %217 = vperm.xlu0 %3502, %v84_v7  }
  0x56   :  { %474 = vrot.lane.b32.xlu1 %v3831_v8, %s3509_s25  ;;  %472 = vrot.lane.b32.xlu0 %v3836_v9, %s3509_s25 }
  0x5a   :  { %232 = vperm.xlu1 %3503, %v87_v10   ;;  %227 = vperm.xlu0 %3502, %v86_v11  }
  0x5e   :  { %478 = vrot.lane.b32.xlu1 %v3851_v13, %s3509_s25  ;;  %476 = vrot.lane.b32.xlu0 %v3856_v15, %s3509_s25 }
  0x62   :  { %242 = vperm.xlu1 %3503, %v89_v16   ;;  %237 = vperm.xlu0 %3502, %v88_v17   ;;  %v303_v16 = vsel %vm295_vm0, %v286_v50, %v287_v1  ;;  %v289_v17 = vrot.slane %v3933_v4, 1  ;;  %v3985_v50 = vld [vmem:[%s5974_s0 + $0x98] sm:$0xff] }
  0x66   :  { %482 = vrot.lane.b32.xlu1 %v3871_v18, %s3509_s25  ;;  %480 = vrot.lane.b32.xlu0 %v3876_v21, %s3509_s25 }
  0x6a   :  { %252 = vperm.xlu1 %3503, %v91_v23   ;;  %247 = vperm.xlu0 %3502, %v90_v26   ;;  %v302_v23 = vsel %vm295_vm0, %v287_v1, %v288_v62  ;;  %v3945_v26 = vld [vmem:[%s5974_s0 + $0x78] sm:$0xff] }
  0x81   :  { %v329_v32 = vpop.permute.xlu1 %328  ;;  %v319_v33 = vpop.permute.xlu0 %318 }
  0x82   :  { %v416_v34 = vmul.f32 %v319_v33, %v3662_v22  ;;  %v418_v35 = vmul.f32 %v329_v32, %v3667_v24  ;;  %v301_v33 = vsel %vm295_vm0, %v288_v62, %v289_v17 }
  0x84   :  { %536 = vrot.lane.b32.xlu0 %v416_v34, %s3511_s1  ;;  %v290_v34 = vrot.slane %v3945_v26, 1 }
  0x85   :  { %v334_v36 = vpop.permute.xlu1 %333  ;;  %v324_v37 = vpop.permute.xlu0 %323 }
  0x86   :  { %v417_v38 = vmul.f32 %v324_v37, %v3671_v25  ;;  %v419_v22 = vmul.f32 %v334_v36, %v3681_v28  ;;  %v309_v25 = vsel %vm295_vm0, %v280_v20, %v281_v40  ;;  %v306_v20 = vsel %vm295_vm0, %v283_v45, %v284_v44 }
  0x87   :  { %v300_v40 = vsel %vm295_vm0, %v289_v17, %v290_v34 }
  0x88   :  { %538 = vrot.lane.b32.xlu1 %v417_v38, %s3511_s1  ;;  %540 = vrot.lane.b32.xlu0 %v418_v35, %s3511_s1  ;;  %v3955_v35 = vld [vmem:[%s5974_s0 + $0x80] sm:$0xff] }
  0x89   :  { %v344_v42 = vpop.permute.xlu1 %343  ;;  %v339_v43 = vpop.permute.xlu0 %338  ;;  %v291_v39 = vrot.slane %v3955_v35, 1 }
  0x8a   :  { %v420_v24 = vmul.f32 %v339_v43, %v3687_v29  ;;  %v421_v49 = vmul.f32 %v344_v42, %v309_v25  ;;  %v3966_v42 = vld [vmem:[%s5974_s0 + $0x88] sm:$0xff]  ;;  %v3974_v25 = vld [vmem:[%s5974_s0 + $0x90] sm:$0xff] }
  0x8b   :  { %v299_v44 = vsel %vm295_vm0, %v290_v34, %v291_v39  ;;  %v292_v45 = vrot.slane %v3966_v42, 1  ;;  %v1127_v34 = vld [vmem:[%s5977_s3 + $0x20] sm:$0xff] }
  0x8c   :  { %542 = vrot.lane.b32.xlu1 %v419_v22, %s3511_s1  ;;  %544 = vrot.lane.b32.xlu0 %v420_v24, %s3511_s1 }
  0x8d   :  { %v354_v48 = vpop.permute.xlu1 %353  ;;  %v349_v28 = vpop.permute.xlu0 %348 }
  0x8e   :  { %v422_v29 = vmul.f32 %v349_v28, %v308_v47  ;;  %v423_v60 = vmul.f32 %v354_v48, %v307_v19 }
  0x90   :  { %546 = vrot.lane.b32.xlu1 %v421_v49, %s3511_s1  ;;  %548 = vrot.lane.b32.xlu0 %v422_v29, %s3511_s1  ;;  %v293_v49 = vrot.slane %v3974_v25, 1  ;;  %v298_v29 = vsel %vm295_vm0, %v291_v39, %v292_v45  ;;  %v1129_v39 = vld [vmem:[%s5977_s3 + $0x30] sm:$0xff] }
  0x91   :  { %v364_v54 = vpop.permute.xlu1 %363  ;;  %v359_v58 = vpop.permute.xlu0 %358 }
  0x92   :  { %v424_v61 = vmul.f32 %v359_v58, %v306_v20  ;;  %v425_v10 = vmul.f32 %v364_v54, %v305_v2  ;;  %v297_v54 = vsel %vm295_vm0, %v292_v45, %v293_v49  ;;  %v294_v58 = vrot.slane %v3985_v50, 1 }
  0x94   :  { %550 = vrot.lane.b32.xlu1 %v423_v60, %s3511_s1  ;;  %552 = vrot.lane.b32.xlu0 %v424_v61, %s3511_s1  ;;  %v296_v1 = vsel %vm295_vm0, %v293_v49, %v294_v58 }
  0x95   :  { %v374_v5 = vpop.permute.xlu1 %373  ;;  %v369_v7 = vpop.permute.xlu0 %368 }
  0x96   :  { %v426_v11 = vmul.f32 %v369_v7, %v304_v3  ;;  %v427_v31 = vmul.f32 %v374_v5, %v303_v16  ;;  %v315_v7 = vsel %vm295_vm0, %v294_v58, %v275_v14  ;;  %v1123_v16 = vld [vmem:[%s5977_s3] sm:$0xff]  ;;  %v1136_v58 = vld [vmem:[%s5977_s3 + $0x68] sm:$0xff] }
  0x98   :  { %554 = vrot.lane.b32.xlu1 %v425_v10, %s3511_s1  ;;  %556 = vrot.lane.b32.xlu0 %v426_v11, %s3511_s1 }
  0x99   :  { %v384_v27 = vpop.permute.xlu1 %383  ;;  %v379_v30 = vpop.permute.xlu0 %378 }
  0x9a   :  { %v428_v32 = vmul.f32 %v379_v30, %v302_v23  ;;  %v429_v38 = vmul.f32 %v384_v27, %v301_v33  ;;  %v1124_v27 = vld [vmem:[%s5977_s3 + $0x8] sm:$0xff]  ;;  %v1125_v30 = vld [vmem:[%s5977_s3 + $0x10] sm:$0xff]  ;;  %v1126_v33 = vld [vmem:[%s5977_s3 + $0x18] sm:$0xff] }
  0x9c   :  { %558 = vrot.lane.b32.xlu1 %v427_v31, %s3511_s1  ;;  %560 = vrot.lane.b32.xlu0 %v428_v32, %s3511_s1 }
  0x9d   :  { %v394_v36 = vpop.permute.xlu1 %393  ;;  %v389_v37 = vpop.permute.xlu0 %388 }
  0x9e   :  { %v430_v24 = vmul.f32 %v389_v37, %v300_v40  ;;  %v431_v28 = vmul.f32 %v394_v36, %v299_v44 }
  0xa0   :  { %562 = vrot.lane.b32.xlu1 %v429_v38, %s3511_s1  ;;  %484 = vrot.lane.b32.xlu0 %v3933_v4, %s3509_s25  ;;  %v1128_v38 = vld [vmem:[%s5977_s3 + $0x28] sm:$0xff] }
  0xa1   :  { %v404_v43 = vpop.permute.xlu1 %403  ;;  %v399_v22 = vpop.permute.xlu0 %398 }
  0xa2   :  { %v432_v20 = vmul.f32 %v399_v22, %v298_v29  ;;  %v433_v62 = vmul.f32 %v404_v43, %v297_v54  ;;  %v1130_v22 = vld [vmem:[%s5977_s3 + $0x38] sm:$0xff] }
  0xa3   :  { %v1134_v29 = vld [vmem:[%s5977_s3 + $0x58] sm:$0xff] }
  0xa4   :  { %486 = vrot.lane.b32.xlu1 %v3945_v26, %s3509_s25  ;;  %564 = vrot.lane.b32.xlu0 %v430_v24, %s3511_s1  ;;  %v1131_v24 = vld [vmem:[%s5977_s3 + $0x40] sm:$0xff] }
  0xa5   :  { %v414_v47 = vpop.permute.xlu1 %413  ;;  %v409_v48 = vpop.permute.xlu0 %408 }
  0xa6   :  { %v434_v5 = vmul.f32 %v409_v48, %v296_v1  ;;  %v435_v17 = vmul.f32 %v414_v47, %v315_v7  ;;  %v1132_v47 = vld [vmem:[%s5977_s3 + $0x48] sm:$0xff]  ;;  %v1133_v48 = vld [vmem:[%s5977_s3 + $0x50] sm:$0xff]  ;;  %v1138_v7 = vld [vmem:[%s5977_s3 + $0x78] sm:$0xff] }
  0xa8   :  { %566 = vrot.lane.b32.xlu1 %v431_v28, %s3511_s1  ;;  %488 = vrot.lane.b32.xlu0 %v3955_v35, %s3509_s25 }
  0xa9   :  { %v3990_v53 = vpop.permute.xlu1 %162  ;;  %v3992_v19 = vpop.permute.xlu0 %157 }
  0xac   :  { %490 = vrot.lane.b32.xlu1 %v3966_v42, %s3509_s25  ;;  %568 = vrot.lane.b32.xlu0 %v432_v20, %s3511_s1  ;;  %v1135_v20 = vld [vmem:[%s5977_s3 + $0x60] sm:$0xff] }
  0xad   :  { %v4000_v60 = vpop.permute.xlu1 %172  ;;  %v4002_v61 = vpop.permute.xlu0 %167 }
  0xb0   :  { %570 = vrot.lane.b32.xlu1 %v433_v62, %s3511_s1  ;;  %492 = vrot.lane.b32.xlu0 %v3974_v25, %s3509_s25  ;;  %v1137_v62 = vld [vmem:[%s5977_s3 + $0x70] sm:$0xff] }
  0xb1   :  { %v4009_v2 = vpop.permute.xlu1 %182  ;;  %v4011_v3 = vpop.permute.xlu0 %177 }
  0xb4   :  { %494 = vrot.lane.b32.xlu1 %v3985_v50, %s3509_s25  ;;  %572 = vrot.lane.b32.xlu0 %v434_v5, %s3511_s1 }
  0xb5   :  { %v4020_v10 = vpop.permute.xlu1 %458  ;;  %v4022_v11 = vpop.permute.xlu0 %456 }
  0xb8   :  { %574 = vrot.lane.b32.xlu1 %v435_v17, %s3511_s1  ;;  %1267 = vperm.xlu0 %3502, %v1123_v16   ;;  %v1139_v16 = vld [vmem:[%s5977_s3 + $0x80] sm:$0xff] }
  0xb9   :  { %v4028_v23 = vpop.permute.xlu1 %192  ;;  %v4030_v14 = vpop.permute.xlu0 %187 }
  0xba   :  { %6011 = vst [vmem:[#allocation3_spill] sm:$0xff] %v4028_v23  ;;  %6012 = vst [vmem:[#allocation4_spill] sm:$0xff] %v4030_v14 }
  0xbc   :  { %1272 = vperm.xlu1 %3503, %v1124_v27   ;;  %1277 = vperm.xlu0 %3502, %v1125_v30   ;;  %v1140_v27 = vld [vmem:[%s5977_s3 + $0x88] sm:$0xff]  ;;  %v1141_v30 = vld [vmem:[%s5977_s3 + $0x90] sm:$0xff] }
  0xbd   :  { %v4038_v31 = vpop.permute.xlu1 %462  ;;  %v4040_v32 = vpop.permute.xlu0 %460 }
  0xc0   :  { %1282 = vperm.xlu1 %3503, %v1126_v33   ;;  %1287 = vperm.xlu0 %3502, %v1127_v34   ;;  %v1142_v34 = vld [vmem:[%s5977_s3 + $0x98] sm:$0xff] }
  0xc1   :  { %v4048_v36 = vpop.permute.xlu1 %202  ;;  %v4050_v37 = vpop.permute.xlu0 %197 }
  0xc2   :  { %6013 = vst [vmem:[#allocation5_spill] sm:$0xff] %v4048_v36  ;;  %6014 = vst [vmem:[#allocation6_spill] sm:$0xff] %v4050_v37 }
  0xc4   :  { %1292 = vperm.xlu1 %3503, %v1128_v38   ;;  %1297 = vperm.xlu0 %3502, %v1129_v39  }
  0xc5   :  { %v4058_v40 = vpop.permute.xlu1 %466  ;;  %v4060_v43 = vpop.permute.xlu0 %464 }
  0xc8   :  { %1302 = vperm.xlu1 %3503, %v1130_v22   ;;  %1307 = vperm.xlu0 %3502, %v1131_v24  }
  0xc9   :  { %v4068_v44 = vpop.permute.xlu1 %212  ;;  %v4070_v45 = vpop.permute.xlu0 %207 }
  0xca   :  { %6015 = vst [vmem:[#allocation7_spill] sm:$0xff] %v4068_v44  ;;  %6016 = vst [vmem:[#allocation8_spill] sm:$0xff] %v4070_v45 }
  0xcc   :  { %1312 = vperm.xlu1 %3503, %v1132_v47   ;;  %1317 = vperm.xlu0 %3502, %v1133_v48  }
  0xcd   :  { %v4078_v28 = vpop.permute.xlu1 %470  ;;  %v4080_v49 = vpop.permute.xlu0 %468 }
  0xd0   :  { %1322 = vperm.xlu1 %3503, %v1134_v29   ;;  %1327 = vperm.xlu0 %3502, %v1135_v20   ;;  %v5989_v29 = vrot.slane %v3985_v50, 7 }
  0xd1   :  { %v4088_v54 = vpop.permute.xlu0 %217  ;;  %v4096_v1 = vpop.permute.xlu1 %222 }
  0xd2   :  { %6017 = vst [vmem:[#allocation9_spill] sm:$0xff] %v4088_v54  ;;  %6018 = vst [vmem:[#allocation10_spill] sm:$0xff] %v4096_v1 }
  0xd4   :  { %1332 = vperm.xlu1 %3503, %v1136_v58   ;;  %1337 = vperm.xlu0 %3502, %v1137_v62   ;;  %v154_v58 = vsel %vm134_vm1, %v5989_v29, %v112_v41  ;;  %v257_v41 = vmul.f32 %v4002_v61, %v3750_v52  ;;  %v259_v52 = vmul.f32 %v4011_v3, %v3764_v56 }
  0xd5   :  { %v4098_v5 = vpop.permute.xlu0 %472  ;;  %v4106_v17 = vpop.permute.xlu1 %474  ;;  %v260_v56 = vmul.f32 %v4009_v2, %v3760_v55 }
  0xd6   :  { %v599_v29 = vsel %vm596_vm5, %v257_v41, %v4040_v32  ;;  %v601_v32 = vsel %vm596_vm5, %v259_v52, %v4060_v43  ;;  %v6025_v43 = vrot.slane %v3769_v57, 7  ;;  %v262_v57 = vmul.f32 %v4028_v23, %v3792_v63 }
  0xd8   :  { %1342 = vperm.xlu1 %3503, %v1138_v7   ;;  %1347 = vperm.xlu0 %3502, %v1139_v16   ;;  %v255_v7 = vmul.f32 %v3992_v19, %v154_v58  ;;  %v604_v52 = vsel %vm596_vm5, %v262_v57, %v4078_v28 }
  0xd9   :  { %v4114_v33 = vpop.permute.xlu0 %227  ;;  %v4119_v38 = vpop.permute.xlu1 %232 }
  0xda   :  { %6019 = vst [vmem:[#allocation11_spill] sm:$0xff] %v4114_v33  ;;  %6020 = vst [vmem:[#allocation12_spill] sm:$0xff] %v4119_v38  ;;  %v597_v16 = vsel %vm596_vm5, %v255_v7, %v4022_v11 }
  0xdc   :  { %1352 = vperm.xlu1 %3503, %v1140_v27   ;;  %1357 = vperm.xlu0 %3502, %v1141_v30  }
  0xdd   :  { %v4121_v39 = vpop.permute.xlu0 %476  ;;  %v4123_v22 = vpop.permute.xlu1 %478 }
  0xe0   :  { %1362 = vperm.xlu1 %3503, %v1142_v34   ;;  %v256_v34 = vmul.f32 %v3990_v53, %v3734_v46  ;;  %v258_v46 = vmul.f32 %v4000_v60, %v3746_v51 }
  0xe1   :  { %v4125_v24 = vpop.permute.xlu0 %237  ;;  %v4127_v47 = vpop.permute.xlu1 %242 }
  0xe2   :  { %6021 = vst [vmem:[#allocation13_spill] sm:$0xff] %v4125_v24  ;;  %6022 = vst [vmem:[#allocation14_spill] sm:$0xff] %v4127_v47  ;;  %v598_v58 = vsel %vm596_vm5, %v256_v34, %v4020_v10  ;;  %v600_v10 = vsel %vm596_vm5, %v258_v46, %v4038_v31  ;;  %v122_v31 = vrot.slane %v3856_v15, 7 }
  0xe5   :  { %v4129_v48 = vpop.permute.xlu0 %480  ;;  %v4132_v20 = vpop.permute.xlu1 %482 }
  0xe9   :  { %v4140_v62 = vpop.permute.xlu0 %247  ;;  %v4145_v27 = vpop.permute.xlu1 %252 }
  0xea   :  { %6023 = vst [vmem:[#allocation15_spill] sm:$0xff] %v4140_v62  ;;  %6024 = vst [vmem:[#allocation16_spill] sm:$0xff] %v4145_v27 }
  0xf6   :  { %v537_v30 = vpop.permute.xlu0 %536 }
  0xf7   :  { %v618_v12 = vsel %vm617_vm6, %v597_v16, %v537_v30  ;;  %v120_v30 = vrot.slane %v3836_v9, 7  ;;  %v121_v9 = vrot.slane %v3831_v8, 7 }
  0xf8   :  { %3302 = vmatprep.mubr.msk.f32.mxu0 %vm640_vm7, %v618_v12 }
  0xf9   :  { %v146_v41 = vsel %vm134_vm1, %v6025_v43, %v120_v30  ;;  %v144_v46 = vsel %vm134_vm1, %v121_v9, %v122_v31 }
  0xfa   :  { %v539_v11 = vpop.permute.xlu1 %538  ;;  %v541_v7 = vpop.permute.xlu0 %540  ;;  %v263_v15 = vmul.f32 %v4050_v37, %v146_v41 }
  0xfb   :  { %v619_v59 = vsel %vm617_vm6, %v598_v58, %v539_v11  ;;  %v620_v16 = vsel %vm617_vm6, %v599_v29, %v541_v7  ;;  %v602_v58 = vsel %vm596_vm5, %v260_v56, %v4058_v40  ;;  %v124_v40 = vrot.slane %v3876_v21, 7 }
  0xfc   :  { %3303 = vmatmul.mubr.msk.f32.vlgmr.msra.gmra.mrb[0].mxu0 %vm640_vm7, %v619_v59  ;;  %v261_v59 = vmul.f32 %v4030_v14, %v3796_v0  ;;  %v605_v63 = vsel %vm596_vm5, %v263_v15, %v4098_v5 }
  0xfd   :  { %3305 = vmatprep.mubr.msk.f32.mxu0 %vm640_vm7, %v620_v16  ;;  %v123_v16 = vrot.slane %v3851_v13, 7 }
  0xfe   :  { %v543_v12 = vpop.permute.xlu1 %542  ;;  %v545_v29 = vpop.permute.xlu0 %544  ;;  %v603_v55 = vsel %vm596_vm5, %v261_v59, %v4080_v49  ;;  %v145_v49 = vsel %vm134_vm1, %v120_v30, %v121_v9  ;;  %v265_v30 = vmul.f32 %v4070_v45, %v144_v46 }
  0xff   :  { %v621_v34 = vsel %vm617_vm6, %v600_v10, %v543_v12  ;;  %v622_v51 = vsel %vm617_vm6, %v601_v32, %v545_v29  ;;  %v264_v12 = vmul.f32 %v4048_v36, %v145_v49  ;;  %v125_v29 = vrot.slane %v3871_v18, 7 }
 0x100   :  { %3306 = vmatmul.mubr.msk.f32.gmra.mrb[2].mxu0 %vm640_vm7, %v621_v34  ;;  %v143_v28 = vsel %vm134_vm1, %v122_v31, %v123_v16  ;;  %v142_v5 = vsel %vm134_vm1, %v123_v16, %v124_v40 }
 0x101   :  { %3308 = vmatprep.mubr.msk.f32.mxu0 %vm640_vm7, %v622_v51  ;;  %v606_v34 = vsel %vm596_vm5, %v264_v12, %v4106_v17  ;;  %v607_v51 = vsel %vm596_vm5, %v265_v30, %v4121_v39  ;;  %v266_v43 = vmul.f32 %v4068_v44, %v143_v28  ;;  %v267_v31 = vmul.f32 %v4088_v54, %v142_v5 }
 0x102   :  { %v547_v0 = vpop.permute.xlu1 %546  ;;  %v549_v11 = vpop.permute.xlu0 %548  ;;  %v141_v41 = vsel %vm134_vm1, %v124_v40, %v125_v29  ;;  %v126_v17 = vrot.slane %v3933_v4, 7  ;;  %v127_v4 = vrot.slane %v3945_v26, 7  ;;  %v128_v26 = vrot.slane %v3955_v35, 7 }
 0x103   :  { %v623_v7 = vsel %vm617_vm6, %v602_v58, %v547_v0  ;;  %v624_v8 = vsel %vm617_vm6, %v603_v55, %v549_v11  ;;  %v608_v39 = vsel %vm596_vm5, %v266_v43, %v4123_v22  ;;  %v609_v58 = vsel %vm596_vm5, %v267_v31, %v4129_v48 }
 0x104   :  { %3309 = vmatmul.mubr.msk.f32.gmra.mrb[4].mxu0 %vm640_vm7, %v623_v7  ;;  %v140_v57 = vsel %vm134_vm1, %v125_v29, %v126_v17  ;;  %v139_v49 = vsel %vm134_vm1, %v126_v17, %v127_v4  ;;  %v130_v5 = vrot.slane %v3974_v25, 7  ;;  %v6026_v17 = vrot.slane %v3985_v50, 7 }
 0x105   :  { %3311 = vmatprep.mubr.msk.f32.mxu0 %vm640_vm7, %v624_v8  ;;  %v268_v8 = vmul.f32 %v4096_v1, %v141_v41  ;;  %v269_v40 = vmul.f32 %v4114_v33, %v140_v57 }
 0x106   :  { %v551_v10 = vpop.permute.xlu1 %550  ;;  %v553_v32 = vpop.permute.xlu0 %552 }
 0x107   :  { %v625_v13 = vsel %vm617_vm6, %v604_v52, %v551_v10  ;;  %v626_v21 = vsel %vm617_vm6, %v605_v63, %v553_v32  ;;  %v610_v22 = vsel %vm596_vm5, %v268_v8, %v4132_v20  ;;  %v270_v20 = vmul.f32 %v4119_v38, %v139_v49 }
 0x108   :  { %3312 = vmatmul.mubr.msk.f32.gmra.mrb[6].mxu0 %vm640_vm7, %v625_v13  ;;  %v129_v32 = vrot.slane %v3966_v42, 7  ;;  %v138_v13 = vsel %vm134_vm1, %v127_v4, %v128_v26 }
 0x109   :  { %3314 = vmatprep.mubr.msk.f32.mxu0 %vm640_vm7, %v626_v21  ;;  %v271_v29 = vmul.f32 %v4125_v24, %v138_v13 }
 0x10a   :  { %v555_v56 = vpop.permute.xlu1 %554  ;;  %v557_v59 = vpop.permute.xlu0 %556  ;;  %v137_v28 = vsel %vm134_vm1, %v128_v26, %v129_v32 }
 0x10b   :  { %v627_v9 = vsel %vm617_vm6, %v606_v34, %v555_v56  ;;  %v628_v18 = vsel %vm617_vm6, %v607_v51, %v557_v59  ;;  %v272_v59 = vmul.f32 %v4127_v47, %v137_v28 }
 0x10c   :  { %3315 = vmatmul.mubr.msk.f32.gmra.mrb[8].mxu0 %vm640_vm7, %v627_v9  ;;  %v136_v9 = vsel %vm134_vm1, %v129_v32, %v130_v5 }
 0x10d   :  { %3317 = vmatprep.mubr.msk.f32.mxu0 %vm640_vm7, %v628_v18  ;;  %v273_v25 = vmul.f32 %v4140_v62, %v136_v9 }
 0x10e   :  { %v559_v55 = vpop.permute.xlu1 %558  ;;  %v561_v0 = vpop.permute.xlu0 %560 }
 0x10f   :  { %v629_v11 = vsel %vm617_vm6, %v608_v39, %v559_v55  ;;  %v630_v7 = vsel %vm617_vm6, %v609_v58, %v561_v0  ;;  %v135_v39 = vsel %vm134_vm1, %v130_v5, %v6026_v17  ;;  %vm3091_vm1 = vcmask 7168  }
 0x110   :  { %3318 = vmatmul.mubr.msk.f32.gmra.mrb[10].mxu0 %vm640_vm7, %v629_v11 }
 0x111   :  { %3320 = vmatprep.mubr.msk.f32.mxu0 %vm640_vm7, %v630_v7  ;;  %v274_v7 = vmul.f32 %v4145_v27, %v135_v39 }
 0x112   :  { %v563_v48 = vpop.permute.xlu1 %562  ;;  %v485_v15 = vpop.permute.xlu0 %484 }
 0x113   :  { %v631_v16 = vsel %vm617_vm6, %v610_v22, %v563_v48  ;;  %v611_v46 = vsel %vm596_vm5, %v269_v40, %v485_v15 }
 0x114   :  { %3321 = vmatmul.mubr.msk.f32.gmra.mrb[12].mxu0 %vm640_vm7, %v631_v16 }
 0x116   :  { %v487_v52 = vpop.permute.xlu1 %486  ;;  %v565_v63 = vpop.permute.xlu0 %564 }
 0x117   :  { %v632_v10 = vsel %vm617_vm6, %v611_v46, %v565_v63  ;;  %v612_v21 = vsel %vm596_vm5, %v270_v20, %v487_v52 }
 0x118   :  { %3323 = vmatprep.mubr.msk.f32.mxu0 %vm640_vm7, %v632_v10 }
 0x11a   :  { %v567_v12 = vpop.permute.xlu1 %566  ;;  %v489_v30 = vpop.permute.xlu0 %488 }
 0x11b   :  { %v633_v35 = vsel %vm617_vm6, %v612_v21, %v567_v12  ;;  %v613_v42 = vsel %vm596_vm5, %v271_v29, %v489_v30 }
 0x11c   :  { %3324 = vmatmul.mubr.msk.f32.gmra.mrb[14].mxu0 %vm640_vm7, %v633_v35 }
 0x11e   :  { %v491_v34 = vpop.permute.xlu1 %490  ;;  %v569_v51 = vpop.permute.xlu0 %568 }
 0x11f   :  { %v634_v56 = vsel %vm617_vm6, %v613_v42, %v569_v51  ;;  %v614_v18 = vsel %vm596_vm5, %v272_v59, %v491_v34 }
 0x120   :  { %3326 = vmatprep.mubr.msk.f32.mxu0 %vm640_vm7, %v634_v56 }
 0x122   :  { %v571_v43 = vpop.permute.xlu1 %570  ;;  %v493_v31 = vpop.permute.xlu0 %492 }
 0x123   :  { %v635_v41 = vsel %vm617_vm6, %v614_v18, %v571_v43  ;;  %v615_v58 = vsel %vm596_vm5, %v273_v25, %v493_v31 }
 0x124   :  { %3327 = vmatmul.mubr.msk.f32.gmra.mrb[16].mxu0 %vm640_vm7, %v635_v41 }
 0x126   :  { %v495_v55 = vpop.permute.xlu1 %494  ;;  %v573_v0 = vpop.permute.xlu0 %572 }
 0x127   :  { %v636_v11 = vsel %vm617_vm6, %v615_v58, %v573_v0  ;;  %v616_v8 = vsel %vm596_vm5, %v274_v7, %v495_v55 }
 0x128   :  { %3329 = vmatprep.mubr.msk.f32.mxu0 %vm640_vm7, %v636_v11 }
 0x12a   :  { %v575_v4 = vpop.permute.xlu1 %574 }
 0x12b   :  { %v637_v57 = vsel %vm617_vm6, %v616_v8, %v575_v4 }
 0x12c   :  { %3330 = vmatmul.mubr.msk.f32.gmra.mrb[18].mxu0 %vm640_vm7, %v637_v57 }
 0x1cf   :  { %v4284_v50 = vpop.f32.mrb[0].mxu0 }
 0x1d0   :  { %v871_v22 = vsel %vm617_vm6, %v4284_v50, 0.0  ;;  %v917_v48 = vmul.f32 %v4284_v50, %v4284_v50  ;;  %v4290_v15 = vpop.f32.mrb[1].mxu0 }
 0x1d1   :  { %v870_v16 = vsel %vm617_vm6, %v4290_v15, 0.0  ;;  %v916_v40 = vmul.f32 %v4290_v15, %v4290_v15 }
 0x1d2   :  { %v937_v49 = vsel %vm617_vm6, %v917_v48, 0.0  ;;  %v872_v26 = vadd.f32 %v871_v22, %v870_v16 }
 0x1d3   :  { %v936_v46 = vsel %vm617_vm6, %v916_v40, 0.0  ;;  %v4298_v52 = vpop.f32.mrb[2].mxu0 }
 0x1d4   :  { %v938_v63 = vadd.f32 %v937_v49, %v936_v46  ;;  %v4300_v10 = vpop.f32.mrb[3].mxu0  ;;  %v919_v20 = vmul.f32 %v4298_v52, %v4298_v52  ;;  %v875_v12 = vsel %vm617_vm6, %v4298_v52, 0.0 }
 0x1d5   :  { %v873_v32 = vsel %vm617_vm6, %v4300_v10, 0.0  ;;  %v918_v13 = vmul.f32 %v4300_v10, %v4300_v10 }
 0x1d6   :  { %v874_v21 = vadd.f32 %v873_v32, %v872_v26  ;;  %v941_v42 = vsel %vm617_vm6, %v919_v20, 0.0 }
 0x1d7   :  { %v939_v30 = vsel %vm617_vm6, %v918_v13, 0.0  ;;  %v4311_v35 = vpop.f32.mrb[4].mxu0 }
 0x1d8   :  { %v940_v29 = vadd.f32 %v939_v30, %v938_v63  ;;  %v4313_v28 = vpop.f32.mrb[5].mxu0  ;;  %v876_v5 = vadd.f32 %v875_v12, %v874_v21  ;;  %v921_v34 = vmul.f32 %v4311_v35, %v4311_v35  ;;  %v879_v18 = vsel %vm617_vm6, %v4311_v35, 0.0 }
 0x1d9   :  { %v877_v51 = vsel %vm617_vm6, %v4313_v28, 0.0  ;;  %v920_v56 = vmul.f32 %v4313_v28, %v4313_v28 }
 0x1da   :  { %v878_v59 = vadd.f32 %v877_v51, %v876_v5  ;;  %v942_v9 = vadd.f32 %v941_v42, %v940_v29  ;;  %v945_v39 = vsel %vm617_vm6, %v921_v34, 0.0 }
 0x1db   :  { %v943_v43 = vsel %vm617_vm6, %v920_v56, 0.0  ;;  %v4325_v31 = vpop.f32.mrb[6].mxu0 }
 0x1dc   :  { %v944_v41 = vadd.f32 %v943_v43, %v942_v9  ;;  %v4327_v25 = vpop.f32.mrb[7].mxu0  ;;  %v880_v17 = vadd.f32 %v879_v18, %v878_v59  ;;  %v923_v58 = vmul.f32 %v4325_v31, %v4325_v31  ;;  %v883_v8 = vsel %vm617_vm6, %v4325_v31, 0.0 }
 0x1dd   :  { %v881_v55 = vsel %vm617_vm6, %v4327_v25, 0.0  ;;  %v922_v0 = vmul.f32 %v4327_v25, %v4327_v25 }
 0x1de   :  { %v882_v11 = vadd.f32 %v881_v55, %v880_v17  ;;  %v946_v7 = vadd.f32 %v945_v39, %v944_v41  ;;  %v949_v40 = vsel %vm617_vm6, %v923_v58, 0.0 }
 0x1df   :  { %v947_v4 = vsel %vm617_vm6, %v922_v0, 0.0  ;;  %v4339_v57 = vpop.f32.mrb[8].mxu0 }
 0x1e0   :  { %v948_v22 = vadd.f32 %v947_v4, %v946_v7  ;;  %v4341_v48 = vpop.f32.mrb[9].mxu0  ;;  %v884_v16 = vadd.f32 %v883_v8, %v882_v11  ;;  %v925_v49 = vmul.f32 %v4339_v57, %v4339_v57  ;;  %v887_v32 = vsel %vm617_vm6, %v4339_v57, 0.0 }
 0x1e1   :  { %v885_v26 = vsel %vm617_vm6, %v4341_v48, 0.0  ;;  %v924_v46 = vmul.f32 %v4341_v48, %v4341_v48 }
 0x1e2   :  { %v886_v63 = vadd.f32 %v885_v26, %v884_v16  ;;  %v950_v20 = vadd.f32 %v949_v40, %v948_v22  ;;  %v953_v5 = vsel %vm617_vm6, %v925_v49, 0.0 }
 0x1e3   :  { %v951_v13 = vsel %vm617_vm6, %v924_v46, 0.0  ;;  %v4353_v21 = vpop.f32.mrb[10].mxu0 }
 0x1e4   :  { %v952_v12 = vadd.f32 %v951_v13, %v950_v20  ;;  %v4355_v30 = vpop.f32.mrb[11].mxu0  ;;  %v888_v29 = vadd.f32 %v887_v32, %v886_v63  ;;  %v927_v42 = vmul.f32 %v4353_v21, %v4353_v21  ;;  %v891_v9 = vsel %vm617_vm6, %v4353_v21, 0.0 }
 0x1e5   :  { %v889_v34 = vsel %vm617_vm6, %v4355_v30, 0.0  ;;  %v926_v51 = vmul.f32 %v4355_v30, %v4355_v30 }
 0x1e6   :  { %v890_v56 = vadd.f32 %v889_v34, %v888_v29  ;;  %v954_v59 = vadd.f32 %v953_v5, %v952_v12  ;;  %v957_v58 = vsel %vm617_vm6, %v927_v42, 0.0 }
 0x1e7   :  { %v955_v18 = vsel %vm617_vm6, %v926_v51, 0.0  ;;  %v4367_v43 = vpop.f32.mrb[12].mxu0 }
 0x1e8   :  { %v956_v41 = vadd.f32 %v955_v18, %v954_v59  ;;  %v4369_v17 = vpop.f32.mrb[13].mxu0  ;;  %v892_v39 = vadd.f32 %v891_v9, %v890_v56  ;;  %v929_v55 = vmul.f32 %v4367_v43, %v4367_v43  ;;  %v895_v4 = vsel %vm617_vm6, %v4367_v43, 0.0 }
 0x1e9   :  { %v893_v0 = vsel %vm617_vm6, %v4369_v17, 0.0  ;;  %v928_v11 = vmul.f32 %v4369_v17, %v4369_v17 }
 0x1ea   :  { %v894_v7 = vadd.f32 %v893_v0, %v892_v39  ;;  %v958_v8 = vadd.f32 %v957_v58, %v956_v41  ;;  %v961_v49 = vsel %vm617_vm6, %v929_v55, 0.0 }
 0x1eb   :  { %v959_v22 = vsel %vm617_vm6, %v928_v11, 0.0 }
 0x1ec   :  { %v960_v16 = vadd.f32 %v959_v22, %v958_v8  ;;  %v896_v40 = vadd.f32 %v895_v4, %v894_v7 }
 0x1ee   :  { %v962_v26 = vadd.f32 %v961_v49, %v960_v16 }
 0x1ef   :  { %v4382_v46 = vpop.f32.mrb[14].mxu0 }
 0x1f0   :  { %v4384_v63 = vpop.f32.mrb[15].mxu0  ;;  %v931_v20 = vmul.f32 %v4382_v46, %v4382_v46  ;;  %v899_v29 = vsel %vm617_vm6, %v4382_v46, 0.0 }
 0x1f1   :  { %v897_v32 = vsel %vm617_vm6, %v4384_v63, 0.0  ;;  %v930_v13 = vmul.f32 %v4384_v63, %v4384_v63 }
 0x1f2   :  { %v898_v12 = vadd.f32 %v897_v32, %v896_v40  ;;  %v965_v51 = vsel %vm617_vm6, %v931_v20, 0.0 }
 0x1f3   :  { %v963_v5 = vsel %vm617_vm6, %v930_v13, 0.0 }
 0x1f4   :  { %v964_v42 = vadd.f32 %v963_v5, %v962_v26  ;;  %v900_v34 = vadd.f32 %v899_v29, %v898_v12 }
 0x1f6   :  { %v966_v56 = vadd.f32 %v965_v51, %v964_v42 }
 0x1f7   :  { %v4396_v59 = vpop.f32.mrb[16].mxu0 }
 0x1f8   :  { %v4398_v9 = vpop.f32.mrb[17].mxu0  ;;  %v933_v18 = vmul.f32 %v4396_v59, %v4396_v59  ;;  %v903_v55 = vsel %vm617_vm6, %v4396_v59, 0.0 }
 0x1f9   :  { %v901_v41 = vsel %vm617_vm6, %v4398_v9, 0.0  ;;  %v932_v39 = vmul.f32 %v4398_v9, %v4398_v9 }
 0x1fa   :  { %v902_v58 = vadd.f32 %v901_v41, %v900_v34  ;;  %v969_v8 = vsel %vm617_vm6, %v933_v18, 0.0 }
 0x1fb   :  { %v967_v0 = vsel %vm617_vm6, %v932_v39, 0.0 }
 0x1fc   :  { %v968_v11 = vadd.f32 %v967_v0, %v966_v56  ;;  %v904_v7 = vadd.f32 %v903_v55, %v902_v58 }
 0x1fe   :  { %v970_v4 = vadd.f32 %v969_v8, %v968_v11 }
 0x1ff   :  { %v4410_v22 = vpop.f32.mrb[18].mxu0 }
 0x200   :  { %v861_v16 = vpop.f32.mrb[19].mxu0  ;;  %v935_v40 = vmul.f32 %v4410_v22, %v4410_v22  ;;  %v907_v32 = vsel %vm617_vm6, %v4410_v22, 0.0 }
 0x201   :  { %v905_v49 = vsel %vm617_vm6, %v861_v16, 0.0  ;;  %v934_v26 = vmul.f32 %v861_v16, %v861_v16 }
 0x202   :  { %v906_v20 = vadd.f32 %v905_v49, %v904_v7  ;;  %v973_v5 = vsel %vm617_vm6, %v935_v40, 0.0  ;;  %v982_v40 = vld [vmem:[%s5978_s6] sm:$0x1]  ;;  %s3512_s6 = smov 16  }
 0x203   :  { %v971_v13 = vsel %vm617_vm6, %v934_v26, 0.0 }
 0x204   :  { %v908_v12 = vadd.f32 %v907_v32, %v906_v20  ;;  %v972_v29 = vadd.f32 %v971_v13, %v970_v4  ;;  %v4423_v32 = vsub.s32 0, %v3608_v6 }
 0x206   :  { %v909_v42 = vrot.slane %v908_v12, 4  ;;  %v974_v34 = vadd.f32 %v973_v5, %v972_v29  ;;  %6027 = vst [vmem:[#allocation17_spill] sm:$0xff] %v4423_v32  ;;  %v988_v29 = vld [vmem:[%s5979_s7] sm:$0x1] }
 0x208   :  { %v910_v51 = vadd.f32 %v909_v42, %v908_v12  ;;  %v975_v56 = vrot.slane %v974_v34, 4 }
 0x20a   :  { %v911_v18 = vrot.slane %v910_v51, 2  ;;  %v976_v41 = vadd.f32 %v975_v56, %v974_v34 }
 0x20c   :  { %v912_v39 = vadd.f32 %v911_v18, %v910_v51  ;;  %v977_v58 = vrot.slane %v976_v41, 2 }
 0x20e   :  { %v913_v55 = vrot.slane %v912_v39, 1  ;;  %v978_v0 = vadd.f32 %v977_v58, %v976_v41 }
 0x210   :  { %v914_v11 = vadd.f32 %v913_v55, %v912_v39  ;;  %v979_v7 = vrot.slane %v978_v0, 1 }
 0x212   :  { %v915_v8 = vmul.f32 0.00625, %v914_v11  ;;  %v980_v49 = vadd.f32 %v979_v7, %v978_v0 }
 0x214   :  { %v981_v62 = vmul.f32 0.00625, %v980_v49  ;;  %v983_v26 = vmul.f32 %v915_v8, %v915_v8 }
 0x216   :  { %v984_v20 = vsub.f32 %v981_v62, %v983_v26 }
 0x218   :  { %v985_v4 = vadd.f32 1e-05, %v984_v20 }
 0x21a   :  { %3504 = vrsqrt.f32 %v985_v4 }
 0x224   :  { %v3505_v13 = vpop.eup %3504 }
 0x225   :  { %v987_v12 = vmul.f32 %v3505_v13, %v982_v40 }
 0x227   :  { %v989_v5 = vmul.f32 %v987_v12, %v915_v8  ;;  %v4429_v42 = vrot.slane %v987_v12, %v4423_v32 }
 0x229   :  { %v990_v62 = vsub.f32 %v988_v29, %v989_v5  ;;  %v1015_v34 = vmul.f32 %v4429_v42, %v861_v16  ;;  %v998_v51 = vmul.f32 %v4284_v50, %v4429_v42  ;;  %v999_v56 = vmul.f32 %v4429_v42, %v4300_v10 }
 0x22a   :  { %v997_v18 = vmul.f32 %v4429_v42, %v4290_v15  ;;  %v1000_v41 = vmul.f32 %v4298_v52, %v4429_v42  ;;  %v1001_v39 = vmul.f32 %v4429_v42, %v4313_v28  ;;  %v1002_v58 = vmul.f32 %v4311_v35, %v4429_v42 }
 0x22b   :  { %v4445_v16 = vrot.slane %v990_v62, %v4423_v32  ;;  %v1003_v50 = vmul.f32 %v4429_v42, %v4327_v25  ;;  %v1004_v10 = vmul.f32 %v4325_v31, %v4429_v42  ;;  %v1005_v15 = vmul.f32 %v4429_v42, %v4341_v48 }
 0x22c   :  { %v1006_v52 = vmul.f32 %v4339_v57, %v4429_v42  ;;  %v1007_v28 = vmul.f32 %v4429_v42, %v4355_v30  ;;  %v1008_v35 = vmul.f32 %v4353_v21, %v4429_v42  ;;  %v1009_v55 = vmul.f32 %v4429_v42, %v4369_v17 }
 0x22d   :  { %v4462_v25 = vadd.f32 %v4445_v16, %v1015_v34  ;;  %v1024_v31 = vadd.f32 %v4445_v16, %v998_v51  ;;  %v1025_v0 = vadd.f32 %v4445_v16, %v999_v56  ;;  %v1023_v48 = vadd.f32 %v4445_v16, %v997_v18 }
 0x22e   :  { %v1026_v57 = vadd.f32 %v4445_v16, %v1000_v41  ;;  %v1027_v11 = vadd.f32 %v4445_v16, %v1001_v39  ;;  %v1028_v30 = vadd.f32 %v4445_v16, %v1002_v58  ;;  %v1029_v21 = vadd.f32 %v4445_v16, %v1003_v50 }
 0x22f   :  { %v1044_v7 = vmax.f32 %v1024_v31, 0.0  ;;  %v1045_v8 = vmax.f32 %v1025_v0, 0.0  ;;  %v1043_v17 = vmax.f32 %v1023_v48, 0.0  ;;  %v1030_v18 = vadd.f32 %v4445_v16, %v1004_v10 }
 0x230   :  { %v1046_v49 = vmax.f32 %v1026_v57, 0.0  ;;  %v1047_v26 = vmax.f32 %v1027_v11, 0.0  ;;  %v1048_v20 = vmax.f32 %v1028_v30, 0.0  ;;  %v1049_v4 = vmax.f32 %v1029_v21, 0.0 }
 0x231   :  { %v1064_v40 = vrot.slane %v1044_v7, 1  ;;  %v1065_v13 = vrot.slane %v1045_v8, 1  ;;  %v4471_v12 = vrot.slane %v1043_v17, 1  ;;  %v1031_v41 = vadd.f32 %v4445_v16, %v1005_v15 }
 0x232   :  { %v1066_v29 = vrot.slane %v1046_v49, 1  ;;  %v1067_v5 = vrot.slane %v1047_v26, 1  ;;  %v1068_v62 = vrot.slane %v1048_v20, 1  ;;  %v1069_v34 = vrot.slane %v1049_v4, 1 }
 0x233   :  { %v1100_v51 = vsel %vm295_vm0, %v1064_v40, %v1065_v13  ;;  %v1101_v56 = vsel %vm295_vm0, %v4471_v12, %v1064_v40  ;;  %v1050_v30 = vmax.f32 %v1030_v18, 0.0  ;;  %v1051_v21 = vmax.f32 %v1031_v41, 0.0 }
 0x234   :  { %v4480_v39 = vmax.f32 %v1044_v7, %v1100_v51  ;;  %v4482_v58 = vmax.f32 %v1043_v17, %v1101_v56  ;;  %v1098_v50 = vsel %vm295_vm0, %v1066_v29, %v1067_v5  ;;  %v1099_v31 = vsel %vm295_vm0, %v1065_v13, %v1066_v29 }
 0x235   :  { %v4488_v0 = vmax.f32 %v1046_v49, %v1098_v50  ;;  %v4490_v48 = vmax.f32 %v1045_v8, %v1099_v31  ;;  %v1096_v57 = vsel %vm295_vm0, %v1068_v62, %v1069_v34  ;;  %v1097_v10 = vsel %vm295_vm0, %v1067_v5, %v1068_v62 }
 0x236   :  { %1407 = vrot.lane.b32.xlu1 %v4480_v39, %s3511_s1  ;;  %1405 = vrot.lane.b32.xlu0 %v4482_v58, %s3511_s1  ;;  %v4500_v15 = vmax.f32 %v1048_v20, %v1096_v57  ;;  %v4502_v11 = vmax.f32 %v1047_v26, %v1097_v10  ;;  %v1225_v7 = vrot.slane %v4480_v39, 2  ;;  %v1032_v8 = vadd.f32 %v4445_v16, %v1006_v52 }
 0x237   :  { %v1033_v17 = vadd.f32 %v4445_v16, %v1007_v28  ;;  %v1070_v49 = vrot.slane %v1050_v30, 1  ;;  %v1071_v40 = vrot.slane %v1051_v21, 1  ;;  %v1034_v13 = vadd.f32 %v4445_v16, %v1008_v35 }
 0x238   :  { %v1035_v29 = vadd.f32 %v4445_v16, %v1009_v55  ;;  %v1052_v26 = vmax.f32 %v1032_v8, 0.0  ;;  %v1010_v5 = vmul.f32 %v4367_v43, %v4429_v42  ;;  %v1011_v52 = vmul.f32 %v4429_v42, %v4384_v63 }
 0x239   :  { %v1053_v20 = vmax.f32 %v1033_v17, 0.0  ;;  %v1094_v28 = vsel %vm295_vm0, %v1070_v49, %v1071_v40  ;;  %v1095_v35 = vsel %vm295_vm0, %v1069_v34, %v1070_v49  ;;  %v1054_v55 = vmax.f32 %v1034_v13, 0.0 }
 0x23a   :  { %1411 = vrot.lane.b32.xlu1 %v4488_v0, %s3511_s1  ;;  %1409 = vrot.lane.b32.xlu0 %v4490_v48, %s3511_s1  ;;  %v1055_v62 = vmax.f32 %v1035_v29, 0.0  ;;  %v4521_v51 = vmax.f32 %v1050_v30, %v1094_v28  ;;  %v4523_v56 = vmax.f32 %v1049_v4, %v1095_v35  ;;  %v1072_v18 = vrot.slane %v1052_v26, 1 }
 0x23b   :  { %v1073_v41 = vrot.slane %v1053_v20, 1  ;;  %v1074_v50 = vrot.slane %v1054_v55, 1  ;;  %v1036_v43 = vadd.f32 %v4445_v16, %v1010_v5  ;;  %v1037_v63 = vadd.f32 %v4445_v16, %v1011_v52 }
 0x23c   :  { %v1075_v31 = vrot.slane %v1055_v62, 1  ;;  %v5992_v57 = vrot.slane %v4482_v58, 2  ;;  %v1226_v10 = vrot.slane %v4490_v48, 2  ;;  %v1093_v34 = vsel %vm295_vm0, %v1071_v40, %v1072_v18 }
 0x23d   :  { %v1092_v4 = vsel %vm295_vm0, %v1072_v18, %v1073_v41  ;;  %v4539_v8 = vmax.f32 %v1051_v21, %v1093_v34  ;;  %v1091_v49 = vsel %vm295_vm0, %v1073_v41, %v1074_v50  ;;  %v1056_v5 = vmax.f32 %v1036_v43, 0.0 }
 0x23e   :  { %1415 = vrot.lane.b32.xlu1 %v4500_v15, %s3511_s1  ;;  %1413 = vrot.lane.b32.xlu0 %v4502_v11, %s3511_s1  ;;  %v4537_v30 = vmax.f32 %v1052_v26, %v1092_v4  ;;  %v1090_v17 = vsel %vm295_vm0, %v1074_v50, %v1075_v31  ;;  %v4547_v29 = vmax.f32 %v1053_v20, %v1091_v49  ;;  %v1057_v52 = vmax.f32 %v1037_v63, 0.0 }
 0x23f   :  { %v4545_v13 = vmax.f32 %v1054_v55, %v1090_v17  ;;  %v5993_v28 = vmax.f32 %v4462_v25, 0.0  ;;  %v1012_v40 = vmul.f32 %v4382_v46, %v4429_v42  ;;  %v1013_v21 = vmul.f32 %v4429_v42, %v4398_v9 }
 0x240   :  { %v1227_v26 = vrot.slane %v4488_v0, 2  ;;  %v1228_v35 = vrot.slane %v4502_v11, 2  ;;  %v1076_v20 = vrot.slane %v1056_v5, 1  ;;  %v1077_v55 = vrot.slane %v1057_v52, 1 }
 0x241   :  { %v1038_v18 = vadd.f32 %v4445_v16, %v1012_v40  ;;  %v1039_v46 = vadd.f32 %v4445_v16, %v1013_v21  ;;  %v1014_v9 = vmul.f32 %v4396_v59, %v4429_v42  ;;  %v1016_v41 = vmul.f32 %v4410_v22, %v4429_v42 }
 0x242   :  { %1419 = vrot.lane.b32.xlu1 %v4521_v51, %s3511_s1  ;;  %1417 = vrot.lane.b32.xlu0 %v4523_v56, %s3511_s1  ;;  %v1088_v50 = vsel %vm295_vm0, %v1076_v20, %v1077_v55  ;;  %v1089_v43 = vsel %vm295_vm0, %v1075_v31, %v1076_v20  ;;  %v4573_v63 = vsel %vm1244_vm8, %v1225_v7, %v1226_v10  ;;  %v1229_v17 = vrot.slane %v4500_v15, 2 }
 0x243   :  { %v4579_v4 = vsel %vm1244_vm8, %v5992_v57, %v1225_v7  ;;  %v4581_v59 = vmax.f32 %v1056_v5, %v1088_v50  ;;  %v4583_v34 = vmax.f32 %v1055_v62, %v1089_v43  ;;  %v1058_v22 = vmax.f32 %v1038_v18, 0.0  ;;  %v4601_v43 = vpop.permute.xlu0 %1267 }
 0x244   :  { %v1059_v42 = vmax.f32 %v1039_v46, 0.0  ;;  %v1231_v31 = vrot.slane %v4521_v51, 2  ;;  %v1040_v49 = vadd.f32 %v4445_v16, %v1014_v9  ;;  %v1042_v7 = vadd.f32 %v4445_v16, %v1016_v41  ;;  %v4603_v9 = vpop.permute.xlu1 %1272 }
 0x245   :  { %v1230_v5 = vrot.slane %v4523_v56, 2  ;;  %v1232_v62 = vrot.slane %v4539_v8, 2  ;;  %v1078_v40 = vrot.slane %v1058_v22, 1  ;;  %v1081_v20 = vrot.slane %v5993_v28, 1 }
 0x246   :  { %1423 = vrot.lane.b32.xlu1 %v4537_v30, %s3511_s1  ;;  %1421 = vrot.lane.b32.xlu0 %v4539_v8, %s3511_s1  ;;  %v1079_v21 = vrot.slane %v1059_v42, 1  ;;  %v1060_v18 = vmax.f32 %v1040_v49, 0.0  ;;  %v1062_v46 = vmax.f32 %v1042_v7, 0.0  ;;  %v4599_v50 = vsel %vm1244_vm8, %v1227_v26, %v1228_v35 }
 0x247   :  { %v1233_v16 = vrot.slane %v4537_v30, 2  ;;  %v1087_v57 = vsel %vm295_vm0, %v1077_v55, %v1078_v40  ;;  %v4612_v49 = vsel %vm1244_vm8, %v1226_v10, %v1227_v26  ;;  %v1235_v24 = vrot.slane %v4545_v13, 2 }
 0x248   :  { %v1086_v41 = vsel %vm295_vm0, %v1078_v40, %v1079_v21  ;;  %v4620_v28 = vmax.f32 %v1057_v52, %v1087_v57  ;;  %v1080_v32 = vrot.slane %v1060_v18, 1  ;;  %v1082_v27 = vrot.slane %v1062_v46, 1 }
 0x249   :  { %v4618_v7 = vmax.f32 %v1058_v22, %v1086_v41  ;;  %v4625_v55 = vsel %vm1244_vm8, %v1229_v17, %v1230_v5  ;;  %v4629_v10 = vsel %vm1244_vm8, %v1228_v35, %v1229_v17  ;;  %v4633_v26 = vsel %vm1244_vm8, %v1231_v31, %v1232_v62 }
 0x24a   :  { %1427 = vrot.lane.b32.xlu1 %v4545_v13, %s3511_s1  ;;  %1425 = vrot.lane.b32.xlu0 %v4547_v29, %s3511_s1  ;;  %v1234_v22 = vrot.slane %v4547_v29, 2  ;;  %v1236_v57 = vrot.slane %v4583_v34, 2  ;;  %v1084_v52 = vsel %vm295_vm0, %v1080_v32, %v1081_v20  ;;  %v1085_v40 = vsel %vm295_vm0, %v1079_v21, %v1080_v32 }
 0x24b   :  { %v4641_v41 = vmax.f32 %v1060_v18, %v1084_v52  ;;  %v4643_v47 = vmax.f32 %v1059_v42, %v1085_v40  ;;  %v1102_v35 = vsel %vm295_vm0, %v1082_v27, %v4471_v12  ;;  %v1083_v17 = vsel %vm295_vm0, %v1081_v20, %v1082_v27  ;;  %v4660_v42 = vpop.permute.xlu0 %1277  ;;  %v1283_v18 = vpop.permute.xlu1 %1282 }
 0x24c   :  { %v4654_v33 = vmax.f32 %v1062_v46, %v1102_v35  ;;  %v6028_v32 = vmax.f32 %v4462_v25, 0.0  ;;  %v1237_v12 = vrot.slane %v4581_v59, 2  ;;  %v1239_v52 = vrot.slane %v4618_v7, 2 }
 0x24d   :  { %v1238_v27 = vrot.slane %v4620_v28, 2  ;;  %v1240_v20 = vrot.slane %v4643_v47, 2  ;;  %v1241_v40 = vrot.slane %v4641_v41, 2  ;;  %v4669_v46 = vsel %vm1244_vm8, %v1230_v5, %v1231_v31 }
 0x24e   :  { %1431 = vrot.lane.b32.xlu1 %v4581_v59, %s3511_s1  ;;  %1429 = vrot.lane.b32.xlu0 %v4583_v34, %s3511_s1  ;;  %v4658_v21 = vmax.f32 %v6028_v32, %v1083_v17  ;;  %v4673_v25 = vsel %vm1244_vm8, %v1233_v16, %v1234_v22  ;;  %v1243_v35 = vrot.slane %v4654_v33, 2  ;;  %v4679_v32 = vsel %vm1244_vm8, %v1232_v62, %v1233_v16 }
 0x24f   :  { %v4683_v38 = vsel %vm1244_vm8, %v1235_v24, %v1236_v57  ;;  %v4691_v31 = vsel %vm1244_vm8, %v1234_v22, %v1235_v24  ;;  %v1163_v5 = vrot.slane %v4482_v58, 6  ;;  %v1164_v54 = vrot.slane %v4480_v39, 6  ;;  %v1288_v39 = vpop.permute.xlu0 %1287  ;;  %v1293_v22 = vpop.permute.xlu1 %1292 }
 0x250   :  { %v1242_v17 = vrot.slane %v4658_v21, 2  ;;  %v4697_v62 = vsel %vm1244_vm8, %v1237_v12, %v1238_v27  ;;  %v4701_v16 = vsel %vm1244_vm8, %v1236_v57, %v1237_v12  ;;  %v4705_v1 = vsel %vm1244_vm8, %v1239_v52, %v1240_v20 }
 0x251   :  { %v4710_v24 = vsel %vm1244_vm8, %v1238_v27, %v1239_v52  ;;  %v4719_v57 = vsel %vm1244_vm8, %v1240_v20, %v1241_v40  ;;  %v6029_v12 = vrot.slane %v4482_v58, 2  ;;  %v1165_v52 = vrot.slane %v4490_v48, 6 }
 0x252   :  { %1435 = vrot.lane.b32.xlu1 %v4618_v7, %s3511_s1  ;;  %1433 = vrot.lane.b32.xlu0 %v4620_v28, %s3511_s1  ;;  %v4715_v44 = vsel %vm1244_vm8, %v1241_v40, %v1242_v17  ;;  %v4734_v27 = vsel %vm1244_vm8, %v1242_v17, %v1243_v35  ;;  %v4738_v20 = vsel %vm1183_vm9, %v1163_v5, %v1164_v54  ;;  %v6030_v58 = vrot.slane %v4654_v33, 6 }
 0x253   :  { %v4725_v45 = vsel %vm1244_vm8, %v1243_v35, %v6029_v12  ;;  %v1166_v12 = vrot.slane %v4488_v0, 6  ;;  %v4749_v37 = vsel %vm1183_vm9, %v1164_v54, %v1165_v52  ;;  %v1167_v35 = vrot.slane %v4502_v11, 6  ;;  %v1303_v36 = vpop.permute.xlu1 %1302 }
 0x254   :  { %v4744_v40 = vsel %vm1183_vm9, %v6030_v58, %v1163_v5  ;;  %v1168_v17 = vrot.slane %v4500_v15, 6  ;;  %v1169_v0 = vrot.slane %v4523_v56, 6  ;;  %v1170_v5 = vrot.slane %v4521_v51, 6  ;;  %v1298_v58 = vpop.permute.xlu0 %1297 }
 0x255   :  { %v4753_v48 = vsel %vm1183_vm9, %v1165_v52, %v1166_v12  ;;  %v1171_v54 = vrot.slane %v4539_v8, 6  ;;  %v4770_v15 = vsel %vm1183_vm9, %v1166_v12, %v1167_v35  ;;  %v1172_v11 = vrot.slane %v4537_v30, 6 }
 0x256   :  { %1439 = vrot.lane.b32.xlu1 %v4641_v41, %s3511_s1  ;;  %1437 = vrot.lane.b32.xlu0 %v4643_v47, %s3511_s1  ;;  %v4766_v52 = vsel %vm1183_vm9, %v1167_v35, %v1168_v17  ;;  %v1173_v14 = vrot.slane %v4547_v29, 6  ;;  %v1366_v56 = vmul.f32 %v4603_v9, %v4573_v63  ;;  %v1365_v51 = vmul.f32 %v4601_v43, %v4579_v4 }
 0x257   :  { %v4780_v8 = vsel %vm1183_vm9, %v1169_v0, %v1170_v5  ;;  %v4784_v23 = vsel %vm1183_vm9, %v1168_v17, %v1169_v0  ;;  %v4788_v12 = vsel %vm1183_vm9, %v1171_v54, %v1172_v11  ;;  %v4792_v30 = vsel %vm1183_vm9, %v1170_v5, %v1171_v54  ;;  %v1313_v54 = vpop.permute.xlu1 %1312 }
 0x258   :  { %v1368_v29 = vmul.f32 %v1283_v18, %v4599_v50  ;;  %v1174_v63 = vrot.slane %v4545_v13, 6  ;;  %v4800_v4 = vsel %vm1183_vm9, %v1172_v11, %v1173_v14  ;;  %v1367_v43 = vmul.f32 %v4660_v42, %v4612_v49  ;;  %v1308_v5 = vpop.permute.xlu0 %1307 }
 0x259   :  { %v1175_v9 = vrot.slane %v4583_v34, 6  ;;  %v1176_v35 = vrot.slane %v4581_v59, 6  ;;  %v1177_v17 = vrot.slane %v4620_v28, 6  ;;  %v1178_v50 = vrot.slane %v4618_v7, 6  ;;  %v1586_v34 = vld [vmem:[%s5980_s8] sm:$0xff]  ;;  %v1587_v7 = vld [vmem:[%s5980_s8 + $0x8] sm:$0xff] }
 0x25a   :  { %1443 = vrot.lane.b32.xlu1 %v4654_v33, %s3511_s1  ;;  %1441 = vrot.lane.b32.xlu0 %v4658_v21, %s3511_s1  ;;  %v4809_v0 = vsel %vm1183_vm9, %v1173_v14, %v1174_v63  ;;  %v1179_v13 = vrot.slane %v4643_v47, 6  ;;  %v1180_v18 = vrot.slane %v4641_v41, 6  ;;  %v1181_v28 = vrot.slane %v4658_v21, 6 }
 0x25b   :  { %v4816_v49 = vsel %vm1183_vm9, %v1175_v9, %v1176_v35  ;;  %v4820_v59 = vsel %vm1183_vm9, %v1174_v63, %v1175_v9  ;;  %v4824_v14 = vsel %vm1183_vm9, %v1176_v35, %v1177_v17  ;;  %v4830_v47 = vsel %vm1183_vm9, %v1177_v17, %v1178_v50 }
 0x25c   :  { %v4841_v41 = vsel %vm1183_vm9, %v1179_v13, %v1180_v18  ;;  %v4845_v42 = vsel %vm1183_vm9, %v1178_v50, %v1179_v13  ;;  %v1370_v11 = vmul.f32 %v1293_v22, %v4625_v55  ;;  %v1369_v21 = vmul.f32 %v1288_v39, %v4629_v10  ;;  %v1588_v55 = vld [vmem:[%s5980_s8 + $0x10] sm:$0xff]  ;;  %v1318_v10 = vpop.permute.xlu0 %1317  ;;  %v1323_v39 = vpop.permute.xlu1 %1322 }
 0x25d   :  { %v3462_v63 = vpack.c.bf16 %v1587_v7, %v1586_v34  ;;  %v1371_v22 = vmul.f32 %v1298_v58, %v4669_v46  ;;  %v1373_v9 = vmul.f32 %v1308_v5, %v4679_v32  ;;  %v1150_v34 = vld [vmem:[%s5981_s4 + $0x38] sm:$0xff]  ;;  %v1149_v7 = vld [vmem:[%s5981_s4 + $0x30] sm:$0xff]  ;;  %vm2609_vm0 = vcmask 654336  }
 0x25e   :  { %1487 = vrot.lane.b32.xlu1 %v1366_v56, %s3512_s6  ;;  %1485 = vrot.lane.b32.xlu0 %v1365_v51, %s3512_s6  ;;  %v6031_v56 = vrot.slane %v4654_v33, 6  ;;  %v1372_v33 = vmul.f32 %v1303_v36, %v4633_v26  ;;  %v1376_v36 = vmul.f32 %v1323_v39, %v4683_v38  ;;  %v1375_v26 = vmul.f32 %v1318_v10, %v4691_v31  ;;  %v1155_v10 = vld [vmem:[%s5981_s4 + $0x60] sm:$0xff]  ;;  %v1158_v39 = vld [vmem:[%s5981_s4 + $0x78] sm:$0xff] }
 0x25f   :  { %3463 = vmatprep.subr.bf16.mxu1 %v3462_v63 }
 0x260   :  { %v4853_v51 = vsel %vm1183_vm9, %v1181_v28, %v6031_v56  ;;  %3465 = vmatpush3.bf16.msra.mxu1 %v3462_v63  ;;  %v1328_v35 = vpop.permute.xlu0 %1327  ;;  %v1333_v17 = vpop.permute.xlu1 %1332  ;;  %v1154_v56 = vld [vmem:[%s5981_s4 + $0x58] sm:$0xff]  ;;  %v1153_v63 = vld [vmem:[%s5981_s4 + $0x50] sm:$0xff] }
 0x261   :  { %3336 = vmatprep.subr.mxu1 %v1588_v55  ;;  %v1377_v32 = vmul.f32 %v1328_v35, %v4701_v16  ;;  %v1161_v35 = vld [vmem:[%s5981_s4 + $0x90] sm:$0xff] }
 0x262   :  { %1491 = vrot.lane.b32.xlu1 %v1368_v29, %s3512_s6  ;;  %1489 = vrot.lane.b32.xlu0 %v1367_v43, %s3512_s6  ;;  %v4857_v29 = vsel %vm1183_vm9, %v1180_v18, %v1181_v28  ;;  %v1374_v43 = vmul.f32 %v1313_v54, %v4673_v25  ;;  %v1378_v25 = vmul.f32 %v1333_v17, %v4697_v62  ;;  %v1148_v54 = vld [vmem:[%s5981_s4 + $0x28] sm:$0xff]  ;;  %v1147_v28 = vld [vmem:[%s5981_s4 + $0x20] sm:$0xff] }
 0x264   :  { %3337 = vmatpush3.msra.mxu1 %v1588_v55  ;;  %v1338_v46 = vpop.permute.xlu0 %1337  ;;  %v1343_v58 = vpop.permute.xlu1 %1342  ;;  %v1156_v55 = vld [vmem:[%s5981_s4 + $0x68] sm:$0xff] }
 0x265   :  { %v1380_v50 = vmul.f32 %v1343_v58, %v4705_v1  ;;  %v1379_v38 = vmul.f32 %v1338_v46, %v4710_v24 }
 0x266   :  { %1495 = vrot.lane.b32.xlu1 %v1370_v11, %s3512_s6  ;;  %1493 = vrot.lane.b32.xlu0 %v1369_v21, %s3512_s6  ;;  %v1152_v11 = vld [vmem:[%s5981_s4 + $0x48] sm:$0xff]  ;;  %v1151_v21 = vld [vmem:[%s5981_s4 + $0x40] sm:$0xff] }
 0x268   :  { %v1348_v13 = vpop.permute.xlu0 %1347  ;;  %v1353_v31 = vpop.permute.xlu1 %1352 }
 0x269   :  { %v1382_v18 = vmul.f32 %v1353_v31, %v4715_v44  ;;  %v1381_v62 = vmul.f32 %v1348_v13, %v4719_v57  ;;  %v1144_v44 = vld [vmem:[%s5981_s4 + $0x8] sm:$0xff]  ;;  %v1143_v57 = vld [vmem:[%s5981_s4] sm:$0xff] }
 0x26a   :  { %1499 = vrot.lane.b32.xlu1 %v1372_v33, %s3512_s6  ;;  %1497 = vrot.lane.b32.xlu0 %v1371_v22, %s3512_s6  ;;  %v1157_v33 = vld [vmem:[%s5981_s4 + $0x70] sm:$0xff]  ;;  %v1160_v22 = vld [vmem:[%s5981_s4 + $0x88] sm:$0xff] }
 0x26c   :  { %v1358_v16 = vpop.permute.xlu0 %1357  ;;  %v1363_v5 = vpop.permute.xlu1 %1362 }
 0x26d   :  { %v1384_v1 = vmul.f32 %v1363_v5, %v4725_v45  ;;  %v1383_v24 = vmul.f32 %v1358_v16, %v4734_v27  ;;  %v1146_v45 = vld [vmem:[%s5981_s4 + $0x18] sm:$0xff]  ;;  %v1145_v27 = vld [vmem:[%s5981_s4 + $0x10] sm:$0xff] }
 0x26e   :  { %1503 = vrot.lane.b32.xlu1 %v1374_v43, %s3512_s6  ;;  %1501 = vrot.lane.b32.xlu0 %v1373_v9, %s3512_s6  ;;  %v1159_v43 = vld [vmem:[%s5981_s4 + $0x80] sm:$0xff]  ;;  %v1162_v9 = vld [vmem:[%s5981_s4 + $0x98] sm:$0xff] }
 0x272   :  { %1507 = vrot.lane.b32.xlu1 %v1376_v36, %s3512_s6  ;;  %1505 = vrot.lane.b32.xlu0 %v1375_v26, %s3512_s6 }
 0x276   :  { %1511 = vrot.lane.b32.xlu1 %v1378_v25, %s3512_s6  ;;  %1509 = vrot.lane.b32.xlu0 %v1377_v32, %s3512_s6 }
 0x27a   :  { %1515 = vrot.lane.b32.xlu1 %v1380_v50, %s3512_s6  ;;  %1513 = vrot.lane.b32.xlu0 %v1379_v38, %s3512_s6 }
 0x27e   :  { %1519 = vrot.lane.b32.xlu1 %v1382_v18, %s3512_s6  ;;  %1517 = vrot.lane.b32.xlu0 %v1381_v62, %s3512_s6 }
 0x282   :  { %1523 = vrot.lane.b32.xlu1 %v1384_v1, %s3512_s6  ;;  %1521 = vrot.lane.b32.xlu0 %v1383_v24, %s3512_s6 }
 0x286   :  { %1822 = vperm.xlu1 %3503, %v1144_v44   ;;  %1817 = vperm.xlu0 %3502, %v1143_v57  }
 0x28a   :  { %1832 = vperm.xlu1 %3503, %v1146_v45   ;;  %1827 = vperm.xlu0 %3502, %v1145_v27   ;;  %v1205_v27 = vmul.f32 %v4738_v20, %v3990_v53  ;;  %v1206_v53 = vmul.f32 %v4749_v37, %v4002_v61  ;;  %v1208_v61 = vmul.f32 %v4770_v15, %v4011_v3 }
 0x28e   :  { %1842 = vperm.xlu1 %3503, %v1148_v54   ;;  %1837 = vperm.xlu0 %3502, %v1147_v28   ;;  %v1204_v54 = vmul.f32 %v4744_v40, %v3992_v19 }
 0x292   :  { %1852 = vperm.xlu1 %3503, %v1150_v34   ;;  %1847 = vperm.xlu0 %3502, %v1149_v7  }
 0x296   :  { %1862 = vperm.xlu1 %3503, %v1152_v11   ;;  %1857 = vperm.xlu0 %3502, %v1151_v21  }
 0x29a   :  { %1872 = vperm.xlu1 %3503, %v1154_v56   ;;  %1867 = vperm.xlu0 %3502, %v1153_v63   ;;  %v1207_v63 = vmul.f32 %v4753_v48, %v4000_v60  ;;  %v1209_v60 = vmul.f32 %v4766_v52, %v4009_v2  ;;  %v6033_v52 = vld [vmem:[#allocation4_spill] sm:$0xff] }
 0x29b   :  { %v1210_v3 = vmul.f32 %v4784_v23, %v6033_v52 }
 0x29e   :  { %1882 = vperm.xlu1 %3503, %v1156_v55   ;;  %1877 = vperm.xlu0 %3502, %v1155_v10  }
 0x2a2   :  { %1892 = vperm.xlu1 %3503, %v1158_v39   ;;  %1887 = vperm.xlu0 %3502, %v1157_v33  }
 0x2a6   :  { %1902 = vperm.xlu1 %3503, %v1160_v22   ;;  %1897 = vperm.xlu0 %3502, %v1159_v43  }
 0x2a8   :  { %v1408_v17 = vpop.permute.xlu1 %1407  ;;  %v1406_v36 = vpop.permute.xlu0 %1405 }
 0x2a9   :  { %v1546_v28 = vsel %vm617_vm6, %v1205_v27, %v1408_v17  ;;  %v1545_v34 = vsel %vm617_vm6, %v1204_v54, %v1406_v36  ;;  %v6035_v27 = vld [vmem:[#allocation6_spill] sm:$0xff] }
 0x2aa   :  { %1912 = vperm.xlu1 %3503, %v1162_v9   ;;  %1907 = vperm.xlu0 %3502, %v1161_v35   ;;  %v6032_v35 = vld [vmem:[#allocation3_spill] sm:$0xff]  ;;  %v1212_v23 = vmul.f32 %v4792_v30, %v6035_v27 }
 0x2ab   :  { %v1211_v2 = vmul.f32 %v4780_v8, %v6032_v35 }
 0x2ac   :  { %v1412_v26 = vpop.permute.xlu1 %1411  ;;  %v1410_v46 = vpop.permute.xlu0 %1409 }
 0x2ad   :  { %v1548_v19 = vsel %vm617_vm6, %v1207_v63, %v1412_v26  ;;  %v1547_v20 = vsel %vm617_vm6, %v1206_v53, %v1410_v46 }
 0x2b0   :  { %v1416_v58 = vpop.permute.xlu1 %1415  ;;  %v1414_v25 = vpop.permute.xlu0 %1413 }
 0x2b1   :  { %v1550_v37 = vsel %vm617_vm6, %v1209_v60, %v1416_v58  ;;  %v1549_v48 = vsel %vm617_vm6, %v1208_v61, %v1414_v25  ;;  %v6034_v25 = vld [vmem:[#allocation5_spill] sm:$0xff] }
 0x2b2   :  { %v1213_v8 = vmul.f32 %v4788_v12, %v6034_v25 }
 0x2b4   :  { %v1420_v32 = vpop.permute.xlu1 %1419  ;;  %v1418_v50 = vpop.permute.xlu0 %1417 }
 0x2b5   :  { %v1552_v15 = vsel %vm617_vm6, %v1211_v2, %v1420_v32  ;;  %v1551_v17 = vsel %vm617_vm6, %v1210_v3, %v1418_v50 }
 0x2b8   :  { %v1424_v38 = vpop.permute.xlu1 %1423  ;;  %v1422_v13 = vpop.permute.xlu0 %1421 }
 0x2b9   :  { %v1554_v32 = vsel %vm617_vm6, %v1213_v8, %v1424_v38  ;;  %v1553_v50 = vsel %vm617_vm6, %v1212_v23, %v1422_v13 }
 0x2bc   :  { %v4952_v31 = vpop.permute.xlu1 %1427  ;;  %v4954_v18 = vpop.permute.xlu0 %1425 }
 0x2c0   :  { %v4956_v62 = vpop.permute.xlu1 %1431  ;;  %v4958_v16 = vpop.permute.xlu0 %1429 }
 0x2c4   :  { %v4960_v5 = vpop.permute.xlu1 %1435  ;;  %v4962_v1 = vpop.permute.xlu0 %1433 }
 0x2c8   :  { %v4964_v24 = vpop.permute.xlu1 %1439  ;;  %v4966_v44 = vpop.permute.xlu0 %1437 }
 0x2cc   :  { %v4968_v57 = vpop.permute.xlu1 %1443  ;;  %v4970_v45 = vpop.permute.xlu0 %1441 }
 0x2d0   :  { %v1488_v7 = vpop.permute.xlu1 %1487  ;;  %v1486_v11 = vpop.permute.xlu0 %1485 }
 0x2d1   :  { %v1567_v21 = vsel %vm1565_vm10, %v1546_v28, %v1488_v7  ;;  %v1566_v56 = vsel %vm1565_vm10, %v1545_v34, %v1486_v11  ;;  %v6036_v11 = vld [vmem:[#allocation7_spill] sm:$0xff] }
 0x2d2   :  { %3338 = vmatprep.mubr.msk.f32.mxu1 %vm1589_vm11, %v1566_v56  ;;  %v1215_v12 = vmul.f32 %v4809_v0, %v6036_v11  ;;  %v6038_v0 = vld [vmem:[#allocation10_spill] sm:$0xff] }
 0x2d3   :  { %3339 = vmatmul.mubr.msk.f32.vlgmr.msra.gmra.mrb[0].mxu1 %vm1589_vm11, %v1567_v21  ;;  %v6037_v21 = vld [vmem:[#allocation8_spill] sm:$0xff] }
 0x2d4   :  { %v1492_v40 = vpop.permute.xlu1 %1491  ;;  %v1490_v55 = vpop.permute.xlu0 %1489  ;;  %v1214_v30 = vmul.f32 %v4800_v4, %v6037_v21  ;;  %v1556_v38 = vsel %vm617_vm6, %v1215_v12, %v4952_v31  ;;  %v6039_v4 = vld [vmem:[#allocation9_spill] sm:$0xff] }
 0x2d5   :  { %v1569_v10 = vsel %vm1565_vm10, %v1548_v19, %v1492_v40  ;;  %v1568_v39 = vsel %vm1565_vm10, %v1547_v20, %v1490_v55  ;;  %v1217_v20 = vmul.f32 %v4816_v49, %v6038_v0  ;;  %v1216_v40 = vmul.f32 %v4820_v59, %v6039_v4  ;;  %v6040_v49 = vld [vmem:[#allocation12_spill] sm:$0xff]  ;;  %v6041_v59 = vld [vmem:[#allocation11_spill] sm:$0xff] }
 0x2d6   :  { %3341 = vmatprep.mubr.msk.f32.mxu1 %vm1589_vm11, %v1568_v39  ;;  %v1555_v13 = vsel %vm617_vm6, %v1214_v30, %v4954_v18  ;;  %v1219_v61 = vmul.f32 %v4830_v47, %v6040_v49  ;;  %v6042_v47 = vld [vmem:[#allocation14_spill] sm:$0xff] }
 0x2d7   :  { %3342 = vmatmul.mubr.msk.f32.gmra.mrb[2].mxu1 %vm1589_vm11, %v1569_v10  ;;  %v1558_v31 = vsel %vm617_vm6, %v1217_v20, %v4956_v62  ;;  %v1557_v18 = vsel %vm617_vm6, %v1216_v40, %v4958_v16 }
 0x2d8   :  { %v1496_v33 = vpop.permute.xlu1 %1495  ;;  %v1494_v22 = vpop.permute.xlu0 %1493  ;;  %v1560_v62 = vsel %vm617_vm6, %v1219_v61, %v4960_v5 }
 0x2d9   :  { %v1571_v43 = vsel %vm1565_vm10, %v1550_v37, %v1496_v33  ;;  %v1570_v9 = vsel %vm1565_vm10, %v1549_v48, %v1494_v22  ;;  %v1218_v37 = vmul.f32 %v4824_v14, %v6041_v59  ;;  %v6043_v14 = vld [vmem:[#allocation13_spill] sm:$0xff] }
 0x2da   :  { %3344 = vmatprep.mubr.msk.f32.mxu1 %vm1589_vm11, %v1570_v9  ;;  %v1221_v9 = vmul.f32 %v4841_v41, %v6042_v47  ;;  %v1220_v35 = vmul.f32 %v4845_v42, %v6043_v14  ;;  %v6044_v41 = vld [vmem:[#allocation16_spill] sm:$0xff]  ;;  %v6045_v42 = vld [vmem:[#allocation15_spill] sm:$0xff] }
 0x2db   :  { %3345 = vmatmul.mubr.msk.f32.gmra.mrb[4].mxu1 %vm1589_vm11, %v1571_v43  ;;  %v1559_v16 = vsel %vm617_vm6, %v1218_v37, %v4962_v1 }
 0x2dc   :  { %v1500_v36 = vpop.permute.xlu1 %1499  ;;  %v1498_v26 = vpop.permute.xlu0 %1497  ;;  %v1562_v5 = vsel %vm617_vm6, %v1221_v9, %v4964_v24  ;;  %v1561_v1 = vsel %vm617_vm6, %v1220_v35, %v4966_v44 }
 0x2dd   :  { %v1573_v46 = vsel %vm1565_vm10, %v1552_v15, %v1500_v36  ;;  %v1572_v58 = vsel %vm1565_vm10, %v1551_v17, %v1498_v26  ;;  %v1223_v17 = vmul.f32 %v4853_v51, %v6044_v41  ;;  %v1222_v36 = vmul.f32 %v4857_v29, %v6045_v42 }
 0x2de   :  { %3347 = vmatprep.mubr.msk.f32.mxu1 %vm1589_vm11, %v1572_v58 }
 0x2df   :  { %3348 = vmatmul.mubr.msk.f32.gmra.mrb[6].mxu1 %vm1589_vm11, %v1573_v46  ;;  %v1564_v24 = vsel %vm617_vm6, %v1223_v17, %v4968_v57  ;;  %v1563_v44 = vsel %vm617_vm6, %v1222_v36, %v4970_v45 }
 0x2e0   :  { %v1504_v54 = vpop.permute.xlu1 %1503  ;;  %v1502_v28 = vpop.permute.xlu0 %1501 }
 0x2e1   :  { %v1575_v34 = vsel %vm1565_vm10, %v1554_v32, %v1504_v54  ;;  %v1574_v7 = vsel %vm1565_vm10, %v1553_v50, %v1502_v28 }
 0x2e2   :  { %3350 = vmatprep.mubr.msk.f32.mxu1 %vm1589_vm11, %v1574_v7 }
 0x2e3   :  { %3351 = vmatmul.mubr.msk.f32.gmra.mrb[8].mxu1 %vm1589_vm11, %v1575_v34 }
 0x2e4   :  { %v1508_v56 = vpop.permute.xlu1 %1507  ;;  %v1506_v63 = vpop.permute.xlu0 %1505 }
 0x2e5   :  { %v1577_v53 = vsel %vm1565_vm10, %v1556_v38, %v1508_v56  ;;  %v1576_v19 = vsel %vm1565_vm10, %v1555_v13, %v1506_v63 }
 0x2e6   :  { %3353 = vmatprep.mubr.msk.f32.mxu1 %vm1589_vm11, %v1576_v19 }
 0x2e7   :  { %3354 = vmatmul.mubr.msk.f32.gmra.mrb[10].mxu1 %vm1589_vm11, %v1577_v53 }
 0x2e8   :  { %v1512_v55 = vpop.permute.xlu1 %1511  ;;  %v1510_v10 = vpop.permute.xlu0 %1509 }
 0x2e9   :  { %v1579_v39 = vsel %vm1565_vm10, %v1558_v31, %v1512_v55  ;;  %v1578_v60 = vsel %vm1565_vm10, %v1557_v18, %v1510_v10 }
 0x2ea   :  { %3356 = vmatprep.mubr.msk.f32.mxu1 %vm1589_vm11, %v1578_v60 }
 0x2eb   :  { %3357 = vmatmul.mubr.msk.f32.gmra.mrb[12].mxu1 %vm1589_vm11, %v1579_v39 }
 0x2ec   :  { %v1516_v48 = vpop.permute.xlu1 %1515  ;;  %v1514_v33 = vpop.permute.xlu0 %1513 }
 0x2ed   :  { %v1581_v22 = vsel %vm1565_vm10, %v1560_v62, %v1516_v48  ;;  %v1580_v43 = vsel %vm1565_vm10, %v1559_v16, %v1514_v33 }
 0x2ee   :  { %3359 = vmatprep.mubr.msk.f32.mxu1 %vm1589_vm11, %v1580_v43 }
 0x2ef   :  { %3360 = vmatmul.mubr.msk.f32.gmra.mrb[14].mxu1 %vm1589_vm11, %v1581_v22 }
 0x2f0   :  { %v1520_v2 = vpop.permute.xlu1 %1519  ;;  %v1518_v52 = vpop.permute.xlu0 %1517 }
 0x2f1   :  { %v1583_v3 = vsel %vm1565_vm10, %v1562_v5, %v1520_v2  ;;  %v1582_v15 = vsel %vm1565_vm10, %v1561_v1, %v1518_v52 }
 0x2f2   :  { %3362 = vmatprep.mubr.msk.f32.mxu1 %vm1589_vm11, %v1582_v15 }
 0x2f3   :  { %3363 = vmatmul.mubr.msk.f32.gmra.mrb[16].mxu1 %vm1589_vm11, %v1583_v3 }
 0x2f4   :  { %v1524_v26 = vpop.permute.xlu1 %1523  ;;  %v1522_v46 = vpop.permute.xlu0 %1521 }
 0x2f5   :  { %v1585_v58 = vsel %vm1565_vm10, %v1564_v24, %v1524_v26  ;;  %v1584_v25 = vsel %vm1565_vm10, %v1563_v44, %v1522_v46 }
 0x2f6   :  { %3365 = vmatprep.mubr.msk.f32.mxu1 %vm1589_vm11, %v1584_v25 }
 0x2f7   :  { %3366 = vmatmul.mubr.msk.f32.gmra.mrb[18].mxu1 %vm1589_vm11, %v1585_v58 }
 0x305   :  { %v1823_v51 = vpop.permute.xlu1 %1822  ;;  %v1818_v29 = vpop.permute.xlu0 %1817 }
 0x309   :  { %v1833_v8 = vpop.permute.xlu1 %1832  ;;  %v1828_v27 = vpop.permute.xlu0 %1827 }
 0x30d   :  { %v1843_v23 = vpop.permute.xlu1 %1842  ;;  %v1838_v32 = vpop.permute.xlu0 %1837 }
 0x311   :  { %v1853_v57 = vpop.permute.xlu1 %1852  ;;  %v1848_v45 = vpop.permute.xlu0 %1847 }
 0x315   :  { %v1863_v53 = vpop.permute.xlu1 %1862  ;;  %v1858_v20 = vpop.permute.xlu0 %1857 }
 0x319   :  { %v1873_v16 = vpop.permute.xlu1 %1872  ;;  %v1868_v9 = vpop.permute.xlu0 %1867 }
 0x3a6   :  { %v5082_v50 = vpop.f32.mrb[0].mxu1 }
 0x3a7   :  { %v1916_v54 = vmul.f32 %v5082_v50, %v1823_v51  ;;  %v5085_v28 = vpop.f32.mrb[1].mxu1  ;;  %v1883_v51 = vpop.permute.xlu1 %1882 }
 0x3a8   :  { %v1915_v34 = vmul.f32 %v1818_v29, %v5085_v28 }
 0x3a9   :  { %v1936_v7 = vsel %vm1565_vm10, %v1916_v54, 0.0  ;;  %v1982_v11 = vmul.f32 %v5082_v50, %v1916_v54 }
 0x3aa   :  { %v1935_v12 = vsel %vm1565_vm10, %v1915_v34, 0.0  ;;  %v1981_v21 = vmul.f32 %v1915_v34, %v5085_v28  ;;  %v5092_v30 = vpop.f32.mrb[2].mxu1 }
 0x3ab   :  { %v2002_v38 = vsel %vm1565_vm10, %v1982_v11, 0.0  ;;  %v1937_v13 = vadd.f32 %v1936_v7, %v1935_v12  ;;  %v1918_v56 = vmul.f32 %v5092_v30, %v1833_v8  ;;  %v5096_v63 = vpop.f32.mrb[3].mxu1 }
 0x3ac   :  { %v2001_v19 = vsel %vm1565_vm10, %v1981_v21, 0.0  ;;  %v1917_v0 = vmul.f32 %v1828_v27, %v5096_v63 }
 0x3ad   :  { %v2003_v4 = vadd.f32 %v2002_v38, %v2001_v19  ;;  %v1984_v40 = vmul.f32 %v5092_v30, %v1918_v56  ;;  %v1940_v49 = vsel %vm1565_vm10, %v1918_v56, 0.0 }
 0x3ae   :  { %v1938_v31 = vsel %vm1565_vm10, %v1917_v0, 0.0  ;;  %v1983_v18 = vmul.f32 %v1917_v0, %v5096_v63  ;;  %v5103_v55 = vpop.f32.mrb[4].mxu1 }
 0x3af   :  { %v1939_v10 = vadd.f32 %v1938_v31, %v1937_v13  ;;  %v1920_v39 = vmul.f32 %v5103_v55, %v1843_v23  ;;  %v5106_v60 = vpop.f32.mrb[5].mxu1  ;;  %v2006_v48 = vsel %vm1565_vm10, %v1984_v40, 0.0  ;;  %v1878_v23 = vpop.permute.xlu0 %1877 }
 0x3b0   :  { %v2004_v61 = vsel %vm1565_vm10, %v1983_v18, 0.0  ;;  %v1919_v59 = vmul.f32 %v1838_v32, %v5106_v60 }
 0x3b1   :  { %v2005_v37 = vadd.f32 %v2004_v61, %v2003_v4  ;;  %v1941_v62 = vadd.f32 %v1940_v49, %v1939_v10  ;;  %v1986_v33 = vmul.f32 %v5103_v55, %v1920_v39  ;;  %v1944_v2 = vsel %vm1565_vm10, %v1920_v39, 0.0  ;;  %v1893_v4 = vpop.permute.xlu1 %1892 }
 0x3b2   :  { %v1942_v22 = vsel %vm1565_vm10, %v1919_v59, 0.0  ;;  %v1985_v43 = vmul.f32 %v1919_v59, %v5106_v60  ;;  %v5115_v47 = vpop.f32.mrb[6].mxu1 }
 0x3b3   :  { %v1943_v14 = vadd.f32 %v1942_v22, %v1941_v62  ;;  %v2007_v35 = vadd.f32 %v2006_v48, %v2005_v37  ;;  %v1922_v5 = vmul.f32 %v5115_v47, %v1853_v57  ;;  %v5118_v1 = vpop.f32.mrb[7].mxu1  ;;  %v2010_v17 = vsel %vm1565_vm10, %v1986_v33, 0.0  ;;  %v1888_v49 = vpop.permute.xlu0 %1887 }
 0x3b4   :  { %v2008_v52 = vsel %vm1565_vm10, %v1985_v43, 0.0  ;;  %v1921_v3 = vmul.f32 %v1848_v45, %v5118_v1 }
 0x3b5   :  { %v2009_v15 = vadd.f32 %v2008_v52, %v2007_v35  ;;  %v1945_v41 = vadd.f32 %v1944_v2, %v1943_v14  ;;  %v1988_v42 = vmul.f32 %v5115_v47, %v1922_v5  ;;  %v1948_v29 = vsel %vm1565_vm10, %v1922_v5, 0.0 }
 0x3b6   :  { %v1946_v36 = vsel %vm1565_vm10, %v1921_v3, 0.0  ;;  %v1987_v24 = vmul.f32 %v1921_v3, %v5118_v1  ;;  %v5127_v44 = vpop.f32.mrb[8].mxu1 }
 0x3b7   :  { %v1947_v26 = vadd.f32 %v1946_v36, %v1945_v41  ;;  %v2011_v46 = vadd.f32 %v2010_v17, %v2009_v15  ;;  %v1924_v58 = vmul.f32 %v5127_v44, %v1863_v53  ;;  %v5130_v25 = vpop.f32.mrb[9].mxu1  ;;  %v2014_v45 = vsel %vm1565_vm10, %v1988_v42, 0.0  ;;  %v1903_v17 = vpop.permute.xlu1 %1902 }
 0x3b8   :  { %v2012_v8 = vsel %vm1565_vm10, %v1987_v24, 0.0  ;;  %v1923_v27 = vmul.f32 %v1858_v20, %v5130_v25 }
 0x3b9   :  { %v2013_v32 = vadd.f32 %v2012_v8, %v2011_v46  ;;  %v1949_v57 = vadd.f32 %v1948_v29, %v1947_v26  ;;  %v1990_v54 = vmul.f32 %v5127_v44, %v1924_v58  ;;  %v1952_v56 = vsel %vm1565_vm10, %v1924_v58, 0.0  ;;  %v1898_v26 = vpop.permute.xlu0 %1897 }
 0x3ba   :  { %v1950_v34 = vsel %vm1565_vm10, %v1923_v27, 0.0  ;;  %v1989_v7 = vmul.f32 %v1923_v27, %v5130_v25  ;;  %v5139_v11 = vpop.f32.mrb[10].mxu1 }
 0x3bb   :  { %v1951_v12 = vadd.f32 %v1950_v34, %v1949_v57  ;;  %v2015_v21 = vadd.f32 %v2014_v45, %v2013_v32  ;;  %v1926_v38 = vmul.f32 %v5139_v11, %v1873_v16  ;;  %v5142_v13 = vpop.f32.mrb[11].mxu1  ;;  %v2018_v40 = vsel %vm1565_vm10, %v1990_v54, 0.0 }
 0x3bc   :  { %v2016_v53 = vsel %vm1565_vm10, %v1989_v7, 0.0  ;;  %v1925_v19 = vmul.f32 %v1868_v9, %v5142_v13 }
 0x3bd   :  { %v2017_v0 = vadd.f32 %v2016_v53, %v2015_v21  ;;  %v1953_v20 = vadd.f32 %v1952_v56, %v1951_v12  ;;  %v1992_v31 = vmul.f32 %v5139_v11, %v1926_v38  ;;  %v1956_v16 = vsel %vm1565_vm10, %v1926_v38, 0.0  ;;  %v1913_v56 = vpop.permute.xlu1 %1912 }
 0x3be   :  { %v1954_v18 = vsel %vm1565_vm10, %v1925_v19, 0.0  ;;  %v1991_v10 = vmul.f32 %v1925_v19, %v5142_v13  ;;  %v5151_v39 = vpop.f32.mrb[12].mxu1 }
 0x3bf   :  { %v1955_v61 = vadd.f32 %v1954_v18, %v1953_v20  ;;  %v2019_v59 = vadd.f32 %v2018_v40, %v2017_v0  ;;  %v1928_v37 = vmul.f32 %v5151_v39, %v1883_v51  ;;  %v5154_v62 = vpop.f32.mrb[13].mxu1  ;;  %v2022_v9 = vsel %vm1565_vm10, %v1992_v31, 0.0  ;;  %v1908_v40 = vpop.permute.xlu0 %1907 }
 0x3c0   :  { %v2020_v48 = vsel %vm1565_vm10, %v1991_v10, 0.0  ;;  %v1927_v33 = vmul.f32 %v1878_v23, %v5154_v62 }
 0x3c1   :  { %v2021_v22 = vadd.f32 %v2020_v48, %v2019_v59  ;;  %v1957_v43 = vadd.f32 %v1956_v16, %v1955_v61  ;;  %v1994_v14 = vmul.f32 %v5151_v39, %v1928_v37  ;;  %v1960_v42 = vsel %vm1565_vm10, %v1928_v37, 0.0 }
 0x3c2   :  { %v1958_v35 = vsel %vm1565_vm10, %v1927_v33, 0.0  ;;  %v1993_v5 = vmul.f32 %v1927_v33, %v5154_v62  ;;  %v5163_v2 = vpop.f32.mrb[14].mxu1 }
 0x3c3   :  { %v1959_v52 = vadd.f32 %v1958_v35, %v1957_v43  ;;  %v2023_v3 = vadd.f32 %v2022_v9, %v2021_v22  ;;  %v1930_v15 = vmul.f32 %v5163_v2, %v1893_v4  ;;  %v5166_v41 = vpop.f32.mrb[15].mxu1  ;;  %v2026_v51 = vsel %vm1565_vm10, %v1994_v14, 0.0 }
 0x3c4   :  { %v2024_v36 = vsel %vm1565_vm10, %v1993_v5, 0.0  ;;  %v1929_v24 = vmul.f32 %v1888_v49, %v5166_v41 }
 0x3c5   :  { %v2025_v46 = vadd.f32 %v2024_v36, %v2023_v3  ;;  %v1961_v58 = vadd.f32 %v1960_v42, %v1959_v52  ;;  %v1996_v29 = vmul.f32 %v5163_v2, %v1930_v15  ;;  %v1964_v34 = vsel %vm1565_vm10, %v1930_v15, 0.0 }
 0x3c6   :  { %v1962_v8 = vsel %vm1565_vm10, %v1929_v24, 0.0  ;;  %v1995_v27 = vmul.f32 %v1929_v24, %v5166_v41  ;;  %v5175_v23 = vpop.f32.mrb[16].mxu1 }
 0x3c7   :  { %v1963_v32 = vadd.f32 %v1962_v8, %v1961_v58  ;;  %v2027_v57 = vadd.f32 %v2026_v51, %v2025_v46  ;;  %v1932_v45 = vmul.f32 %v5175_v23, %v1903_v17  ;;  %v5178_v54 = vpop.f32.mrb[17].mxu1  ;;  %v2030_v53 = vsel %vm1565_vm10, %v1996_v29, 0.0 }
 0x3c8   :  { %v2028_v7 = vsel %vm1565_vm10, %v1995_v27, 0.0  ;;  %v1931_v12 = vmul.f32 %v1898_v26, %v5178_v54 }
 0x3c9   :  { %v2029_v21 = vadd.f32 %v2028_v7, %v2027_v57  ;;  %v1965_v38 = vadd.f32 %v1964_v34, %v1963_v32  ;;  %v1998_v19 = vmul.f32 %v5175_v23, %v1932_v45  ;;  %v1968_v61 = vsel %vm1565_vm10, %v1932_v45, 0.0 }
 0x3ca   :  { %v1966_v0 = vsel %vm1565_vm10, %v1931_v12, 0.0  ;;  %v1997_v20 = vmul.f32 %v1931_v12, %v5178_v54  ;;  %v5187_v4 = vpop.f32.mrb[18].mxu1 }
 0x3cb   :  { %v1967_v31 = vadd.f32 %v1966_v0, %v1965_v38  ;;  %v2031_v18 = vadd.f32 %v2030_v53, %v2029_v21  ;;  %v1934_v10 = vmul.f32 %v5187_v4, %v1913_v56  ;;  %v1806_v49 = vpop.f32.mrb[19].mxu1  ;;  %v2034_v33 = vsel %vm1565_vm10, %v1998_v19, 0.0  ;;  %v2047_v56 = vld [vmem:[%s5982_s9] sm:$0x1]  ;;  %s3513_s9 = smov 32  }
 0x3cc   :  { %v2032_v59 = vsel %vm1565_vm10, %v1997_v20, 0.0  ;;  %v1933_v37 = vmul.f32 %v1908_v40, %v1806_v49  ;;  %v2053_v0 = vld [vmem:[%s5983_s10] sm:$0x1]  ;;  %v6046_v40 = vld [vmem:[#allocation17_spill] sm:$0xff]  ;;  %s3514_s10 = smov 64  }
 0x3cd   :  { %v2033_v16 = vadd.f32 %v2032_v59, %v2031_v18  ;;  %v1969_v48 = vadd.f32 %v1968_v61, %v1967_v31  ;;  %v2000_v22 = vmul.f32 %v5187_v4, %v1934_v10  ;;  %v1972_v5 = vsel %vm1565_vm10, %v1934_v10, 0.0 }
 0x3ce   :  { %v1970_v43 = vsel %vm1565_vm10, %v1933_v37, 0.0  ;;  %v1999_v9 = vmul.f32 %v1933_v37, %v1806_v49 }
 0x3cf   :  { %v1971_v14 = vadd.f32 %v1970_v43, %v1969_v48  ;;  %v2035_v35 = vadd.f32 %v2034_v33, %v2033_v16  ;;  %v2038_v17 = vsel %vm1565_vm10, %v2000_v22, 0.0 }
 0x3d0   :  { %v2036_v52 = vsel %vm1565_vm10, %v1999_v9, 0.0 }
 0x3d1   :  { %v1973_v3 = vadd.f32 %v1972_v5, %v1971_v14  ;;  %v2037_v15 = vadd.f32 %v2036_v52, %v2035_v35 }
 0x3d3   :  { %v1974_v42 = vrot.slane %v1973_v3, 4  ;;  %v2039_v36 = vadd.f32 %v2038_v17, %v2037_v15 }
 0x3d5   :  { %v1975_v24 = vadd.f32 %v1974_v42, %v1973_v3  ;;  %v2040_v26 = vrot.slane %v2039_v36, 4 }
 0x3d7   :  { %v1976_v46 = vrot.slane %v1975_v24, 2  ;;  %v2041_v58 = vadd.f32 %v2040_v26, %v2039_v36 }
 0x3d9   :  { %v1977_v51 = vadd.f32 %v1976_v46, %v1975_v24  ;;  %v2042_v29 = vrot.slane %v2041_v58, 2 }
 0x3db   :  { %v1978_v8 = vrot.slane %v1977_v51, 1  ;;  %v2043_v27 = vadd.f32 %v2042_v29, %v2041_v58 }
 0x3dd   :  { %v1979_v32 = vadd.f32 %v1978_v8, %v1977_v51  ;;  %v2044_v57 = vrot.slane %v2043_v27, 1 }
 0x3df   :  { %v1980_v45 = vmul.f32 0.0125, %v1979_v32  ;;  %v2045_v34 = vadd.f32 %v2044_v57, %v2043_v27 }
 0x3e1   :  { %v2046_v7 = vmul.f32 0.0125, %v2045_v34  ;;  %v2048_v12 = vmul.f32 %v1980_v45, %v1980_v45 }
 0x3e3   :  { %v2049_v21 = vsub.f32 %v2046_v7, %v2048_v12 }
 0x3e5   :  { %v2050_v38 = vadd.f32 1e-05, %v2049_v21 }
 0x3e7   :  { %3506 = vrsqrt.f32 %v2050_v38 }
 0x3f1   :  { %v3507_v53 = vpop.eup %3506 }
 0x3f2   :  { %v2052_v19 = vmul.f32 %v3507_v53, %v2047_v56 }
 0x3f4   :  { %v2054_v20 = vmul.f32 %v2052_v19, %v1980_v45  ;;  %v5205_v31 = vrot.slane %v2052_v19, %v6046_v40 }
 0x3f6   :  { %v2055_v18 = vsub.f32 %v2053_v0, %v2054_v20  ;;  %v2080_v10 = vmul.f32 %v5205_v31, %v1806_v49  ;;  %v2064_v61 = vmul.f32 %v5205_v31, %v5096_v63  ;;  %v2065_v59 = vmul.f32 %v5092_v30, %v5205_v31 }
 0x3f7   :  { %v2063_v37 = vmul.f32 %v5082_v50, %v5205_v31  ;;  %v2066_v16 = vmul.f32 %v5205_v31, %v5106_v60  ;;  %v2067_v48 = vmul.f32 %v5103_v55, %v5205_v31  ;;  %v2068_v33 = vmul.f32 %v5205_v31, %v5118_v1 }
 0x3f8   :  { %v5221_v49 = vrot.slane %v2055_v18, %v6046_v40  ;;  %v2069_v63 = vmul.f32 %v5115_v47, %v5205_v31  ;;  %v2070_v30 = vmul.f32 %v5205_v31, %v5130_v25  ;;  %v2071_v50 = vmul.f32 %v5127_v44, %v5205_v31 }
 0x3f9   :  { %v2072_v60 = vmul.f32 %v5205_v31, %v5142_v13  ;;  %v2073_v55 = vmul.f32 %v5139_v11, %v5205_v31  ;;  %v2074_v1 = vmul.f32 %v5205_v31, %v5154_v62  ;;  %v2075_v22 = vmul.f32 %v5151_v39, %v5205_v31 }
 0x3fa   :  { %v5238_v47 = vadd.f32 %v5221_v49, %v2080_v10  ;;  %v2090_v25 = vadd.f32 %v5221_v49, %v2064_v61  ;;  %v2091_v43 = vadd.f32 %v5221_v49, %v2065_v59  ;;  %v2089_v44 = vadd.f32 %v5221_v49, %v2063_v37 }
 0x3fb   :  { %v2092_v13 = vadd.f32 %v5221_v49, %v2066_v16  ;;  %v2093_v9 = vadd.f32 %v5221_v49, %v2067_v48  ;;  %v2094_v11 = vadd.f32 %v5221_v49, %v2068_v33  ;;  %v5247_v62 = vadd.f32 %v5221_v49, %v2069_v63 }
 0x3fc   :  { %v2110_v14 = vmax.f32 %v2090_v25, 0.0  ;;  %v2111_v39 = vmax.f32 %v2091_v43, 0.0  ;;  %v2109_v35 = vmax.f32 %v2089_v44, 0.0  ;;  %v2126_v17 = vmax.f32 %v5238_v47, 0.0 }
 0x3fd   :  { %v2112_v5 = vmax.f32 %v2092_v13, 0.0  ;;  %v2113_v52 = vmax.f32 %v2093_v9, 0.0  ;;  %v2114_v3 = vmax.f32 %v2094_v11, 0.0  ;;  %v2115_v15 = vmax.f32 %v5247_v62, 0.0 }
 0x3fe   :  { %v2130_v42 = vrot.slane %v2110_v14, 2  ;;  %v2131_v36 = vrot.slane %v2111_v39, 2  ;;  %v5251_v24 = vrot.slane %v2109_v35, 2  ;;  %v2096_v27 = vadd.f32 %v5221_v49, %v2070_v30 }
 0x3ff   :  { %v2132_v26 = vrot.slane %v2112_v5, 2  ;;  %v2133_v46 = vrot.slane %v2113_v52, 2  ;;  %v2134_v58 = vrot.slane %v2114_v3, 2  ;;  %v2135_v51 = vrot.slane %v2115_v15, 2 }
 0x400   :  { %v2164_v29 = vsel %vm1244_vm8, %v2130_v42, %v2131_v36  ;;  %v2165_v8 = vsel %vm1244_vm8, %v5251_v24, %v2130_v42  ;;  %v5262_v32 = vadd.f32 %v5221_v49, %v2071_v50  ;;  %v2116_v56 = vmax.f32 %v2096_v27, 0.0 }
 0x401   :  { %v5264_v57 = vmax.f32 %v2110_v14, %v2164_v29  ;;  %v5266_v45 = vmax.f32 %v2109_v35, %v2165_v8  ;;  %v2162_v34 = vsel %vm1244_vm8, %v2132_v26, %v2133_v46  ;;  %v2160_v7 = vsel %vm1244_vm8, %v2134_v58, %v2135_v51 }
 0x402   :  { %v5272_v12 = vmax.f32 %v2112_v5, %v2162_v34  ;;  %v5274_v21 = vmax.f32 %v2114_v3, %v2160_v7  ;;  %v2163_v38 = vsel %vm1244_vm8, %v2131_v36, %v2132_v26  ;;  %v2117_v19 = vmax.f32 %v5262_v32, 0.0 }
 0x403   :  { %2331 = vrot.lane.b32.xlu1 %v5264_v57, %s3513_s9  ;;  %2329 = vrot.lane.b32.xlu0 %v5266_v45, %s3513_s9  ;;  %v5282_v53 = vmax.f32 %v2111_v39, %v2163_v38  ;;  %v2098_v0 = vadd.f32 %v5221_v49, %v2072_v60  ;;  %v5287_v20 = vadd.f32 %v5221_v49, %v2073_v55  ;;  %v2136_v40 = vrot.slane %v2116_v56, 2 }
 0x404   :  { %v2100_v18 = vadd.f32 %v5221_v49, %v2074_v1  ;;  %v5291_v10 = vadd.f32 %v5221_v49, %v2075_v22  ;;  %v2161_v61 = vsel %vm1244_vm8, %v2133_v46, %v2134_v58  ;;  %v2137_v59 = vrot.slane %v2117_v19, 2 }
 0x405   :  { %v2118_v37 = vmax.f32 %v2098_v0, 0.0  ;;  %v2119_v16 = vmax.f32 %v5287_v20, 0.0  ;;  %v5296_v48 = vmax.f32 %v2113_v52, %v2161_v61  ;;  %v2076_v30 = vmul.f32 %v5205_v31, %v5166_v41 }
 0x406   :  { %v2120_v33 = vmax.f32 %v2100_v18, 0.0  ;;  %v2121_v63 = vmax.f32 %v5291_v10, 0.0  ;;  %v2077_v50 = vmul.f32 %v5163_v2, %v5205_v31  ;;  %v2158_v60 = vsel %vm1244_vm8, %v2136_v40, %v2137_v59 }
 0x407   :  { %2335 = vrot.lane.b32.xlu1 %v5272_v12, %s3513_s9  ;;  %2449 = vrot.lane.b32.xlu0 %v5264_v57, %s3514_s10  ;;  %v2138_v55 = vrot.slane %v2118_v37, 2  ;;  %v2139_v1 = vrot.slane %v2119_v16, 2  ;;  %v2078_v22 = vmul.f32 %v5205_v31, %v5178_v54  ;;  %v5311_v25 = vmax.f32 %v2116_v56, %v2158_v60 }
 0x408   :  { %v2140_v41 = vrot.slane %v2120_v33, 2  ;;  %v2141_v43 = vrot.slane %v2121_v63, 2  ;;  %v2102_v2 = vadd.f32 %v5221_v49, %v2076_v30  ;;  %v2103_v13 = vadd.f32 %v5221_v49, %v2077_v50 }
 0x409   :  { %v2156_v44 = vsel %vm1244_vm8, %v2138_v55, %v2139_v1  ;;  %v2079_v9 = vmul.f32 %v5175_v23, %v5205_v31  ;;  %v2104_v11 = vadd.f32 %v5221_v49, %v2078_v22  ;;  %v2081_v35 = vmul.f32 %v5187_v4, %v5205_v31 }
 0x40a   :  { %v5320_v14 = vmax.f32 %v2118_v37, %v2156_v44  ;;  %v2154_v54 = vsel %vm1244_vm8, %v2140_v41, %v2141_v43  ;;  %v2122_v39 = vmax.f32 %v2102_v2, 0.0  ;;  %v2123_v23 = vmax.f32 %v2103_v13, 0.0 }
 0x40b   :  { %2339 = vrot.lane.b32.xlu1 %v5274_v21, %s3513_s9  ;;  %2451 = vrot.lane.b32.xlu0 %v5282_v53, %s3514_s10  ;;  %v5330_v5 = vmax.f32 %v2120_v33, %v2154_v54  ;;  %v2105_v52 = vadd.f32 %v5221_v49, %v2079_v9  ;;  %v2124_v3 = vmax.f32 %v2104_v11, 0.0  ;;  %v2107_v36 = vadd.f32 %v5221_v49, %v2081_v35  ;;  %v2592_v35 = vld [vmem:[%s5984_s11] sm:$0xff] }
 0x40c   :  { %v2142_v42 = vrot.slane %v2122_v39, 2  ;;  %v2159_v26 = vsel %vm1244_vm8, %v2135_v51, %v2136_v40  ;;  %v2062_v4 = vmul.f32 %v5205_v31, %v5085_v28  ;;  %v2143_v46 = vrot.slane %v2123_v23, 2 }
 0x40d   :  { %v2125_v58 = vmax.f32 %v2105_v52, 0.0  ;;  %v2144_v29 = vrot.slane %v2124_v3, 2  ;;  %v5340_v8 = vmax.f32 %v2115_v15, %v2159_v26  ;;  %v2146_v27 = vrot.slane %v2126_v17, 2  ;;  %v2594_v26 = vld [vmem:[%s5984_s11 + $0x10] sm:$0xff] }
 0x40e   :  { %v2127_v32 = vmax.f32 %v2107_v36, 0.0  ;;  %v2088_v34 = vadd.f32 %v5221_v49, %v2062_v4  ;;  %v2152_v28 = vsel %vm1244_vm8, %v2142_v42, %v2143_v46  ;;  %v2157_v62 = vsel %vm1244_vm8, %v2137_v59, %v2138_v55  ;;  %v2595_v4 = vld [vmem:[%s5984_s11 + $0x18] sm:$0xff] }
 0x40f   :  { %2343 = vrot.lane.b32.xlu1 %v5311_v25, %s3513_s9  ;;  %2333 = vrot.lane.b32.xlu0 %v5282_v53, %s3513_s9  ;;  %v2145_v31 = vrot.slane %v2125_v58, 2  ;;  %v5353_v15 = vmax.f32 %v2122_v39, %v2152_v28  ;;  %v5357_v38 = vmax.f32 %v2117_v19, %v2157_v62  ;;  %v2155_v40 = vsel %vm1244_vm8, %v2139_v1, %v2140_v41 }
 0x410   :  { %v2147_v51 = vrot.slane %v2127_v32, 2  ;;  %v2108_v7 = vmax.f32 %v2088_v34, 0.0  ;;  %v5373_v19 = vmax.f32 %v2119_v16, %v2155_v40  ;;  %v2153_v61 = vsel %vm1244_vm8, %v2141_v43, %v2142_v42 }
 0x411   :  { %v2150_v49 = vsel %vm1244_vm8, %v2144_v29, %v2145_v31  ;;  %v5382_v37 = vmax.f32 %v2121_v63, %v2153_v61  ;;  %v2151_v33 = vsel %vm1244_vm8, %v2143_v46, %v2144_v29  ;;  %v2190_v55 = vrot.slane %v5264_v57, 4  ;;  %v2601_v61 = vld [vmem:[%s5984_s11 + $0x48] sm:$0xff] }
 0x412   :  { %v5359_v56 = vmax.f32 %v2124_v3, %v2150_v49  ;;  %v2148_v0 = vsel %vm1244_vm8, %v2146_v27, %v2147_v51  ;;  %v2128_v20 = vrot.slane %v2108_v7, 2  ;;  %v5390_v47 = vmax.f32 %v2123_v23, %v2151_v33  ;;  %v2593_v23 = vld [vmem:[%s5984_s11 + $0x8] sm:$0xff] }
 0x413   :  { %2347 = vrot.lane.b32.xlu1 %v5320_v14, %s3513_s9  ;;  %2453 = vrot.lane.b32.xlu0 %v5272_v12, %s3514_s10  ;;  %v5371_v18 = vmax.f32 %v2126_v17, %v2148_v0  ;;  %v2149_v17 = vsel %vm1244_vm8, %v2145_v31, %v2146_v27  ;;  %v2191_v22 = vrot.slane %v5282_v53, 4  ;;  %v2192_v43 = vrot.slane %v5272_v12, 4  ;;  %v2596_v27 = vld [vmem:[%s5984_s11 + $0x20] sm:$0xff] }
 0x414   :  { %v2166_v10 = vsel %vm1244_vm8, %v2128_v20, %v5251_v24  ;;  %v2189_v24 = vrot.slane %v5266_v45, 4  ;;  %v5395_v16 = vmax.f32 %v2125_v58, %v2149_v17  ;;  %v2167_v63 = vsel %vm1244_vm8, %v2147_v51, %v2128_v20  ;;  %v2598_v51 = vld [vmem:[%s5984_s11 + $0x30] sm:$0xff] }
 0x415   :  { %6047 = vst [vmem:[#allocation3_spill] sm:$0xff] %v5371_v18  ;;  %v5380_v59 = vmax.f32 %v2108_v7, %v2166_v10  ;;  %v5400_v30 = vmax.f32 %v2127_v32, %v2167_v63  ;;  %v2225_v41 = vsel %vm2208_vm12, %v2190_v55, %v2191_v22  ;;  %v5446_v2 = vsel %vm2208_vm12, %v2191_v22, %v2192_v43  ;;  %v2597_v32 = vld [vmem:[%s5984_s11 + $0x28] sm:$0xff]  ;;  %v2599_v7 = vld [vmem:[%s5984_s11 + $0x38] sm:$0xff]  ;;  %v2600_v10 = vld [vmem:[%s5984_s11 + $0x40] sm:$0xff] }
 0x416   :  { %v5428_v1 = vsel %vm2208_vm12, %v2189_v24, %v2190_v55  ;;  %v2193_v44 = vrot.slane %v5296_v48, 4  ;;  %v2194_v9 = vrot.slane %v5274_v21, 4  ;;  %v2195_v54 = vrot.slane %v5340_v8, 4 }
 0x417   :  { %2351 = vrot.lane.b32.xlu1 %v5330_v5, %s3513_s9  ;;  %2455 = vrot.lane.b32.xlu0 %v5296_v48, %s3514_s10  ;;  %6048 = vst [vmem:[#allocation4_spill] sm:$0xff] %v5400_v30  ;;  %v2188_v50 = vrot.slane %v5380_v59, 4  ;;  %v3466_v52 = vpack.c.bf16 %v2593_v23, %v2592_v35  ;;  %v2196_v3 = vrot.slane %v5311_v25, 4  ;;  %v2197_v36 = vrot.slane %v5357_v38, 4 }
 0x418   :  { %v2223_v13 = vsel %vm2208_vm12, %v2192_v43, %v2193_v44  ;;  %v5464_v11 = vsel %vm2208_vm12, %v2193_v44, %v2194_v9  ;;  %v2221_v39 = vsel %vm2208_vm12, %v2194_v9, %v2195_v54  ;;  %v3470_v46 = vpack.c.bf16 %v2595_v4, %v2594_v26 }
 0x419   :  { %v5411_v60 = vsel %vm2208_vm12, %v2188_v50, %v2189_v24  ;;  %3467 = vmatprep.subr.bf16.mxu0 %v3466_v52  ;;  %v5488_v42 = vsel %vm2208_vm12, %v2195_v54, %v2196_v3  ;;  %v2219_v58 = vsel %vm2208_vm12, %v2196_v3, %v2197_v36  ;;  %v2198_v29 = vrot.slane %v5320_v14, 4 }
 0x41a   :  { %3469 = vmatpush3.bf16.msra.mxu0 %v3466_v52  ;;  %v3474_v34 = vpack.c.bf16 %v2597_v32, %v2596_v27  ;;  %v2199_v31 = vrot.slane %v5373_v19, 4  ;;  %v3478_v49 = vpack.c.bf16 %v2599_v7, %v2598_v51  ;;  %v2200_v0 = vrot.slane %v5330_v5, 4  ;;  %v2856_v51 = vld [vmem:[%s5985_s13 + $0x8] sm:$0xff]  ;;  %v2857_v7 = vld [vmem:[%s5985_s13 + $0x10] sm:$0xff] }
 0x41b   :  { %2355 = vrot.lane.b32.xlu1 %v5353_v15, %s3513_s9  ;;  %2337 = vrot.lane.b32.xlu0 %v5296_v48, %s3513_s9  ;;  %v2218_v28 = vsel %vm2208_vm12, %v2197_v36, %v2198_v29  ;;  %v2201_v40 = vrot.slane %v5382_v37, 4  ;;  %v3482_v33 = vpack.c.bf16 %v2601_v61, %v2600_v10  ;;  %v2202_v24 = vrot.slane %v5353_v15, 4 }
 0x41c   :  { %3471 = vmatprep.subr.bf16.mxu0 %v3470_v46  ;;  %v2217_v62 = vsel %vm2208_vm12, %v2198_v29, %v2199_v31  ;;  %v2216_v20 = vsel %vm2208_vm12, %v2199_v31, %v2200_v0  ;;  %v2203_v55 = vrot.slane %v5390_v47, 4  ;;  %v2204_v9 = vrot.slane %v5359_v56, 4 }
 0x41d   :  { %v2215_v17 = vsel %vm2208_vm12, %v2200_v0, %v2201_v40  ;;  %v2214_v63 = vsel %vm2208_vm12, %v2201_v40, %v2202_v24  ;;  %v2206_v26 = vrot.slane %v5371_v18, 4 }
 0x41e   :  { %3473 = vmatpush3.bf16.msra.mxu0 %v3470_v46  ;;  %v2213_v43 = vsel %vm2208_vm12, %v2202_v24, %v2203_v55  ;;  %v2212_v35 = vsel %vm2208_vm12, %v2203_v55, %v2204_v9 }
 0x41f   :  { %2359 = vrot.lane.b32.xlu1 %v5359_v56, %s3513_s9  ;;  %2457 = vrot.lane.b32.xlu0 %v5274_v21, %s3514_s10 }
 0x420   :  { %3475 = vmatprep.subr.bf16.mxu0 %v3474_v34 }
 0x422   :  { %3477 = vmatpush3.bf16.msra.mxu0 %v3474_v34 }
 0x423   :  { %2363 = vrot.lane.b32.xlu1 %v5371_v18, %s3513_s9  ;;  %2459 = vrot.lane.b32.xlu0 %v5340_v8, %s3514_s10 }
 0x424   :  { %3479 = vmatprep.subr.bf16.mxu0 %v3478_v49 }
 0x426   :  { %3481 = vmatpush3.bf16.msra.mxu0 %v3478_v49 }
 0x427   :  { %2341 = vrot.lane.b32.xlu0 %v5340_v8, %s3513_s9  ;;  %2367 = vrot.lane.b32.xlu1 %v5380_v59, %s3513_s9 }
 0x428   :  { %3483 = vmatprep.subr.bf16.mxu0 %v3482_v33 }
 0x42a   :  { %3485 = vmatpush3.bf16.msra.mxu0 %v3482_v33 }
 0x42b   :  { %2461 = vrot.lane.b32.xlu0 %v5311_v25, %s3514_s10  ;;  %2251 = vrot.lane.b32.xlu1 %v5428_v1, %s3512_s6 }
 0x42f   :  { %2463 = vrot.lane.b32.xlu0 %v5357_v38, %s3514_s10  ;;  %2391 = vrot.lane.b32.xlu1 %v2225_v41, %s3515_s28 }
 0x433   :  { %2345 = vrot.lane.b32.xlu0 %v5357_v38, %s3513_s9  ;;  %2253 = vrot.lane.b32.xlu1 %v2225_v41, %s3512_s6 }
 0x437   :  { %2465 = vrot.lane.b32.xlu0 %v5320_v14, %s3514_s10  ;;  %2255 = vrot.lane.b32.xlu1 %v5446_v2, %s3512_s6 }
 0x43b   :  { %2467 = vrot.lane.b32.xlu0 %v5373_v19, %s3514_s10  ;;  %2395 = vrot.lane.b32.xlu1 %v2223_v13, %s3515_s28 }
 0x43f   :  { %2349 = vrot.lane.b32.xlu0 %v5373_v19, %s3513_s9  ;;  %2257 = vrot.lane.b32.xlu1 %v2223_v13, %s3512_s6 }
 0x443   :  { %2469 = vrot.lane.b32.xlu0 %v5330_v5, %s3514_s10  ;;  %2259 = vrot.lane.b32.xlu1 %v5464_v11, %s3512_s6 }
 0x447   :  { %2471 = vrot.lane.b32.xlu0 %v5382_v37, %s3514_s10  ;;  %2399 = vrot.lane.b32.xlu1 %v2221_v39, %s3515_s28 }
 0x44b   :  { %2353 = vrot.lane.b32.xlu0 %v5382_v37, %s3513_s9  ;;  %2261 = vrot.lane.b32.xlu1 %v2221_v39, %s3512_s6 }
 0x44f   :  { %2473 = vrot.lane.b32.xlu0 %v5353_v15, %s3514_s10  ;;  %2263 = vrot.lane.b32.xlu1 %v5488_v42, %s3512_s6 }
 0x453   :  { %2475 = vrot.lane.b32.xlu0 %v5390_v47, %s3514_s10  ;;  %2403 = vrot.lane.b32.xlu1 %v2219_v58, %s3515_s28 }
 0x457   :  { %2357 = vrot.lane.b32.xlu0 %v5390_v47, %s3513_s9  ;;  %2265 = vrot.lane.b32.xlu1 %v2219_v58, %s3512_s6  ;;  %v2207_v58 = vrot.slane %v5400_v30, 4 }
 0x459   :  { %v2209_v27 = vsel %vm2208_vm12, %v2206_v26, %v2207_v58  ;;  %v2228_v49 = vsel %vm2208_vm12, %v2207_v58, %v2188_v50 }
 0x45b   :  { %2477 = vrot.lane.b32.xlu0 %v5359_v56, %s3514_s10  ;;  %2267 = vrot.lane.b32.xlu1 %v2218_v28, %s3512_s6 }
 0x45f   :  { %2479 = vrot.lane.b32.xlu0 %v5395_v16, %s3514_s10  ;;  %2407 = vrot.lane.b32.xlu1 %v2217_v62, %s3515_s28 }
 0x463   :  { %2361 = vrot.lane.b32.xlu0 %v5395_v16, %s3513_s9  ;;  %2269 = vrot.lane.b32.xlu1 %v2217_v62, %s3512_s6  ;;  %v2855_v62 = vld [vmem:[%s5985_s13] sm:$0xff] }
 0x464   :  { %v3486_v0 = vpack.c.bf16 %v2856_v51, %v2855_v62 }
 0x466   :  { %3487 = vmatprep.subr.bf16.mxu1 %v3486_v0 }
 0x467   :  { %2481 = vrot.lane.b32.xlu0 %v5371_v18, %s3514_s10  ;;  %2271 = vrot.lane.b32.xlu1 %v2216_v20, %s3512_s6 }
 0x468   :  { %3489 = vmatpush3.bf16.msra.mxu1 %v3486_v0 }
 0x46b   :  { %2483 = vrot.lane.b32.xlu0 %v5400_v30, %s3514_s10  ;;  %2411 = vrot.lane.b32.xlu1 %v2215_v17, %s3515_s28 }
 0x46f   :  { %2365 = vrot.lane.b32.xlu0 %v5400_v30, %s3513_s9  ;;  %2273 = vrot.lane.b32.xlu1 %v2215_v17, %s3512_s6 }
 0x473   :  { %2275 = vrot.lane.b32.xlu1 %v2214_v63, %s3512_s6  ;;  %2249 = vrot.lane.b32.xlu0 %v5411_v60, %s3512_s6 }
 0x475   :  { %v5564_v22 = vpop.permute.xlu1 %2331  ;;  %v5566_v41 = vpop.permute.xlu0 %2329 }
 0x477   :  { %2415 = vrot.lane.b32.xlu1 %v2213_v43, %s3515_s28  ;;  %2389 = vrot.lane.b32.xlu0 %v5428_v1, %s3515_s28  ;;  %v2205_v1 = vrot.slane %v5395_v16, 4 }
 0x479   :  { %v5573_v44 = vpop.permute.xlu1 %2335  ;;  %v5575_v13 = vpop.permute.xlu0 %2449  ;;  %v2210_v46 = vsel %vm2208_vm12, %v2205_v1, %v2206_v26 }
 0x47b   :  { %2277 = vrot.lane.b32.xlu1 %v2213_v43, %s3512_s6  ;;  %2393 = vrot.lane.b32.xlu0 %v5446_v2, %s3515_s28  ;;  %v2211_v2 = vsel %vm2208_vm12, %v2204_v9, %v2205_v1 }
 0x47d   :  { %v5581_v54 = vpop.permute.xlu1 %2339  ;;  %v5583_v39 = vpop.permute.xlu0 %2451 }
 0x47f   :  { %2279 = vrot.lane.b32.xlu1 %v2212_v35, %s3512_s6  ;;  %2397 = vrot.lane.b32.xlu0 %v5464_v11, %s3515_s28 }
 0x481   :  { %v5591_v23 = vpop.permute.xlu1 %2343  ;;  %v2334_v52 = vpop.permute.xlu0 %2333 }
 0x483   :  { %2419 = vrot.lane.b32.xlu1 %v2211_v2, %s3515_s28  ;;  %2401 = vrot.lane.b32.xlu0 %v5488_v42, %s3515_s28 }
 0x485   :  { %v5598_v3 = vpop.permute.xlu1 %2347  ;;  %v5600_v36 = vpop.permute.xlu0 %2453 }
 0x487   :  { %2281 = vrot.lane.b32.xlu1 %v2211_v2, %s3512_s6  ;;  %2405 = vrot.lane.b32.xlu0 %v2218_v28, %s3515_s28 }
 0x489   :  { %v5605_v11 = vpop.permute.xlu1 %2351  ;;  %v2456_v4 = vpop.permute.xlu0 %2455 }
 0x48b   :  { %2283 = vrot.lane.b32.xlu1 %v2210_v46, %s3512_s6  ;;  %2409 = vrot.lane.b32.xlu0 %v2216_v20, %s3515_s28  ;;  %v2858_v20 = vld [vmem:[%s5985_s13 + $0x18] sm:$0xff] }
 0x48c   :  { %v3490_v40 = vpack.c.bf16 %v2858_v20, %v2857_v7 }
 0x48d   :  { %v5612_v42 = vpop.permute.xlu1 %2355  ;;  %v5614_v29 = vpop.permute.xlu0 %2337 }
 0x48e   :  { %3491 = vmatprep.subr.bf16.mxu1 %v3490_v40 }
 0x48f   :  { %2423 = vrot.lane.b32.xlu1 %v2209_v27, %s3515_s28  ;;  %2413 = vrot.lane.b32.xlu0 %v2214_v63, %s3515_s28 }
 0x490   :  { %3493 = vmatpush3.bf16.msra.mxu1 %v3490_v40 }
 0x491   :  { %v5620_v32 = vpop.permute.xlu1 %2359  ;;  %v5622_v34 = vpop.permute.xlu0 %2457 }
 0x493   :  { %2285 = vrot.lane.b32.xlu1 %v2209_v27, %s3512_s6  ;;  %2417 = vrot.lane.b32.xlu0 %v2212_v35, %s3515_s28 }
 0x495   :  { %v5626_v28 = vpop.permute.xlu1 %2363  ;;  %v2460_v31 = vpop.permute.xlu0 %2459 }
 0x497   :  { %2287 = vrot.lane.b32.xlu1 %v2228_v49, %s3512_s6  ;;  %2421 = vrot.lane.b32.xlu0 %v2210_v46, %s3515_s28 }
 0x499   :  { %v5646_v10 = vpop.permute.xlu0 %2341  ;;  %v5648_v61 = vpop.permute.xlu1 %2367 }
 0x49a   :  { %6049 = vst [vmem:[#allocation5_spill] sm:$0xff] %v5648_v61 }
 0x49b   :  { %2427 = vrot.lane.b32.xlu1 %v5411_v60, %s3515_s28  ;;  %2425 = vrot.lane.b32.xlu0 %v2228_v49, %s3515_s28 }
 0x49d   :  { %v5653_v6 = vpop.permute.xlu0 %2461  ;;  %v2252_v50 = vpop.permute.xlu1 %2251 }
 0x49e   :  { %v2510_v33 = vsel %vm1565_vm10, %v5266_v45, %v2252_v50 }
 0x49f   :  { %2487 = vrot.lane.b32.xlu1 %v5266_v45, %s3514_s10  ;;  %2485 = vrot.lane.b32.xlu0 %v5380_v59, %s3514_s10  ;;  %v2531_v17 = vsel %vm2529_vm13, %v2510_v33, %v5564_v22 }
 0x4a1   :  { %v2464_v60 = vpop.permute.xlu0 %2463  ;;  %v2392_v24 = vpop.permute.xlu1 %2391 }
 0x4a2   :  { %v2552_v63 = vsel %vm2550_vm14, %v2531_v17, %v2392_v24 }
 0x4a3   :  { %v2573_v55 = vsel %vm2571_vm15, %v2552_v63, %v5583_v39 }
 0x4a5   :  { %v5666_v43 = vpop.permute.xlu0 %2345  ;;  %v2254_v9 = vpop.permute.xlu1 %2253 }
 0x4a6   :  { %v2511_v45 = vsel %vm1565_vm10, %v5264_v57, %v2254_v9 }
 0x4a7   :  { %v2532_v35 = vsel %vm2529_vm13, %v2511_v45, %v2334_v52 }
 0x4a9   :  { %v5671_v1 = vpop.permute.xlu0 %2465  ;;  %v2256_v22 = vpop.permute.xlu1 %2255 }
 0x4aa   :  { %v2512_v2 = vsel %vm1565_vm10, %v5282_v53, %v2256_v22 }
 0x4ab   :  { %v2533_v26 = vsel %vm2529_vm13, %v2512_v2, %v5573_v44 }
 0x4ad   :  { %v5677_v46 = vpop.permute.xlu0 %2467  ;;  %v2396_v39 = vpop.permute.xlu1 %2395 }
 0x4ae   :  { %v2554_v58 = vsel %vm2550_vm14, %v2533_v26, %v2396_v39 }
 0x4af   :  { %v2575_v27 = vsel %vm2571_vm15, %v2554_v58, %v2456_v4 }
 0x4b1   :  { %v5681_v62 = vpop.permute.xlu0 %2349  ;;  %v2258_v57 = vpop.permute.xlu1 %2257 }
 0x4b5   :  { %v5683_v52 = vpop.permute.xlu0 %2469  ;;  %v2260_v51 = vpop.permute.xlu1 %2259 }
 0x4b6   :  { %v2514_v7 = vsel %vm1565_vm10, %v5296_v48, %v2260_v51 }
 0x4b7   :  { %v2535_v44 = vsel %vm2529_vm13, %v2514_v7, %v5581_v54 }
 0x4b9   :  { %v5687_v53 = vpop.permute.xlu0 %2471  ;;  %v2400_v49 = vpop.permute.xlu1 %2399 }
 0x4ba   :  { %v2556_v0 = vsel %vm2550_vm14, %v2535_v44, %v2400_v49 }
 0x4bb   :  { %v2577_v20 = vsel %vm2571_vm15, %v2556_v0, %v2460_v31 }
 0x4bd   :  { %v5693_v4 = vpop.permute.xlu0 %2353  ;;  %v2262_v40 = vpop.permute.xlu1 %2261 }
 0x4c1   :  { %v5695_v50 = vpop.permute.xlu0 %2473  ;;  %v2264_v33 = vpop.permute.xlu1 %2263 }
 0x4c2   :  { %v2516_v17 = vsel %vm1565_vm10, %v5340_v8, %v2264_v33 }
 0x4c3   :  { %v2537_v24 = vsel %vm2529_vm13, %v2516_v17, %v5591_v23 }
 0x4c5   :  { %v5699_v48 = vpop.permute.xlu0 %2475  ;;  %v2404_v54 = vpop.permute.xlu1 %2403 }
 0x4c6   :  { %v2558_v63 = vsel %vm2550_vm14, %v2537_v24, %v2404_v54 }
 0x4c7   :  { %v2579_v9 = vsel %vm2571_vm15, %v2558_v63, %v2464_v60 }
 0x4c9   :  { %v5705_v31 = vpop.permute.xlu0 %2357  ;;  %v2266_v45 = vpop.permute.xlu1 %2265 }
 0x4cd   :  { %v5707_v22 = vpop.permute.xlu0 %2477  ;;  %v2268_v2 = vpop.permute.xlu1 %2267 }
 0x4d1   :  { %v5709_v26 = vpop.permute.xlu0 %2479  ;;  %v2408_v39 = vpop.permute.xlu1 %2407 }
 0x4d5   :  { %v5711_v8 = vpop.permute.xlu0 %2361  ;;  %v2270_v58 = vpop.permute.xlu1 %2269 }
 0x4d9   :  { %v5713_v51 = vpop.permute.xlu0 %2481  ;;  %v2272_v23 = vpop.permute.xlu1 %2271 }
 0x4dd   :  { %v5715_v7 = vpop.permute.xlu0 %2483  ;;  %v2412_v44 = vpop.permute.xlu1 %2411 }
 0x4e1   :  { %v5717_v49 = vpop.permute.xlu0 %2365  ;;  %v2274_v60 = vpop.permute.xlu1 %2273 }
 0x4e2   :  { %6050 = vst [vmem:[#allocation6_spill] sm:$0xff] %v5717_v49 }
 0x4e5   :  { %v2276_v0 = vpop.permute.xlu1 %2275  ;;  %v2250_v33 = vpop.permute.xlu0 %2249 }
 0x4e6   :  { %v2509_v17 = vsel %vm1565_vm10, %v5380_v59, %v2250_v33  ;;  %v2513_v59 = vsel %vm1565_vm10, %v5272_v12, %v2258_v57 }
 0x4e7   :  { %v2530_v54 = vsel %vm2529_vm13, %v2509_v17, %v5566_v41 }
 0x4e9   :  { %v2416_v24 = vpop.permute.xlu1 %2415  ;;  %v2390_v63 = vpop.permute.xlu0 %2389 }
 0x4ea   :  { %v2551_v61 = vsel %vm2550_vm14, %v2530_v54, %v2390_v63 }
 0x4eb   :  { %v2572_v30 = vsel %vm2571_vm15, %v2551_v61, %v5575_v13  ;;  %v2515_v61 = vsel %vm1565_vm10, %v5274_v21, %v2262_v40  ;;  %v2517_v21 = vsel %vm1565_vm10, %v5311_v25, %v2266_v45 }
 0x4ec   :  { %3388 = vmatprep.mubr.msk.f32.mxu0 %vm2609_vm0, %v2572_v30  ;;  %v2534_v30 = vsel %vm2529_vm13, %v2513_v59, %v5614_v29  ;;  %v2536_v29 = vsel %vm2529_vm13, %v2515_v61, %v5646_v10  ;;  %v2538_v25 = vsel %vm2529_vm13, %v2517_v21, %v5666_v43  ;;  %v2522_v43 = vsel %vm1565_vm10, %v5382_v37, %v2276_v0 }
 0x4ed   :  { %v2278_v49 = vpop.permute.xlu1 %2277  ;;  %3389 = vmatmul.mubr.msk.f32.vlgmr.msra.gmra.mrb[20].mxu0 %vm2609_vm0, %v2573_v55  ;;  %v2394_v18 = vpop.permute.xlu0 %2393 }
 0x4ee   :  { %v2553_v33 = vsel %vm2550_vm14, %v2532_v35, %v2394_v18  ;;  %v2518_v18 = vsel %vm1565_vm10, %v5357_v38, %v2268_v2 }
 0x4ef   :  { %v2574_v41 = vsel %vm2571_vm15, %v2553_v33, %v5600_v36  ;;  %v2539_v57 = vsel %vm2529_vm13, %v2518_v18, %v5598_v3 }
 0x4f0   :  { %3391 = vmatprep.mubr.msk.f32.mxu0 %vm2609_vm0, %v2574_v41  ;;  %v2560_v38 = vsel %vm2550_vm14, %v2539_v57, %v2408_v39  ;;  %v20_v57 = vstv %s5986_s14 }
 0x4f1   :  { %v2280_v17 = vpop.permute.xlu1 %2279  ;;  %3392 = vmatmul.mubr.msk.f32.gmra.mrb[22].mxu0 %vm2609_vm0, %v2575_v27  ;;  %v2398_v13 = vpop.permute.xlu0 %2397  ;;  %21 = vst [vmem:[#allocation2] sm:$0x1] %v20_v57 }
 0x4f2   :  { %v2555_v55 = vsel %vm2550_vm14, %v2534_v30, %v2398_v13  ;;  %v6052_v13 = vld [vmem:[#allocation4_spill] sm:$0xff] }
 0x4f3   :  { %v2576_v12 = vsel %vm2571_vm15, %v2555_v55, %v5622_v34 }
 0x4f4   :  { %3394 = vmatprep.mubr.msk.f32.mxu0 %vm2609_vm0, %v2576_v12  ;;  %v6053_v12 = vld [vmem:[#allocation5_spill] sm:$0xff] }
 0x4f5   :  { %v2420_v36 = vpop.permute.xlu1 %2419  ;;  %3395 = vmatmul.mubr.msk.f32.gmra.mrb[24].mxu0 %vm2609_vm0, %v2577_v20  ;;  %v2402_v35 = vpop.permute.xlu0 %2401  ;;  %v2520_v20 = vsel %vm1565_vm10, %v5373_v19, %v2272_v23  ;;  %v2581_v19 = vsel %vm2571_vm15, %v2560_v38, %v5677_v46  ;;  %v2543_v23 = vsel %vm2529_vm13, %v2522_v43, %v5612_v42  ;;  %v2523_v42 = vsel %vm1565_vm10, %v5353_v15, %v2278_v49  ;;  %v5851_v38 = vld [vmem:[%s5987_s12] ss:$0 sm:$0xff] }
 0x4f6   :  { %v2557_v27 = vsel %vm2550_vm14, %v2536_v29, %v2402_v35  ;;  %v2541_v2 = vsel %vm2529_vm13, %v2520_v20, %v5605_v11  ;;  %v2521_v11 = vsel %vm1565_vm10, %v5330_v5, %v2274_v60  ;;  %v2544_v15 = vsel %vm2529_vm13, %v2523_v42, %v5705_v31 }
 0x4f7   :  { %v2578_v34 = vsel %vm2571_vm15, %v2557_v27, %v5653_v6  ;;  %v2519_v6 = vsel %vm1565_vm10, %v5320_v14, %v2270_v58  ;;  %v2542_v5 = vsel %vm2529_vm13, %v2521_v11, %v5693_v4 }
 0x4f8   :  { %3397 = vmatprep.mubr.msk.f32.mxu0 %vm2609_vm0, %v2578_v34  ;;  %v2540_v14 = vsel %vm2529_vm13, %v2519_v6, %v5681_v62  ;;  %v2524_v62 = vsel %vm1565_vm10, %v5390_v47, %v2280_v17 }
 0x4f9   :  { %v2282_v10 = vpop.permute.xlu1 %2281  ;;  %3398 = vmatmul.mubr.msk.f32.gmra.mrb[26].mxu0 %vm2609_vm0, %v2579_v9  ;;  %v2406_v40 = vpop.permute.xlu0 %2405  ;;  %v2562_v9 = vsel %vm2550_vm14, %v2541_v2, %v2412_v44  ;;  %v2564_v44 = vsel %vm2550_vm14, %v2543_v23, %v2416_v24  ;;  %v2545_v24 = vsel %vm2529_vm13, %v2524_v62, %v5620_v32 }
 0x4fa   :  { %v2559_v45 = vsel %vm2550_vm14, %v2538_v25, %v2406_v40  ;;  %v2583_v37 = vsel %vm2571_vm15, %v2562_v9, %v5687_v53  ;;  %v2585_v47 = vsel %vm2571_vm15, %v2564_v44, %v5699_v48  ;;  %v2566_v54 = vsel %vm2550_vm14, %v2545_v24, %v2420_v36  ;;  %v6054_v36 = vld [vmem:[#allocation6_spill] sm:$0xff] }
 0x4fb   :  { %v2580_v3 = vsel %vm2571_vm15, %v2559_v45, %v5671_v1  ;;  %v2525_v32 = vsel %vm1565_vm10, %v5359_v56, %v2282_v10 }
 0x4fc   :  { %3400 = vmatprep.mubr.msk.f32.mxu0 %vm2609_vm0, %v2580_v3  ;;  %v2546_v56 = vsel %vm2529_vm13, %v2525_v32, %v5711_v8 }
 0x4fd   :  { %v2284_v39 = vpop.permute.xlu1 %2283  ;;  %3401 = vmatmul.mubr.msk.f32.gmra.mrb[28].mxu0 %vm2609_vm0, %v2581_v19  ;;  %v2410_v1 = vpop.permute.xlu0 %2409 }
 0x4fe   :  { %v2561_v58 = vsel %vm2550_vm14, %v2540_v14, %v2410_v1  ;;  %v2526_v4 = vsel %vm1565_vm10, %v5395_v16, %v2284_v39  ;;  %v2587_v16 = vsel %vm2571_vm15, %v2566_v54, %v5709_v26  ;;  %v6051_v26 = vld [vmem:[#allocation3_spill] sm:$0xff] }
 0x4ff   :  { %v2582_v46 = vsel %vm2571_vm15, %v2561_v58, %v5683_v52  ;;  %v2547_v59 = vsel %vm2529_vm13, %v2526_v4, %v5626_v28 }
 0x500   :  { %3403 = vmatprep.mubr.msk.f32.mxu0 %vm2609_vm0, %v2582_v46 }
 0x501   :  { %v2424_v0 = vpop.permute.xlu1 %2423  ;;  %3404 = vmatmul.mubr.msk.f32.gmra.mrb[30].mxu0 %vm2609_vm0, %v2583_v37  ;;  %v2414_v52 = vpop.permute.xlu0 %2413 }
 0x502   :  { %v2563_v60 = vsel %vm2550_vm14, %v2542_v5, %v2414_v52  ;;  %v2568_v33 = vsel %vm2550_vm14, %v2547_v59, %v2424_v0 }
 0x503   :  { %v2584_v53 = vsel %vm2571_vm15, %v2563_v60, %v5695_v50  ;;  %v2589_v28 = vsel %vm2571_vm15, %v2568_v33, %v5715_v7 }
 0x504   :  { %3406 = vmatprep.mubr.msk.f32.mxu0 %vm2609_vm0, %v2584_v53 }
 0x505   :  { %v2286_v63 = vpop.permute.xlu1 %2285  ;;  %3407 = vmatmul.mubr.msk.f32.gmra.mrb[32].mxu0 %vm2609_vm0, %v2585_v47  ;;  %v2418_v50 = vpop.permute.xlu0 %2417 }
 0x506   :  { %v2565_v49 = vsel %vm2550_vm14, %v2544_v15, %v2418_v50  ;;  %v2527_v30 = vsel %vm1565_vm10, %v6051_v26, %v2286_v63 }
 0x507   :  { %v2586_v48 = vsel %vm2571_vm15, %v2565_v49, %v5707_v22 }
 0x508   :  { %3409 = vmatprep.mubr.msk.f32.mxu0 %vm2609_vm0, %v2586_v48 }
 0x509   :  { %v2288_v31 = vpop.permute.xlu1 %2287  ;;  %3410 = vmatmul.mubr.msk.f32.gmra.mrb[34].mxu0 %vm2609_vm0, %v2587_v16  ;;  %v2422_v41 = vpop.permute.xlu0 %2421 }
 0x50a   :  { %v2567_v17 = vsel %vm2550_vm14, %v2546_v56, %v2422_v41  ;;  %v2528_v61 = vsel %vm1565_vm10, %v6052_v13, %v2288_v31 }
 0x50b   :  { %v2588_v22 = vsel %vm2571_vm15, %v2567_v17, %v5713_v51  ;;  %v2549_v18 = vsel %vm2529_vm13, %v2528_v61, %v6053_v12  ;;  %v2548_v51 = vsel %vm2529_vm13, %v2527_v30, %v6054_v36 }
 0x50c   :  { %3412 = vmatprep.mubr.msk.f32.mxu0 %vm2609_vm0, %v2588_v22 }
 0x50d   :  { %v2428_v55 = vpop.permute.xlu1 %2427  ;;  %3413 = vmatmul.mubr.msk.f32.gmra.mrb[36].mxu0 %vm2609_vm0, %v2589_v28  ;;  %v2426_v8 = vpop.permute.xlu0 %2425 }
 0x50e   :  { %v2570_v29 = vsel %vm2550_vm14, %v2549_v18, %v2428_v55  ;;  %v2569_v7 = vsel %vm2550_vm14, %v2548_v51, %v2426_v8 }
 0x511   :  { %v2488_v35 = vpop.permute.xlu1 %2487  ;;  %v2486_v21 = vpop.permute.xlu0 %2485 }
 0x512   :  { %v2591_v27 = vsel %vm2571_vm15, %v2570_v29, %v2488_v35  ;;  %v2590_v34 = vsel %vm2571_vm15, %v2569_v7, %v2486_v21 }
 0x513   :  { %3415 = vmatprep.mubr.msk.f32.mxu0 %vm2609_vm0, %v2590_v34 }
 0x514   :  { %3416 = vmatmul.mubr.msk.f32.gmra.mrb[38].mxu0 %vm2609_vm0, %v2591_v27  ;;  %v3178_v27 = vld [vmem:[#allocation2] ss:$0 sm:$0xff] }
 0x5c0   :  { %v3390_v20 = vpop.f32.mrb[20].mxu0 }
 0x5c1   :  { %v2742_v10 = vadd.f32 %v3390_v20, %v5851_v38  ;;  %v2736_v25 = vpop.f32.mrb[21].mxu0 }
 0x5c2   :  { %v2737_v40 = vadd.f32 %v5851_v38, %v2736_v25 }
 0x5c3   :  { %v2836_v3 = vmax.f32 %v2742_v10, 0.0 }
 0x5c4   :  { %v2835_v6 = vmax.f32 %v2737_v40, 0.0  ;;  %v3393_v45 = vpop.f32.mrb[22].mxu0 }
 0x5c5   :  { %v2752_v2 = vadd.f32 %v3393_v45, %v5851_v38  ;;  %v2746_v19 = vpop.f32.mrb[23].mxu0 }
 0x5c6   :  { %v2747_v9 = vadd.f32 %v5851_v38, %v2746_v19  ;;  %3426 = vmatprep.mubr.msk.f32.mxu1 %vm2529_vm13, %v2835_v6 }
 0x5c7   :  { %3427 = vmatmul.mubr.msk.f32.vlgmr.msra.gmra.mrb[20].mxu1 %vm2529_vm13, %v2836_v3  ;;  %v2838_v14 = vmax.f32 %v2752_v2, 0.0 }
 0x5c8   :  { %v2837_v43 = vmax.f32 %v2747_v9, 0.0  ;;  %v3396_v39 = vpop.f32.mrb[24].mxu0 }
 0x5c9   :  { %v2762_v1 = vadd.f32 %v3396_v39, %v5851_v38  ;;  %v2756_v11 = vpop.f32.mrb[25].mxu0 }
 0x5ca   :  { %v2757_v58 = vadd.f32 %v5851_v38, %v2756_v11  ;;  %3429 = vmatprep.mubr.msk.f32.mxu1 %vm2529_vm13, %v2837_v43 }
 0x5cb   :  { %3430 = vmatmul.mubr.msk.f32.gmra.mrb[22].mxu1 %vm2529_vm13, %v2838_v14  ;;  %v2840_v37 = vmax.f32 %v2762_v1, 0.0 }
 0x5cc   :  { %v2839_v46 = vmax.f32 %v2757_v58, 0.0  ;;  %v3399_v23 = vpop.f32.mrb[26].mxu0 }
 0x5cd   :  { %v2772_v44 = vadd.f32 %v3399_v23, %v5851_v38  ;;  %v2766_v62 = vpop.f32.mrb[27].mxu0 }
 0x5ce   :  { %v2767_v0 = vadd.f32 %v5851_v38, %v2766_v62  ;;  %3432 = vmatprep.mubr.msk.f32.mxu1 %vm2529_vm13, %v2839_v46 }
 0x5cf   :  { %3433 = vmatmul.mubr.msk.f32.gmra.mrb[24].mxu1 %vm2529_vm13, %v2840_v37  ;;  %v2842_v42 = vmax.f32 %v2772_v44, 0.0 }
 0x5d0   :  { %v2841_v5 = vmax.f32 %v2767_v0, 0.0  ;;  %v3402_v52 = vpop.f32.mrb[28].mxu0 }
 0x5d1   :  { %v2782_v60 = vadd.f32 %v3402_v52, %v5851_v38  ;;  %v2776_v53 = vpop.f32.mrb[29].mxu0 }
 0x5d2   :  { %v2777_v24 = vadd.f32 %v5851_v38, %v2776_v53  ;;  %3435 = vmatprep.mubr.msk.f32.mxu1 %vm2529_vm13, %v2841_v5 }
 0x5d3   :  { %3436 = vmatmul.mubr.msk.f32.gmra.mrb[26].mxu1 %vm2529_vm13, %v2842_v42  ;;  %v2844_v4 = vmax.f32 %v2782_v60, 0.0 }
 0x5d4   :  { %v2843_v47 = vmax.f32 %v2777_v24, 0.0  ;;  %v3405_v54 = vpop.f32.mrb[30].mxu0 }
 0x5d5   :  { %v2792_v63 = vadd.f32 %v3405_v54, %v5851_v38  ;;  %v2786_v15 = vpop.f32.mrb[31].mxu0 }
 0x5d6   :  { %v2787_v50 = vadd.f32 %v5851_v38, %v2786_v15  ;;  %3438 = vmatprep.mubr.msk.f32.mxu1 %vm2529_vm13, %v2843_v47 }
 0x5d7   :  { %3439 = vmatmul.mubr.msk.f32.gmra.mrb[28].mxu1 %vm2529_vm13, %v2844_v4  ;;  %v2846_v48 = vmax.f32 %v2792_v63, 0.0 }
 0x5d8   :  { %v2845_v32 = vmax.f32 %v2787_v50, 0.0  ;;  %v3408_v49 = vpop.f32.mrb[32].mxu0 }
 0x5d9   :  { %v2802_v59 = vadd.f32 %v3408_v49, %v5851_v38  ;;  %v2796_v16 = vpop.f32.mrb[33].mxu0 }
 0x5da   :  { %v2797_v33 = vadd.f32 %v5851_v38, %v2796_v16  ;;  %3441 = vmatprep.mubr.msk.f32.mxu1 %vm2529_vm13, %v2845_v32 }
 0x5db   :  { %3442 = vmatmul.mubr.msk.f32.gmra.mrb[30].mxu1 %vm2529_vm13, %v2846_v48  ;;  %v2848_v41 = vmax.f32 %v2802_v59, 0.0 }
 0x5dc   :  { %v2847_v31 = vmax.f32 %v2797_v33, 0.0  ;;  %v3411_v56 = vpop.f32.mrb[34].mxu0 }
 0x5dd   :  { %v2812_v17 = vadd.f32 %v3411_v56, %v5851_v38  ;;  %v2806_v22 = vpop.f32.mrb[35].mxu0 }
 0x5de   :  { %v2807_v28 = vadd.f32 %v5851_v38, %v2806_v22  ;;  %3444 = vmatprep.mubr.msk.f32.mxu1 %vm2529_vm13, %v2847_v31 }
 0x5df   :  { %3445 = vmatmul.mubr.msk.f32.gmra.mrb[32].mxu1 %vm2529_vm13, %v2848_v41  ;;  %v2850_v13 = vmax.f32 %v2812_v17, 0.0 }
 0x5e0   :  { %v2849_v26 = vmax.f32 %v2807_v28, 0.0  ;;  %v3414_v30 = vpop.f32.mrb[36].mxu0 }
 0x5e1   :  { %v2822_v61 = vadd.f32 %v3414_v30, %v5851_v38  ;;  %v2816_v55 = vpop.f32.mrb[37].mxu0 }
 0x5e2   :  { %v2817_v8 = vadd.f32 %v5851_v38, %v2816_v55  ;;  %3447 = vmatprep.mubr.msk.f32.mxu1 %vm2529_vm13, %v2849_v26 }
 0x5e3   :  { %3448 = vmatmul.mubr.msk.f32.gmra.mrb[34].mxu1 %vm2529_vm13, %v2850_v13  ;;  %v2852_v18 = vmax.f32 %v2822_v61, 0.0 }
 0x5e4   :  { %v2851_v12 = vmax.f32 %v2817_v8, 0.0 }
 0x5e6   :  { %3450 = vmatprep.mubr.msk.f32.mxu1 %vm2529_vm13, %v2851_v12 }
 0x5e7   :  { %v3417_v36 = vpop.f32.mrb[38].mxu0  ;;  %3451 = vmatmul.mubr.msk.f32.gmra.mrb[36].mxu1 %vm2529_vm13, %v2852_v18 }
 0x5e8   :  { %v2832_v51 = vadd.f32 %v3417_v36, %v5851_v38  ;;  %v2826_v29 = vpop.f32.mrb[39].mxu0 }
 0x5e9   :  { %v2827_v7 = vadd.f32 %v5851_v38, %v2826_v29 }
 0x5ea   :  { %v2854_v21 = vmax.f32 %v2832_v51, 0.0 }
 0x5eb   :  { %v2853_v35 = vmax.f32 %v2827_v7, 0.0 }
 0x5ed   :  { %3453 = vmatprep.mubr.msk.f32.mxu1 %vm2529_vm13, %v2853_v35 }
 0x5ee   :  { %3454 = vmatmul.mubr.msk.f32.gmra.mrb[38].mxu1 %vm2529_vm13, %v2854_v21 }
 0x69a   :  { %v3428_v34 = vpop.f32.mrb[20].mxu1 }
 0x69b   :  { %v2998_v57 = vadd.f32 %v3428_v34, %v3178_v27  ;;  %v2992_v20 = vpop.f32.mrb[21].mxu1 }
 0x69c   :  { %v2993_v10 = vadd.f32 %v3178_v27, %v2992_v20 }
 0x69d   :  { %3093 = vst.msk [vmem:[%s5988_s15 + $0x8] sm:$0xff] %vm3091_vm1, %v2998_v57 }
 0x69e   :  { %3092 = vst.msk [vmem:[%s5988_s15] sm:$0xff] %vm3091_vm1, %v2993_v10  ;;  %v3431_v38 = vpop.f32.mrb[22].mxu1 }
 0x69f   :  { %v3008_v25 = vadd.f32 %v3431_v38, %v3178_v27  ;;  %v3002_v40 = vpop.f32.mrb[23].mxu1 }
 0x6a0   :  { %v3003_v6 = vadd.f32 %v3178_v27, %v3002_v40 }
 0x6a1   :  { %3095 = vst.msk [vmem:[%s5988_s15 + $0x18] sm:$0xff] %vm3091_vm1, %v3008_v25 }
 0x6a2   :  { %3094 = vst.msk [vmem:[%s5988_s15 + $0x10] sm:$0xff] %vm3091_vm1, %v3003_v6  ;;  %v3434_v45 = vpop.f32.mrb[24].mxu1 }
 0x6a3   :  { %v3018_v3 = vadd.f32 %v3434_v45, %v3178_v27  ;;  %v3012_v2 = vpop.f32.mrb[25].mxu1 }
 0x6a4   :  { %v3013_v19 = vadd.f32 %v3178_v27, %v3012_v2 }
 0x6a5   :  { %3097 = vst.msk [vmem:[%s5988_s15 + $0x28] sm:$0xff] %vm3091_vm1, %v3018_v3 }
 0x6a6   :  { %3096 = vst.msk [vmem:[%s5988_s15 + $0x20] sm:$0xff] %vm3091_vm1, %v3013_v19  ;;  %v3437_v9 = vpop.f32.mrb[26].mxu1 }
 0x6a7   :  { %v3028_v43 = vadd.f32 %v3437_v9, %v3178_v27  ;;  %v3022_v39 = vpop.f32.mrb[27].mxu1 }
 0x6a8   :  { %v3023_v14 = vadd.f32 %v3178_v27, %v3022_v39 }
 0x6a9   :  { %3099 = vst.msk [vmem:[%s5988_s15 + $0x38] sm:$0xff] %vm3091_vm1, %v3028_v43 }
 0x6aa   :  { %3098 = vst.msk [vmem:[%s5988_s15 + $0x30] sm:$0xff] %vm3091_vm1, %v3023_v14  ;;  %v3440_v1 = vpop.f32.mrb[28].mxu1 }
 0x6ab   :  { %v3038_v11 = vadd.f32 %v3440_v1, %v3178_v27  ;;  %v3032_v58 = vpop.f32.mrb[29].mxu1 }
 0x6ac   :  { %v3033_v46 = vadd.f32 %v3178_v27, %v3032_v58 }
 0x6ad   :  { %3101 = vst.msk [vmem:[%s5988_s15 + $0x48] sm:$0xff] %vm3091_vm1, %v3038_v11 }
 0x6ae   :  { %3100 = vst.msk [vmem:[%s5988_s15 + $0x40] sm:$0xff] %vm3091_vm1, %v3033_v46  ;;  %v3443_v23 = vpop.f32.mrb[30].mxu1 }
 0x6af   :  { %v3048_v37 = vadd.f32 %v3443_v23, %v3178_v27  ;;  %v3042_v44 = vpop.f32.mrb[31].mxu1 }
 0x6b0   :  { %v3043_v62 = vadd.f32 %v3178_v27, %v3042_v44 }
 0x6b1   :  { %3103 = vst.msk [vmem:[%s5988_s15 + $0x58] sm:$0xff] %vm3091_vm1, %v3048_v37 }
 0x6b2   :  { %3102 = vst.msk [vmem:[%s5988_s15 + $0x50] sm:$0xff] %vm3091_vm1, %v3043_v62  ;;  %v3446_v0 = vpop.f32.mrb[32].mxu1 }
 0x6b3   :  { %v3058_v5 = vadd.f32 %v3446_v0, %v3178_v27  ;;  %v3052_v52 = vpop.f32.mrb[33].mxu1 }
 0x6b4   :  { %v3053_v42 = vadd.f32 %v3178_v27, %v3052_v52 }
 0x6b5   :  { %3105 = vst.msk [vmem:[%s5988_s15 + $0x68] sm:$0xff] %vm3091_vm1, %v3058_v5 }
 0x6b6   :  { %3104 = vst.msk [vmem:[%s5988_s15 + $0x60] sm:$0xff] %vm3091_vm1, %v3053_v42  ;;  %v3449_v60 = vpop.f32.mrb[34].mxu1 }
 0x6b7   :  { %v3068_v53 = vadd.f32 %v3449_v60, %v3178_v27  ;;  %v3062_v24 = vpop.f32.mrb[35].mxu1 }
 0x6b8   :  { %v3063_v47 = vadd.f32 %v3178_v27, %v3062_v24 }
 0x6b9   :  { %3107 = vst.msk [vmem:[%s5988_s15 + $0x78] sm:$0xff] %vm3091_vm1, %v3068_v53 }
 0x6ba   :  { %3106 = vst.msk [vmem:[%s5988_s15 + $0x70] sm:$0xff] %vm3091_vm1, %v3063_v47  ;;  %v3452_v54 = vpop.f32.mrb[36].mxu1 }
 0x6bb   :  { %v3078_v4 = vadd.f32 %v3452_v54, %v3178_v27  ;;  %v3072_v63 = vpop.f32.mrb[37].mxu1 }
 0x6bc   :  { %v3073_v15 = vadd.f32 %v3178_v27, %v3072_v63 }
 0x6bd   :  { %3109 = vst.msk [vmem:[%s5988_s15 + $0x88] sm:$0xff] %vm3091_vm1, %v3078_v4 }
 0x6be   :  { %3108 = vst.msk [vmem:[%s5988_s15 + $0x80] sm:$0xff] %vm3091_vm1, %v3073_v15 }
 0x6c1   :  { %v3455_v50 = vpop.f32.mrb[38].mxu1 }
 0x6c2   :  { %v3088_v32 = vadd.f32 %v3455_v50, %v3178_v27  ;;  %v3082_v49 = vpop.f32.mrb[39].mxu1 }
 0x6c3   :  { %v3083_v48 = vadd.f32 %v3178_v27, %v3082_v49 }
 0x6c4   :  { %3111 = vst.msk [vmem:[%s5988_s15 + $0x98] sm:$0xff] %vm3091_vm1, %v3088_v32 }
 0x6c5   :  { %3110 = vst.msk [vmem:[%s5988_s15 + $0x90] sm:$0xff] %vm3091_vm1, %v3083_v48 }

</bundles_post_ra>
